<compile_context>
chip_gen: v5e
topology: v5e:2x2
jax: 0.10.0
libtpu: 0.0.40
codegen_flags: <defaults>
</compile_context>

<pallas_src>
import functools

import jax
import jax.numpy as jnp
from jax import lax
from jax.experimental import pallas as pl
from jax.experimental.pallas import tpu as pltpu

NEG_SLOPE = 0.1
BN_EPS = 1e-5


def _leaky(x):
    return jnp.where(x >= 0, x, NEG_SLOPE * x)


@functools.lru_cache(maxsize=None)
def _vmem_limit_bytes():
    """Scoped-VMEM budget sized per TPU generation (conservative fallback)."""
    cap = 64 * 1024 * 1024
    try:
        cap = int(pltpu.get_tpu_info().vmem_capacity_bytes)
    except Exception:           # best-effort hardware query
        pass
    # leave headroom for Mosaic internals: ~100 MiB on v5e/v6e (128 MiB physical),
    # ~48 MiB on v7x (64 MiB physical per TensorCore).
    return int(max(32 * 1024 * 1024, min(cap - 16 * 1024 * 1024, 100 * 1024 * 1024)))


# ----------------------------- fused stage kernel ---------------------------
# One grid step (b, h) computes `th` output rows of
#   z = LeakyReLU(x * scale + shift)     (scale/shift = BN of previous stage, or 1/0)
#   y = depthwise_conv(z, dw; stride) @ pw
# and accumulates per-image (sum, sum_sq) of y so BatchNorm statistics become a
# cheap host-side reduction over (n, 2, Cout).

def _stage_kernel(x_ref, scale_ref, shift_ref, dw_ref, pw_ref,
                  y_ref, st_ref, xp_ref, *, k, stride, pad, th, Ho):
    h_idx = pl.program_id(1)
    _, H, W, C = x_ref.shape
    Hp_alloc, Wp, _ = xp_ref.shape
    _, _, Wo, Cout = y_ref.shape

    # Once per batch element: build the affine+LeakyReLU'd zero-padded image in VMEM
    # scratch (resident across the inner "arbitrary" h axis) and reset the BN partial
    # sums (the st output block is h-resident, so it acts as an accumulator).
    @pl.when(h_idx == 0)
    def _init():
        if pad > 0:                                           # zero only the border
            xp_ref[:, 0:pad, :] = jnp.zeros((Hp_alloc, pad, C), jnp.float32)
            xp_ref[:, pad + W:Wp, :] = jnp.zeros((Hp_alloc, Wp - W - pad, C), jnp.float32)
            xp_ref[0:pad, :, :] = jnp.zeros((pad, Wp, C), jnp.float32)
        if Hp_alloc > pad + H:                                # bottom pad + tail halo rows
            xp_ref[pad + H:Hp_alloc, :, :] = jnp.zeros((Hp_alloc - pad - H, Wp, C),
                                                       jnp.float32)
        z = x_ref[0].astype(jnp.float32) * scale_ref[0] + shift_ref[0]
        xp_ref[pad:pad + H, pad:pad + W, :] = _leaky(z)
        st_ref[...] = jnp.zeros_like(st_ref)

    row0 = h_idx * (th * stride)
    if (th * stride) % 8 == 0:
        row0 = pl.multiple_of(row0, 8)

    # Depthwise conv: k*k broadcast-MACs on the VPU, taps read directly from the
    # padded scratch ref (no materialized slab, accumulator tile stays in vregs).
    w = dw_ref[...].astype(jnp.float32)                       # (k, k, C)
    acc = jnp.zeros((th, Wo, C), jnp.float32)
    if stride == 1:
        for i in range(k):
            for j in range(k):
                patch = xp_ref[pl.ds(row0 + i, th), j:j + Wo, :]
                acc = acc + patch * w[i, j]
    else:
        in_rows = (th - 1) * stride + k
        xin = xp_ref[pl.ds(row0, in_rows), :, :]
        for i in range(k):
            for j in range(k):
                patch = xin[i:i + stride * th:stride, j:j + stride * Wo:stride, :]
                acc = acc + patch * w[i, j]

    # 1x1 conv: one big MXU matmul over the whole row tile, one block store.
    pw = pw_ref[...].astype(jnp.float32)                      # (C, Cout)
    out2 = jnp.dot(acc.reshape(th * Wo, C), pw, preferred_element_type=jnp.float32)
    y_ref[...] = out2.reshape(1, th, Wo, Cout).astype(y_ref.dtype)

    # BN partial sums. If the last tile hangs over Ho, mask the invalid rows
    # (their y writes are dropped by Pallas, but stats must not see them).
    if Ho % th != 0:
        flat = lax.broadcasted_iota(jnp.int32, (th * Wo, 1), 0)
        out2 = jnp.where(flat < (Ho - h_idx * th) * Wo, out2, 0.0)
    st_ref[...] += jnp.stack([jnp.sum(out2, axis=0),
                              jnp.sum(out2 * out2, axis=0)])[None]


def _fused_stage(x, scale, shift, dw, pw, *, k, stride, pad):
    n, H, W, C = x.shape
    Cout = pw.shape[1]
    Hp, Wp = H + 2 * pad, W + 2 * pad
    Ho = (Hp - k) // stride + 1
    Wo = (Wp - k) // stride + 1

    vmem = _vmem_limit_bytes()
    # Per-step VMEM already committed (f32): double-buffered input image, padded
    # scratch (+ halo rows), weights.
    fixed = 4 * (2 * H * W * C + (Hp + 8) * Wp * C + k * k * C + C * Cout)
    # Per-output-row cost: y block (double-buffered) + depthwise accumulator +
    # matmul result + one in-flight tap patch.
    per_row = 4 * Wo * (2 * Cout + C + Cout + C)
    avail = int(vmem * 0.7) - fixed
    th = int(max(1, min(Ho, avail // per_row))) if avail > 0 else 1
    if th < Ho and th >= 8:
        th = (th // 8) * 8                       # keep dynamic row offsets 8-aligned
    nh = -(-Ho // th)
    Hp_alloc = max(Hp, (nh * th - 1) * stride + k)   # cover the tail tile's taps
    # TODO(synk): for very large feature maps on v7x (64 MiB VMEM) the full-image
    # input block + padded scratch should be replaced by incremental per-tile fills.

    kern = functools.partial(_stage_kernel, k=k, stride=stride, pad=pad, th=th, Ho=Ho)
    y, st = pl.pallas_call(
        kern,
        grid=(n, nh),
        in_specs=[
            pl.BlockSpec((1, H, W, C), lambda b, h: (b, 0, 0, 0)),   # full image per b
            pl.BlockSpec((1, C), lambda b, h: (0, 0)),               # prev-stage BN scale
            pl.BlockSpec((1, C), lambda b, h: (0, 0)),               # prev-stage BN shift
            pl.BlockSpec((k, k, C), lambda b, h: (0, 0, 0)),         # depthwise taps
            pl.BlockSpec((C, Cout), lambda b, h: (0, 0)),            # 1x1 weights
        ],
        out_specs=[
            pl.BlockSpec((1, th, Wo, Cout), lambda b, h: (b, h, 0, 0)),
            pl.BlockSpec((1, 2, Cout), lambda b, h: (b, 0, 0)),      # resident accumulator
        ],
        out_shape=[
            jax.ShapeDtypeStruct((n, Ho, Wo, Cout), jnp.float32),
            jax.ShapeDtypeStruct((n, 2, Cout), jnp.float32),
        ],
        scratch_shapes=[pltpu.VMEM((Hp_alloc, Wp, C), jnp.float32)],
        compiler_params=pltpu.CompilerParams(
            dimension_semantics=("parallel", "arbitrary"),
            vmem_limit_bytes=vmem),
        # TODO(synk): with N==1 only one TensorCore is used on v7x; an extra
        # parallel axis over row groups would be needed to fill both cores.
    )(x, scale, shift, dw, pw)
    return y, st


# ------------------------------ BN apply kernel ------------------------------

def _bn_apply_kernel(y_ref, scale_ref, shift_ref, o_ref):
    y = y_ref[...].astype(jnp.float32)
    o_ref[...] = (y * scale_ref[...] + shift_ref[...]).astype(o_ref.dtype)


def _bn_apply(y, scale, shift):
    """Final BatchNorm affine over a lane-dense (N*H, W*C) view with large row blocks."""
    n, H, W, C = y.shape
    R, L = n * H, W * C
    y2 = y.reshape(R, L)
    # per-channel scale/shift tiled so the flattened last dim (w*C + c) broadcasts right
    scale_l = jnp.tile(scale.reshape(1, C), (1, W))
    shift_l = jnp.tile(shift.reshape(1, C), (1, W))

    vmem = _vmem_limit_bytes()
    max_rows = max(8, int(vmem * 0.5) // (4 * 4 * L))        # in+out, double-buffered
    if R <= max_rows:
        tr = R
    else:
        tr = max(8, (min(max_rows, 1024) // 8) * 8)
    nr = -(-R // tr)
    out = pl.pallas_call(
        _bn_apply_kernel,
        grid=(nr,),
        in_specs=[
            pl.BlockSpec((tr, L), lambda i: (i, 0)),
            pl.BlockSpec((1, L), lambda i: (0, 0)),
            pl.BlockSpec((1, L), lambda i: (0, 0)),
        ],
        out_specs=pl.BlockSpec((tr, L), lambda i: (i, 0)),
        out_shape=jax.ShapeDtypeStruct((R, L), jnp.float32),
        compiler_params=pltpu.CompilerParams(
            dimension_semantics=("parallel",),
            vmem_limit_bytes=vmem),
    )(y2, scale_l, shift_l)
    return out.reshape(n, H, W, C)


def _bn_affine(partials, count, gamma, beta):
    """Combine per-image (sum, sum_sq) partials into BN scale/shift (torch training BN)."""
    tot = jnp.sum(partials, axis=0)                           # (2, C)
    mean = tot[0] / count
    var = jnp.maximum(tot[1] / count - mean * mean, 0.0)      # biased variance
    scale = gamma.reshape(-1) * lax.rsqrt(var + BN_EPS)
    shift = beta.reshape(-1) - mean * scale
    return scale.reshape(1, -1), shift.reshape(1, -1)


# --------------------------------- wrapper -----------------------------------

def sep_conv_forward(x_nchw, params, *, kernel_size, stride, padding):
    k, s, p = kernel_size, stride, padding
    # TODO(synk): NCHW<->NHWC boundary transposes are left to XLA; an NHWC-native
    # caller (or fusing the transpose into the first/last DMA) would save 2 HBM passes.
    x = jnp.transpose(x_nchw, (0, 2, 3, 1)).astype(jnp.float32)
    n, h, w, c = x.shape

    ones_c = jnp.ones((1, c), jnp.float32)
    zeros_c = jnp.zeros((1, c), jnp.float32)
    dw1 = params["dw1"].reshape(k, k, c)
    dw2 = params["dw2"].reshape(k, k, c)

    # stage 1: LeakyReLU + depthwise conv (stride s) + 1x1 conv, BN1 partial sums
    h1 = (h + 2 * p - k) // s + 1
    w1 = (w + 2 * p - k) // s + 1
    y1, st1 = _fused_stage(x, ones_c, zeros_c, dw1, params["pw1"], k=k, stride=s, pad=p)
    scale1, shift1 = _bn_affine(st1, n * h1 * w1, params["g1"], params["b1"])

    # stage 2: BN1 + LeakyReLU + depthwise conv (stride 1) + 1x1 conv, BN2 partial sums
    h2 = h1 + 2 * p - k + 1
    w2 = w1 + 2 * p - k + 1
    y2, st2 = _fused_stage(y1, scale1, shift1, dw2, params["pw2"], k=k, stride=1, pad=p)
    scale2, shift2 = _bn_affine(st2, n * h2 * w2, params["g2"], params["b2"])

    out = _bn_apply(y2, scale2, shift2)                       # (n, h2, w2, c_out) NHWC
    return jnp.transpose(out, (0, 3, 1, 2))                   # NHWC -> NCHW


def init_params(key, c_in, c_out, k):
    k1, k2, k3, k4 = jax.random.split(key, 4)
    return {
        # depthwise weights, layout (k, k, 1, C)  (== torch (C,1,k,k) transposed)
        "dw1": 0.2 * jax.random.normal(k1, (k, k, 1, c_in), jnp.float32),
        "dw2": 0.2 * jax.random.normal(k3, (k, k, 1, c_in), jnp.float32),
        # pointwise weights, layout (Cin, Cout)   (== torch (Cout,Cin,1,1) transposed)
        "pw1": jax.random.normal(k2, (c_in, c_in), jnp.float32) / jnp.sqrt(c_in),
        "pw2": jax.random.normal(k4, (c_in, c_out), jnp.float32) / jnp.sqrt(c_in),
        # BatchNorm affine params (PyTorch init: weight=1, bias=0)
        "g1": jnp.ones((1, c_in), jnp.float32),
        "b1": jnp.zeros((1, c_in), jnp.float32),
        "g2": jnp.ones((1, c_out), jnp.float32),
        "b2": jnp.zeros((1, c_out), jnp.float32),
    }
    # TODO(synk): BatchNorm running_mean/running_var momentum buffers are not
    # materialized; only the training-mode normalization math is reproduced.


# ------------------------- pure-JAX reference check --------------------------

def _reference(x_nchw, params, *, kernel_size, stride, padding):
    k, s, p = kernel_size, stride, padding
    x = jnp.transpose(x_nchw, (0, 2, 3, 1)).astype(jnp.float32)

    def dwconv(z, wt, st):
        return lax.conv_general_dilated(
            z, wt, window_strides=(st, st), padding=[(p, p), (p, p)],
            dimension_numbers=("NHWC", "HWIO", "NHWC"),
            feature_group_count=z.shape[-1])

    def pwconv(z, wt):
        return lax.conv_general_dilated(
            z, wt.reshape(1, 1, wt.shape[0], wt.shape[1]), (1, 1),
            padding=[(0, 0), (0, 0)],
            dimension_numbers=("NHWC", "HWIO", "NHWC"))

    def bn(z, g, b):
        mean = z.mean(axis=(0, 1, 2), keepdims=True)
        var = ((z - mean) ** 2).mean(axis=(0, 1, 2), keepdims=True)
        return (z - mean) * lax.rsqrt(var + BN_EPS) * g.reshape(1, 1, 1, -1) \
            + b.reshape(1, 1, 1, -1)

    y = _leaky(x)
    y = dwconv(y, params["dw1"], s)
    y = pwconv(y, params["pw1"])
    y = bn(y, params["g1"], params["b1"])
    y = _leaky(y)
    y = dwconv(y, params["dw2"], 1)
    y = pwconv(y, params["pw2"])
    y = bn(y, params["g2"], params["b2"])
    return jnp.transpose(y, (0, 3, 1, 2))


if __name__ == "__main__":
    N, C_IN, C_OUT, H, W = 2, 4, 8, 16, 16
    K, STRIDE, PAD = 3, 1, 1

    key = jax.random.PRNGKey(0)
    kx, kp = jax.random.split(key)
    x = jax.random.normal(kx, (N, C_IN, H, W), jnp.float32)
    params = init_params(kp, C_IN, C_OUT, K)

    fwd = jax.jit(functools.partial(
        sep_conv_forward, kernel_size=K, stride=STRIDE, padding=PAD))
    out = jax.block_until_ready(fwd(x, params))

    ref = jax.block_until_ready(
        _reference(x, params, kernel_size=K, stride=STRIDE, padding=PAD))

    assert out.shape == (N, C_OUT, H, W), out.shape
    assert jnp.allclose(out, ref, atol=1e-3, rtol=1e-3), \
        float(jnp.max(jnp.abs(out - ref)))
    print("KERNEL_OK")
</pallas_src>

<mosaic_0001>
module attributes {stable_mosaic.version = 11 : i64} {
  func.func @_stage_kernel(%arg0: i32, %arg1: i32, %arg2: memref<1x16x16x4xf32, #tpu.memory_space<vmem>>, %arg3: memref<1x4xf32, #tpu.memory_space<vmem>>, %arg4: memref<1x4xf32, #tpu.memory_space<vmem>>, %arg5: memref<3x3x4xf32, #tpu.memory_space<vmem>>, %arg6: memref<4x4xf32, #tpu.memory_space<vmem>>, %arg7: memref<1x16x16x4xf32, #tpu.memory_space<vmem>>, %arg8: memref<1x2x4xf32, #tpu.memory_space<vmem>>, %arg9: memref<18x18x4xf32, #tpu.memory_space<vmem>>) attributes {dimension_semantics = [#tpu.dimension_semantics<parallel>, #tpu.dimension_semantics<arbitrary>], iteration_bounds = array<i64: 2, 1>, scalar_prefetch = 0 : i64, scratch_operands = 1 : i64, tpu.core_type = #tpu.core_type<tc>, window_params = [{transform_indices = @transform_0, window_bounds = array<i64: 1, 16, 16, 4>}, {pipeline_mode = #tpu.pipeline_mode<synchronous>, transform_indices = @transform_1, window_bounds = array<i64: 1, 4>}, {pipeline_mode = #tpu.pipeline_mode<synchronous>, transform_indices = @transform_2, window_bounds = array<i64: 1, 4>}, {pipeline_mode = #tpu.pipeline_mode<synchronous>, transform_indices = @transform_3, window_bounds = array<i64: 3, 3, 4>}, {pipeline_mode = #tpu.pipeline_mode<synchronous>, transform_indices = @transform_4, window_bounds = array<i64: 4, 4>}, {transform_indices = @transform_5, window_bounds = array<i64: 1, 16, 16, 4>}, {transform_indices = @transform_6, window_bounds = array<i64: 1, 2, 4>}]} {
    %c0_i32 = arith.constant 0 : i32
    %0 = arith.cmpi eq, %arg1, %c0_i32 : i32
    %1 = arith.extui %0 : i1 to i32
    %c0_i32_0 = arith.constant 0 : i32
    %2 = arith.cmpi ne, %1, %c0_i32_0 : i32
    scf.if %2 {
      %cst_41 = arith.constant 0.000000e+00 : f32
      %103 = vector.broadcast %cst_41 : f32 to vector<18x1x4xf32>
      %c0_42 = arith.constant 0 : index
      %c0_43 = arith.constant 0 : index
      %c0_44 = arith.constant 0 : index
      %104 = vector.load %arg9[%c0_42, %c0_43, %c0_44] : memref<18x18x4xf32, #tpu.memory_space<vmem>>, vector<18x1x4xf32>
      tpu.vector_store %arg9[%c0_42, %c0_43, %c0_44], %103 {strides = array<i32>} : memref<18x18x4xf32, #tpu.memory_space<vmem>>, vector<18x1x4xf32>,
      %cst_45 = arith.constant 0.000000e+00 : f32
      %105 = vector.broadcast %cst_45 : f32 to vector<18x1x4xf32>
      %c0_46 = arith.constant 0 : index
      %c17 = arith.constant 17 : index
      %c0_47 = arith.constant 0 : index
      %106 = vector.load %arg9[%c0_46, %c17, %c0_47] : memref<18x18x4xf32, #tpu.memory_space<vmem>>, vector<18x1x4xf32>
      tpu.vector_store %arg9[%c0_46, %c17, %c0_47], %105 {strides = array<i32>} : memref<18x18x4xf32, #tpu.memory_space<vmem>>, vector<18x1x4xf32>,
      %cst_48 = arith.constant 0.000000e+00 : f32
      %107 = vector.broadcast %cst_48 : f32 to vector<1x18x4xf32>
      %c0_49 = arith.constant 0 : index
      %c0_50 = arith.constant 0 : index
      %c0_51 = arith.constant 0 : index
      %108 = vector.load %arg9[%c0_49, %c0_50, %c0_51] : memref<18x18x4xf32, #tpu.memory_space<vmem>>, vector<1x18x4xf32>
      tpu.vector_store %arg9[%c0_49, %c0_50, %c0_51], %107 {strides = array<i32>} : memref<18x18x4xf32, #tpu.memory_space<vmem>>, vector<1x18x4xf32>,
      %cst_52 = arith.constant 0.000000e+00 : f32
      %109 = vector.broadcast %cst_52 : f32 to vector<1x18x4xf32>
      %c17_53 = arith.constant 17 : index
      %c0_54 = arith.constant 0 : index
      %c0_55 = arith.constant 0 : index
      %110 = vector.load %arg9[%c17_53, %c0_54, %c0_55] : memref<18x18x4xf32, #tpu.memory_space<vmem>>, vector<1x18x4xf32>
      tpu.vector_store %arg9[%c17_53, %c0_54, %c0_55], %109 {strides = array<i32>} : memref<18x18x4xf32, #tpu.memory_space<vmem>>, vector<1x18x4xf32>,
      %c0_56 = arith.constant 0 : index
      %c0_57 = arith.constant 0 : index
      %c0_58 = arith.constant 0 : index
      %c0_59 = arith.constant 0 : index
      %111 = vector.load %arg2[%c0_56, %c0_57, %c0_58, %c0_59] : memref<1x16x16x4xf32, #tpu.memory_space<vmem>>, vector<1x16x16x4xf32>
      %112 = vector.shape_cast %111 : vector<1x16x16x4xf32> to vector<16x16x4xf32>
      %c0_60 = arith.constant 0 : index
      %c0_61 = arith.constant 0 : index
      %113 = vector.load %arg3[%c0_60, %c0_61] : memref<1x4xf32, #tpu.memory_space<vmem>>, vector<1x4xf32>
      %114 = vector.shape_cast %113 : vector<1x4xf32> to vector<4xf32>
      %115 = vector.shape_cast %114 : vector<4xf32> to vector<1x1x4xf32>
      %116 = vector.broadcast %115 : vector<1x1x4xf32> to vector<16x16x4xf32>
      %117 = arith.mulf %112, %116 : vector<16x16x4xf32>
      %c0_62 = arith.constant 0 : index
      %c0_63 = arith.constant 0 : index
      %118 = vector.load %arg4[%c0_62, %c0_63] : memref<1x4xf32, #tpu.memory_space<vmem>>, vector<1x4xf32>
      %119 = vector.shape_cast %118 : vector<1x4xf32> to vector<4xf32>
      %120 = vector.shape_cast %119 : vector<4xf32> to vector<1x1x4xf32>
      %121 = vector.broadcast %120 : vector<1x1x4xf32> to vector<16x16x4xf32>
      %122 = arith.addf %117, %121 : vector<16x16x4xf32>
      %cst_64 = arith.constant 0.000000e+00 : f32
      %123 = vector.broadcast %cst_64 : f32 to vector<16x16x4xf32>
      %124 = arith.cmpf oge, %122, %123 : vector<16x16x4xf32>
      %cst_65 = arith.constant 1.000000e-01 : f32
      %125 = vector.broadcast %cst_65 : f32 to vector<16x16x4xf32>
      %126 = arith.mulf %125, %122 : vector<16x16x4xf32>
      %127 = arith.select %124, %122, %126 : vector<16x16x4xi1>, vector<16x16x4xf32>
      %c1_66 = arith.constant 1 : index
      %c1_67 = arith.constant 1 : index
      %c0_68 = arith.constant 0 : index
      %128 = vector.load %arg9[%c1_66, %c1_67, %c0_68] : memref<18x18x4xf32, #tpu.memory_space<vmem>>, vector<16x16x4xf32>
      tpu.vector_store %arg9[%c1_66, %c1_67, %c0_68], %127 {strides = array<i32>} : memref<18x18x4xf32, #tpu.memory_space<vmem>>, vector<16x16x4xf32>,
      %cst_69 = arith.constant 0.000000e+00 : f32
      %129 = vector.broadcast %cst_69 : f32 to vector<1x2x4xf32>
      %c0_70 = arith.constant 0 : index
      %c0_71 = arith.constant 0 : index
      %c0_72 = arith.constant 0 : index
      %130 = vector.load %arg8[%c0_70, %c0_71, %c0_72] : memref<1x2x4xf32, #tpu.memory_space<vmem>>, vector<1x2x4xf32>
      tpu.vector_store %arg8[%c0_70, %c0_71, %c0_72], %129 {strides = array<i32>} : memref<1x2x4xf32, #tpu.memory_space<vmem>>, vector<1x2x4xf32>,
    } else {
    }
    %c16_i32 = arith.constant 16 : i32
    %3 = arith.muli %arg1, %c16_i32 : i32
    %4 = tpu.assume_multiple %3, 8 : i32
    %c0 = arith.constant 0 : index
    %c0_1 = arith.constant 0 : index
    %c0_2 = arith.constant 0 : index
    %5 = vector.load %arg5[%c0, %c0_1, %c0_2] : memref<3x3x4xf32, #tpu.memory_space<vmem>>, vector<3x3x4xf32>
    %cst = arith.constant 0.000000e+00 : f32
    %6 = vector.broadcast %cst : f32 to vector<16x16x4xf32>
    %c0_i32_3 = arith.constant 0 : i32
    %7 = arith.addi %4, %c0_i32_3 : i32
    %8 = arith.index_cast %7 : i32 to index
    %c0_4 = arith.constant 0 : index
    %c0_5 = arith.constant 0 : index
    %9 = vector.load %arg9[%8, %c0_4, %c0_5] : memref<18x18x4xf32, #tpu.memory_space<vmem>>, vector<16x16x4xf32>
    %10 = vector.extract_strided_slice %5 {offsets = [0, 0, 0], sizes = [1, 1, 4], strides = [1, 1, 1]} : vector<3x3x4xf32> to vector<1x1x4xf32>
    %11 = vector.shape_cast %10 : vector<1x1x4xf32> to vector<4xf32>
    %12 = vector.shape_cast %11 : vector<4xf32> to vector<1x1x4xf32>
    %13 = vector.broadcast %12 : vector<1x1x4xf32> to vector<16x16x4xf32>
    %14 = arith.mulf %9, %13 : vector<16x16x4xf32>
    %15 = arith.addf %6, %14 : vector<16x16x4xf32>
    %c0_i32_6 = arith.constant 0 : i32
    %16 = arith.addi %4, %c0_i32_6 : i32
    %17 = arith.index_cast %16 : i32 to index
    %c1 = arith.constant 1 : index
    %c0_7 = arith.constant 0 : index
    %18 = vector.load %arg9[%17, %c1, %c0_7] : memref<18x18x4xf32, #tpu.memory_space<vmem>>, vector<16x16x4xf32>
    %19 = vector.extract_strided_slice %5 {offsets = [0, 1, 0], sizes = [1, 1, 4], strides = [1, 1, 1]} : vector<3x3x4xf32> to vector<1x1x4xf32>
    %20 = vector.shape_cast %19 : vector<1x1x4xf32> to vector<4xf32>
    %21 = vector.shape_cast %20 : vector<4xf32> to vector<1x1x4xf32>
    %22 = vector.broadcast %21 : vector<1x1x4xf32> to vector<16x16x4xf32>
    %23 = arith.mulf %18, %22 : vector<16x16x4xf32>
    %24 = arith.addf %15, %23 : vector<16x16x4xf32>
    %c0_i32_8 = arith.constant 0 : i32
    %25 = arith.addi %4, %c0_i32_8 : i32
    %26 = arith.index_cast %25 : i32 to index
    %c2 = arith.constant 2 : index
    %c0_9 = arith.constant 0 : index
    %27 = vector.load %arg9[%26, %c2, %c0_9] : memref<18x18x4xf32, #tpu.memory_space<vmem>>, vector<16x16x4xf32>
    %28 = vector.extract_strided_slice %5 {offsets = [0, 2, 0], sizes = [1, 1, 4], strides = [1, 1, 1]} : vector<3x3x4xf32> to vector<1x1x4xf32>
    %29 = vector.shape_cast %28 : vector<1x1x4xf32> to vector<4xf32>
    %30 = vector.shape_cast %29 : vector<4xf32> to vector<1x1x4xf32>
    %31 = vector.broadcast %30 : vector<1x1x4xf32> to vector<16x16x4xf32>
    %32 = arith.mulf %27, %31 : vector<16x16x4xf32>
    %33 = arith.addf %24, %32 : vector<16x16x4xf32>
    %c1_i32 = arith.constant 1 : i32
    %34 = arith.addi %4, %c1_i32 : i32
    %35 = arith.index_cast %34 : i32 to index
    %c0_10 = arith.constant 0 : index
    %c0_11 = arith.constant 0 : index
    %36 = vector.load %arg9[%35, %c0_10, %c0_11] : memref<18x18x4xf32, #tpu.memory_space<vmem>>, vector<16x16x4xf32>
    %37 = vector.extract_strided_slice %5 {offsets = [1, 0, 0], sizes = [1, 1, 4], strides = [1, 1, 1]} : vector<3x3x4xf32> to vector<1x1x4xf32>
    %38 = vector.shape_cast %37 : vector<1x1x4xf32> to vector<4xf32>
    %39 = vector.shape_cast %38 : vector<4xf32> to vector<1x1x4xf32>
    %40 = vector.broadcast %39 : vector<1x1x4xf32> to vector<16x16x4xf32>
    %41 = arith.mulf %36, %40 : vector<16x16x4xf32>
    %42 = arith.addf %33, %41 : vector<16x16x4xf32>
    %c1_i32_12 = arith.constant 1 : i32
    %43 = arith.addi %4, %c1_i32_12 : i32
    %44 = arith.index_cast %43 : i32 to index
    %c1_13 = arith.constant 1 : index
    %c0_14 = arith.constant 0 : index
    %45 = vector.load %arg9[%44, %c1_13, %c0_14] : memref<18x18x4xf32, #tpu.memory_space<vmem>>, vector<16x16x4xf32>
    %46 = vector.extract_strided_slice %5 {offsets = [1, 1, 0], sizes = [1, 1, 4], strides = [1, 1, 1]} : vector<3x3x4xf32> to vector<1x1x4xf32>
    %47 = vector.shape_cast %46 : vector<1x1x4xf32> to vector<4xf32>
    %48 = vector.shape_cast %47 : vector<4xf32> to vector<1x1x4xf32>
    %49 = vector.broadcast %48 : vector<1x1x4xf32> to vector<16x16x4xf32>
    %50 = arith.mulf %45, %49 : vector<16x16x4xf32>
    %51 = arith.addf %42, %50 : vector<16x16x4xf32>
    %c1_i32_15 = arith.constant 1 : i32
    %52 = arith.addi %4, %c1_i32_15 : i32
    %53 = arith.index_cast %52 : i32 to index
    %c2_16 = arith.constant 2 : index
    %c0_17 = arith.constant 0 : index
    %54 = vector.load %arg9[%53, %c2_16, %c0_17] : memref<18x18x4xf32, #tpu.memory_space<vmem>>, vector<16x16x4xf32>
    %55 = vector.extract_strided_slice %5 {offsets = [1, 2, 0], sizes = [1, 1, 4], strides = [1, 1, 1]} : vector<3x3x4xf32> to vector<1x1x4xf32>
    %56 = vector.shape_cast %55 : vector<1x1x4xf32> to vector<4xf32>
    %57 = vector.shape_cast %56 : vector<4xf32> to vector<1x1x4xf32>
    %58 = vector.broadcast %57 : vector<1x1x4xf32> to vector<16x16x4xf32>
    %59 = arith.mulf %54, %58 : vector<16x16x4xf32>
    %60 = arith.addf %51, %59 : vector<16x16x4xf32>
    %c2_i32 = arith.constant 2 : i32
    %61 = arith.addi %4, %c2_i32 : i32
    %62 = arith.index_cast %61 : i32 to index
    %c0_18 = arith.constant 0 : index
    %c0_19 = arith.constant 0 : index
    %63 = vector.load %arg9[%62, %c0_18, %c0_19] : memref<18x18x4xf32, #tpu.memory_space<vmem>>, vector<16x16x4xf32>
    %64 = vector.extract_strided_slice %5 {offsets = [2, 0, 0], sizes = [1, 1, 4], strides = [1, 1, 1]} : vector<3x3x4xf32> to vector<1x1x4xf32>
    %65 = vector.shape_cast %64 : vector<1x1x4xf32> to vector<4xf32>
    %66 = vector.shape_cast %65 : vector<4xf32> to vector<1x1x4xf32>
    %67 = vector.broadcast %66 : vector<1x1x4xf32> to vector<16x16x4xf32>
    %68 = arith.mulf %63, %67 : vector<16x16x4xf32>
    %69 = arith.addf %60, %68 : vector<16x16x4xf32>
    %c2_i32_20 = arith.constant 2 : i32
    %70 = arith.addi %4, %c2_i32_20 : i32
    %71 = arith.index_cast %70 : i32 to index
    %c1_21 = arith.constant 1 : index
    %c0_22 = arith.constant 0 : index
    %72 = vector.load %arg9[%71, %c1_21, %c0_22] : memref<18x18x4xf32, #tpu.memory_space<vmem>>, vector<16x16x4xf32>
    %73 = vector.extract_strided_slice %5 {offsets = [2, 1, 0], sizes = [1, 1, 4], strides = [1, 1, 1]} : vector<3x3x4xf32> to vector<1x1x4xf32>
    %74 = vector.shape_cast %73 : vector<1x1x4xf32> to vector<4xf32>
    %75 = vector.shape_cast %74 : vector<4xf32> to vector<1x1x4xf32>
    %76 = vector.broadcast %75 : vector<1x1x4xf32> to vector<16x16x4xf32>
    %77 = arith.mulf %72, %76 : vector<16x16x4xf32>
    %78 = arith.addf %69, %77 : vector<16x16x4xf32>
    %c2_i32_23 = arith.constant 2 : i32
    %79 = arith.addi %4, %c2_i32_23 : i32
    %80 = arith.index_cast %79 : i32 to index
    %c2_24 = arith.constant 2 : index
    %c0_25 = arith.constant 0 : index
    %81 = vector.load %arg9[%80, %c2_24, %c0_25] : memref<18x18x4xf32, #tpu.memory_space<vmem>>, vector<16x16x4xf32>
    %82 = vector.extract_strided_slice %5 {offsets = [2, 2, 0], sizes = [1, 1, 4], strides = [1, 1, 1]} : vector<3x3x4xf32> to vector<1x1x4xf32>
    %83 = vector.shape_cast %82 : vector<1x1x4xf32> to vector<4xf32>
    %84 = vector.shape_cast %83 : vector<4xf32> to vector<1x1x4xf32>
    %85 = vector.broadcast %84 : vector<1x1x4xf32> to vector<16x16x4xf32>
    %86 = arith.mulf %81, %85 : vector<16x16x4xf32>
    %87 = arith.addf %78, %86 : vector<16x16x4xf32>
    %c0_26 = arith.constant 0 : index
    %c0_27 = arith.constant 0 : index
    %88 = vector.load %arg6[%c0_26, %c0_27] : memref<4x4xf32, #tpu.memory_space<vmem>>, vector<4x4xf32>
    %89 = vector.shape_cast %87 : vector<16x16x4xf32> to vector<256x4xf32>
    %cst_28 = arith.constant dense<0.000000e+00> : vector<256x4xf32>
    %90 = tpu.matmul %89, %88, %cst_28 {dimension_numbers = #tpu.dot_dimension_numbers<[1], [0], [0], [1], [0, 0, 1, 1], [], []>} : vector<256x4xf32>, vector<4x4xf32>, vector<256x4xf32> -> vector<256x4xf32>
    %91 = vector.shape_cast %90 : vector<256x4xf32> to vector<1x16x16x4xf32>
    %c0_29 = arith.constant 0 : index
    %c0_30 = arith.constant 0 : index
    %c0_31 = arith.constant 0 : index
    %c0_32 = arith.constant 0 : index
    %92 = vector.load %arg7[%c0_29, %c0_30, %c0_31, %c0_32] : memref<1x16x16x4xf32, #tpu.memory_space<vmem>>, vector<1x16x16x4xf32>
    tpu.vector_store %arg7[%c0_29, %c0_30, %c0_31, %c0_32], %91 {strides = array<i32>} : memref<1x16x16x4xf32, #tpu.memory_space<vmem>>, vector<1x16x16x4xf32>,
    %c0_33 = arith.constant 0 : index
    %c0_34 = arith.constant 0 : index
    %c0_35 = arith.constant 0 : index
    %93 = vector.load %arg8[%c0_33, %c0_34, %c0_35] : memref<1x2x4xf32, #tpu.memory_space<vmem>>, vector<1x2x4xf32>
    %cst_36 = arith.constant dense<0.000000e+00> : vector<4xf32>
    %94 = vector.multi_reduction <add>, %90, %cst_36 [0] : vector<256x4xf32> to vector<4xf32>
    %95 = arith.mulf %90, %90 : vector<256x4xf32>
    %cst_37 = arith.constant dense<0.000000e+00> : vector<4xf32>
    %96 = vector.multi_reduction <add>, %95, %cst_37 [0] : vector<256x4xf32> to vector<4xf32>
    %97 = vector.shape_cast %94 : vector<4xf32> to vector<1x4xf32>
    %98 = vector.shape_cast %96 : vector<4xf32> to vector<1x4xf32>
    %99 = tpu.concatenate %97, %98 in 0 : vector<1x4xf32>, vector<1x4xf32> -> vector<2x4xf32>
    %100 = vector.shape_cast %99 : vector<2x4xf32> to vector<1x2x4xf32>
    %101 = arith.addf %93, %100 : vector<1x2x4xf32>
    %c0_38 = arith.constant 0 : index
    %c0_39 = arith.constant 0 : index
    %c0_40 = arith.constant 0 : index
    %102 = vector.load %arg8[%c0_38, %c0_39, %c0_40] : memref<1x2x4xf32, #tpu.memory_space<vmem>>, vector<1x2x4xf32>
    tpu.vector_store %arg8[%c0_38, %c0_39, %c0_40], %101 {strides = array<i32>} : memref<1x2x4xf32, #tpu.memory_space<vmem>>, vector<1x2x4xf32>,
    return
  }
  func.func @transform_0(%arg0: i32, %arg1: i32) -> (i32, i32, i32, i32) {
    %c0_i32 = arith.constant 0 : i32
    %c0_i32_0 = arith.constant 0 : i32
    %c0_i32_1 = arith.constant 0 : i32
    %c0_i32_2 = arith.constant 0 : i32
    return %arg0, %c0_i32, %c0_i32_0, %c0_i32_1 : i32, i32, i32, i32
  }
  func.func @transform_1(%arg0: i32, %arg1: i32) -> (i32, i32) {
    %c0_i32 = arith.constant 0 : i32
    %c0_i32_0 = arith.constant 0 : i32
    %c0_i32_1 = arith.constant 0 : i32
    return %c0_i32, %c0_i32_0 : i32, i32
  }
  func.func @transform_2(%arg0: i32, %arg1: i32) -> (i32, i32) {
    %c0_i32 = arith.constant 0 : i32
    %c0_i32_0 = arith.constant 0 : i32
    %c0_i32_1 = arith.constant 0 : i32
    return %c0_i32, %c0_i32_0 : i32, i32
  }
  func.func @transform_3(%arg0: i32, %arg1: i32) -> (i32, i32, i32) {
    %c0_i32 = arith.constant 0 : i32
    %c0_i32_0 = arith.constant 0 : i32
    %c0_i32_1 = arith.constant 0 : i32
    %c0_i32_2 = arith.constant 0 : i32
    return %c0_i32, %c0_i32_0, %c0_i32_1 : i32, i32, i32
  }
  func.func @transform_4(%arg0: i32, %arg1: i32) -> (i32, i32) {
    %c0_i32 = arith.constant 0 : i32
    %c0_i32_0 = arith.constant 0 : i32
    %c0_i32_1 = arith.constant 0 : i32
    return %c0_i32, %c0_i32_0 : i32, i32
  }
  func.func @transform_5(%arg0: i32, %arg1: i32) -> (i32, i32, i32, i32) {
    %c0_i32 = arith.constant 0 : i32
    %c0_i32_0 = arith.constant 0 : i32
    %c0_i32_1 = arith.constant 0 : i32
    return %arg0, %arg1, %c0_i32, %c0_i32_0 : i32, i32, i32, i32
  }
  func.func @transform_6(%arg0: i32, %arg1: i32) -> (i32, i32, i32) {
    %c0_i32 = arith.constant 0 : i32
    %c0_i32_0 = arith.constant 0 : i32
    %c0_i32_1 = arith.constant 0 : i32
    return %arg0, %c0_i32, %c0_i32_0 : i32, i32, i32
  }
}

module attributes {stable_mosaic.version = 11 : i64} {
  func.func @_bn_apply_kernel(%arg0: i32, %arg1: memref<32x128xf32, #tpu.memory_space<vmem>>, %arg2: memref<1x128xf32, #tpu.memory_space<vmem>>, %arg3: memref<1x128xf32, #tpu.memory_space<vmem>>, %arg4: memref<32x128xf32, #tpu.memory_space<vmem>>) attributes {dimension_semantics = [#tpu.dimension_semantics<parallel>], iteration_bounds = array<i64: 1>, scalar_prefetch = 0 : i64, scratch_operands = 0 : i64, tpu.core_type = #tpu.core_type<tc>, window_params = [{transform_indices = @transform_0, window_bounds = array<i64: 32, 128>}, {pipeline_mode = #tpu.pipeline_mode<synchronous>, transform_indices = @transform_1, window_bounds = array<i64: 1, 128>}, {pipeline_mode = #tpu.pipeline_mode<synchronous>, transform_indices = @transform_2, window_bounds = array<i64: 1, 128>}, {transform_indices = @transform_3, window_bounds = array<i64: 32, 128>}]} {
    %c0 = arith.constant 0 : index
    %c0_0 = arith.constant 0 : index
    %0 = vector.load %arg1[%c0, %c0_0] : memref<32x128xf32, #tpu.memory_space<vmem>>, vector<32x128xf32>
    %c0_1 = arith.constant 0 : index
    %c0_2 = arith.constant 0 : index
    %1 = vector.load %arg2[%c0_1, %c0_2] : memref<1x128xf32, #tpu.memory_space<vmem>>, vector<1x128xf32>
    %2 = vector.broadcast %1 : vector<1x128xf32> to vector<32x128xf32>
    %3 = arith.mulf %0, %2 : vector<32x128xf32>
    %c0_3 = arith.constant 0 : index
    %c0_4 = arith.constant 0 : index
    %4 = vector.load %arg3[%c0_3, %c0_4] : memref<1x128xf32, #tpu.memory_space<vmem>>, vector<1x128xf32>
    %5 = vector.broadcast %4 : vector<1x128xf32> to vector<32x128xf32>
    %6 = arith.addf %3, %5 : vector<32x128xf32>
    %c0_5 = arith.constant 0 : index
    %c0_6 = arith.constant 0 : index
    %7 = vector.load %arg4[%c0_5, %c0_6] : memref<32x128xf32, #tpu.memory_space<vmem>>, vector<32x128xf32>
    tpu.vector_store %arg4[%c0_5, %c0_6], %6 {strides = array<i32>} : memref<32x128xf32, #tpu.memory_space<vmem>>, vector<32x128xf32>,
    return
  }
  func.func @transform_0(%arg0: i32) -> (i32, i32) {
    %c0_i32 = arith.constant 0 : i32
    %c0_i32_0 = arith.constant 0 : i32
    return %arg0, %c0_i32 : i32, i32
  }
  func.func @transform_1(%arg0: i32) -> (i32, i32) {
    %c0_i32 = arith.constant 0 : i32
    %c0_i32_0 = arith.constant 0 : i32
    %c0_i32_1 = arith.constant 0 : i32
    return %c0_i32, %c0_i32_0 : i32, i32
  }
  func.func @transform_2(%arg0: i32) -> (i32, i32) {
    %c0_i32 = arith.constant 0 : i32
    %c0_i32_0 = arith.constant 0 : i32
    %c0_i32_1 = arith.constant 0 : i32
    return %c0_i32, %c0_i32_0 : i32, i32
  }
  func.func @transform_3(%arg0: i32) -> (i32, i32) {
    %c0_i32 = arith.constant 0 : i32
    %c0_i32_0 = arith.constant 0 : i32
    return %arg0, %c0_i32 : i32, i32
  }
}

module attributes {stable_mosaic.version = 11 : i64} {
  func.func @_stage_kernel(%arg0: i32, %arg1: i32, %arg2: memref<1x16x16x4xf32, #tpu.memory_space<vmem>>, %arg3: memref<1x4xf32, #tpu.memory_space<vmem>>, %arg4: memref<1x4xf32, #tpu.memory_space<vmem>>, %arg5: memref<3x3x4xf32, #tpu.memory_space<vmem>>, %arg6: memref<4x8xf32, #tpu.memory_space<vmem>>, %arg7: memref<1x16x16x8xf32, #tpu.memory_space<vmem>>, %arg8: memref<1x2x8xf32, #tpu.memory_space<vmem>>, %arg9: memref<18x18x4xf32, #tpu.memory_space<vmem>>) attributes {dimension_semantics = [#tpu.dimension_semantics<parallel>, #tpu.dimension_semantics<arbitrary>], iteration_bounds = array<i64: 2, 1>, scalar_prefetch = 0 : i64, scratch_operands = 1 : i64, tpu.core_type = #tpu.core_type<tc>, window_params = [{transform_indices = @transform_0, window_bounds = array<i64: 1, 16, 16, 4>}, {pipeline_mode = #tpu.pipeline_mode<synchronous>, transform_indices = @transform_1, window_bounds = array<i64: 1, 4>}, {pipeline_mode = #tpu.pipeline_mode<synchronous>, transform_indices = @transform_2, window_bounds = array<i64: 1, 4>}, {pipeline_mode = #tpu.pipeline_mode<synchronous>, transform_indices = @transform_3, window_bounds = array<i64: 3, 3, 4>}, {pipeline_mode = #tpu.pipeline_mode<synchronous>, transform_indices = @transform_4, window_bounds = array<i64: 4, 8>}, {transform_indices = @transform_5, window_bounds = array<i64: 1, 16, 16, 8>}, {transform_indices = @transform_6, window_bounds = array<i64: 1, 2, 8>}]} {
    %c0_i32 = arith.constant 0 : i32
    %0 = arith.cmpi eq, %arg1, %c0_i32 : i32
    %1 = arith.extui %0 : i1 to i32
    %c0_i32_0 = arith.constant 0 : i32
    %2 = arith.cmpi ne, %1, %c0_i32_0 : i32
    scf.if %2 {
      %cst_41 = arith.constant 0.000000e+00 : f32
      %103 = vector.broadcast %cst_41 : f32 to vector<18x1x4xf32>
      %c0_42 = arith.constant 0 : index
      %c0_43 = arith.constant 0 : index
      %c0_44 = arith.constant 0 : index
      %104 = vector.load %arg9[%c0_42, %c0_43, %c0_44] : memref<18x18x4xf32, #tpu.memory_space<vmem>>, vector<18x1x4xf32>
      tpu.vector_store %arg9[%c0_42, %c0_43, %c0_44], %103 {strides = array<i32>} : memref<18x18x4xf32, #tpu.memory_space<vmem>>, vector<18x1x4xf32>,
      %cst_45 = arith.constant 0.000000e+00 : f32
      %105 = vector.broadcast %cst_45 : f32 to vector<18x1x4xf32>
      %c0_46 = arith.constant 0 : index
      %c17 = arith.constant 17 : index
      %c0_47 = arith.constant 0 : index
      %106 = vector.load %arg9[%c0_46, %c17, %c0_47] : memref<18x18x4xf32, #tpu.memory_space<vmem>>, vector<18x1x4xf32>
      tpu.vector_store %arg9[%c0_46, %c17, %c0_47], %105 {strides = array<i32>} : memref<18x18x4xf32, #tpu.memory_space<vmem>>, vector<18x1x4xf32>,
      %cst_48 = arith.constant 0.000000e+00 : f32
      %107 = vector.broadcast %cst_48 : f32 to vector<1x18x4xf32>
      %c0_49 = arith.constant 0 : index
      %c0_50 = arith.constant 0 : index
      %c0_51 = arith.constant 0 : index
      %108 = vector.load %arg9[%c0_49, %c0_50, %c0_51] : memref<18x18x4xf32, #tpu.memory_space<vmem>>, vector<1x18x4xf32>
      tpu.vector_store %arg9[%c0_49, %c0_50, %c0_51], %107 {strides = array<i32>} : memref<18x18x4xf32, #tpu.memory_space<vmem>>, vector<1x18x4xf32>,
      %cst_52 = arith.constant 0.000000e+00 : f32
      %109 = vector.broadcast %cst_52 : f32 to vector<1x18x4xf32>
      %c17_53 = arith.constant 17 : index
      %c0_54 = arith.constant 0 : index
      %c0_55 = arith.constant 0 : index
      %110 = vector.load %arg9[%c17_53, %c0_54, %c0_55] : memref<18x18x4xf32, #tpu.memory_space<vmem>>, vector<1x18x4xf32>
      tpu.vector_store %arg9[%c17_53, %c0_54, %c0_55], %109 {strides = array<i32>} : memref<18x18x4xf32, #tpu.memory_space<vmem>>, vector<1x18x4xf32>,
      %c0_56 = arith.constant 0 : index
      %c0_57 = arith.constant 0 : index
      %c0_58 = arith.constant 0 : index
      %c0_59 = arith.constant 0 : index
      %111 = vector.load %arg2[%c0_56, %c0_57, %c0_58, %c0_59] : memref<1x16x16x4xf32, #tpu.memory_space<vmem>>, vector<1x16x16x4xf32>
      %112 = vector.shape_cast %111 : vector<1x16x16x4xf32> to vector<16x16x4xf32>
      %c0_60 = arith.constant 0 : index
      %c0_61 = arith.constant 0 : index
      %113 = vector.load %arg3[%c0_60, %c0_61] : memref<1x4xf32, #tpu.memory_space<vmem>>, vector<1x4xf32>
      %114 = vector.shape_cast %113 : vector<1x4xf32> to vector<4xf32>
      %115 = vector.shape_cast %114 : vector<4xf32> to vector<1x1x4xf32>
      %116 = vector.broadcast %115 : vector<1x1x4xf32> to vector<16x16x4xf32>
      %117 = arith.mulf %112, %116 : vector<16x16x4xf32>
      %c0_62 = arith.constant 0 : index
      %c0_63 = arith.constant 0 : index
      %118 = vector.load %arg4[%c0_62, %c0_63] : memref<1x4xf32, #tpu.memory_space<vmem>>, vector<1x4xf32>
      %119 = vector.shape_cast %118 : vector<1x4xf32> to vector<4xf32>
      %120 = vector.shape_cast %119 : vector<4xf32> to vector<1x1x4xf32>
      %121 = vector.broadcast %120 : vector<1x1x4xf32> to vector<16x16x4xf32>
      %122 = arith.addf %117, %121 : vector<16x16x4xf32>
      %cst_64 = arith.constant 0.000000e+00 : f32
      %123 = vector.broadcast %cst_64 : f32 to vector<16x16x4xf32>
      %124 = arith.cmpf oge, %122, %123 : vector<16x16x4xf32>
      %cst_65 = arith.constant 1.000000e-01 : f32
      %125 = vector.broadcast %cst_65 : f32 to vector<16x16x4xf32>
      %126 = arith.mulf %125, %122 : vector<16x16x4xf32>
      %127 = arith.select %124, %122, %126 : vector<16x16x4xi1>, vector<16x16x4xf32>
      %c1_66 = arith.constant 1 : index
      %c1_67 = arith.constant 1 : index
      %c0_68 = arith.constant 0 : index
      %128 = vector.load %arg9[%c1_66, %c1_67, %c0_68] : memref<18x18x4xf32, #tpu.memory_space<vmem>>, vector<16x16x4xf32>
      tpu.vector_store %arg9[%c1_66, %c1_67, %c0_68], %127 {strides = array<i32>} : memref<18x18x4xf32, #tpu.memory_space<vmem>>, vector<16x16x4xf32>,
      %cst_69 = arith.constant 0.000000e+00 : f32
      %129 = vector.broadcast %cst_69 : f32 to vector<1x2x8xf32>
      %c0_70 = arith.constant 0 : index
      %c0_71 = arith.constant 0 : index
      %c0_72 = arith.constant 0 : index
      %130 = vector.load %arg8[%c0_70, %c0_71, %c0_72] : memref<1x2x8xf32, #tpu.memory_space<vmem>>, vector<1x2x8xf32>
      tpu.vector_store %arg8[%c0_70, %c0_71, %c0_72], %129 {strides = array<i32>} : memref<1x2x8xf32, #tpu.memory_space<vmem>>, vector<1x2x8xf32>,
    } else {
    }
    %c16_i32 = arith.constant 16 : i32
    %3 = arith.muli %arg1, %c16_i32 : i32
    %4 = tpu.assume_multiple %3, 8 : i32
    %c0 = arith.constant 0 : index
    %c0_1 = arith.constant 0 : index
    %c0_2 = arith.constant 0 : index
    %5 = vector.load %arg5[%c0, %c0_1, %c0_2] : memref<3x3x4xf32, #tpu.memory_space<vmem>>, vector<3x3x4xf32>
    %cst = arith.constant 0.000000e+00 : f32
    %6 = vector.broadcast %cst : f32 to vector<16x16x4xf32>
    %c0_i32_3 = arith.constant 0 : i32
    %7 = arith.addi %4, %c0_i32_3 : i32
    %8 = arith.index_cast %7 : i32 to index
    %c0_4 = arith.constant 0 : index
    %c0_5 = arith.constant 0 : index
    %9 = vector.load %arg9[%8, %c0_4, %c0_5] : memref<18x18x4xf32, #tpu.memory_space<vmem>>, vector<16x16x4xf32>
    %10 = vector.extract_strided_slice %5 {offsets = [0, 0, 0], sizes = [1, 1, 4], strides = [1, 1, 1]} : vector<3x3x4xf32> to vector<1x1x4xf32>
    %11 = vector.shape_cast %10 : vector<1x1x4xf32> to vector<4xf32>
    %12 = vector.shape_cast %11 : vector<4xf32> to vector<1x1x4xf32>
    %13 = vector.broadcast %12 : vector<1x1x4xf32> to vector<16x16x4xf32>
    %14 = arith.mulf %9, %13 : vector<16x16x4xf32>
    %15 = arith.addf %6, %14 : vector<16x16x4xf32>
    %c0_i32_6 = arith.constant 0 : i32
    %16 = arith.addi %4, %c0_i32_6 : i32
    %17 = arith.index_cast %16 : i32 to index
    %c1 = arith.constant 1 : index
    %c0_7 = arith.constant 0 : index
    %18 = vector.load %arg9[%17, %c1, %c0_7] : memref<18x18x4xf32, #tpu.memory_space<vmem>>, vector<16x16x4xf32>
    %19 = vector.extract_strided_slice %5 {offsets = [0, 1, 0], sizes = [1, 1, 4], strides = [1, 1, 1]} : vector<3x3x4xf32> to vector<1x1x4xf32>
    %20 = vector.shape_cast %19 : vector<1x1x4xf32> to vector<4xf32>
    %21 = vector.shape_cast %20 : vector<4xf32> to vector<1x1x4xf32>
    %22 = vector.broadcast %21 : vector<1x1x4xf32> to vector<16x16x4xf32>
    %23 = arith.mulf %18, %22 : vector<16x16x4xf32>
    %24 = arith.addf %15, %23 : vector<16x16x4xf32>
    %c0_i32_8 = arith.constant 0 : i32
    %25 = arith.addi %4, %c0_i32_8 : i32
    %26 = arith.index_cast %25 : i32 to index
    %c2 = arith.constant 2 : index
    %c0_9 = arith.constant 0 : index
    %27 = vector.load %arg9[%26, %c2, %c0_9] : memref<18x18x4xf32, #tpu.memory_space<vmem>>, vector<16x16x4xf32>
    %28 = vector.extract_strided_slice %5 {offsets = [0, 2, 0], sizes = [1, 1, 4], strides = [1, 1, 1]} : vector<3x3x4xf32> to vector<1x1x4xf32>
    %29 = vector.shape_cast %28 : vector<1x1x4xf32> to vector<4xf32>
    %30 = vector.shape_cast %29 : vector<4xf32> to vector<1x1x4xf32>
    %31 = vector.broadcast %30 : vector<1x1x4xf32> to vector<16x16x4xf32>
    %32 = arith.mulf %27, %31 : vector<16x16x4xf32>
    %33 = arith.addf %24, %32 : vector<16x16x4xf32>
    %c1_i32 = arith.constant 1 : i32
    %34 = arith.addi %4, %c1_i32 : i32
    %35 = arith.index_cast %34 : i32 to index
    %c0_10 = arith.constant 0 : index
    %c0_11 = arith.constant 0 : index
    %36 = vector.load %arg9[%35, %c0_10, %c0_11] : memref<18x18x4xf32, #tpu.memory_space<vmem>>, vector<16x16x4xf32>
    %37 = vector.extract_strided_slice %5 {offsets = [1, 0, 0], sizes = [1, 1, 4], strides = [1, 1, 1]} : vector<3x3x4xf32> to vector<1x1x4xf32>
    %38 = vector.shape_cast %37 : vector<1x1x4xf32> to vector<4xf32>
    %39 = vector.shape_cast %38 : vector<4xf32> to vector<1x1x4xf32>
    %40 = vector.broadcast %39 : vector<1x1x4xf32> to vector<16x16x4xf32>
    %41 = arith.mulf %36, %40 : vector<16x16x4xf32>
    %42 = arith.addf %33, %41 : vector<16x16x4xf32>
    %c1_i32_12 = arith.constant 1 : i32
    %43 = arith.addi %4, %c1_i32_12 : i32
    %44 = arith.index_cast %43 : i32 to index
    %c1_13 = arith.constant 1 : index
    %c0_14 = arith.constant 0 : index
    %45 = vector.load %arg9[%44, %c1_13, %c0_14] : memref<18x18x4xf32, #tpu.memory_space<vmem>>, vector<16x16x4xf32>
    %46 = vector.extract_strided_slice %5 {offsets = [1, 1, 0], sizes = [1, 1, 4], strides = [1, 1, 1]} : vector<3x3x4xf32> to vector<1x1x4xf32>
    %47 = vector.shape_cast %46 : vector<1x1x4xf32> to vector<4xf32>
    %48 = vector.shape_cast %47 : vector<4xf32> to vector<1x1x4xf32>
    %49 = vector.broadcast %48 : vector<1x1x4xf32> to vector<16x16x4xf32>
    %50 = arith.mulf %45, %49 : vector<16x16x4xf32>
    %51 = arith.addf %42, %50 : vector<16x16x4xf32>
    %c1_i32_15 = arith.constant 1 : i32
    %52 = arith.addi %4, %c1_i32_15 : i32
    %53 = arith.index_cast %52 : i32 to index
    %c2_16 = arith.constant 2 : index
    %c0_17 = arith.constant 0 : index
    %54 = vector.load %arg9[%53, %c2_16, %c0_17] : memref<18x18x4xf32, #tpu.memory_space<vmem>>, vector<16x16x4xf32>
    %55 = vector.extract_strided_slice %5 {offsets = [1, 2, 0], sizes = [1, 1, 4], strides = [1, 1, 1]} : vector<3x3x4xf32> to vector<1x1x4xf32>
    %56 = vector.shape_cast %55 : vector<1x1x4xf32> to vector<4xf32>
    %57 = vector.shape_cast %56 : vector<4xf32> to vector<1x1x4xf32>
    %58 = vector.broadcast %57 : vector<1x1x4xf32> to vector<16x16x4xf32>
    %59 = arith.mulf %54, %58 : vector<16x16x4xf32>
    %60 = arith.addf %51, %59 : vector<16x16x4xf32>
    %c2_i32 = arith.constant 2 : i32
    %61 = arith.addi %4, %c2_i32 : i32
    %62 = arith.index_cast %61 : i32 to index
    %c0_18 = arith.constant 0 : index
    %c0_19 = arith.constant 0 : index
    %63 = vector.load %arg9[%62, %c0_18, %c0_19] : memref<18x18x4xf32, #tpu.memory_space<vmem>>, vector<16x16x4xf32>
    %64 = vector.extract_strided_slice %5 {offsets = [2, 0, 0], sizes = [1, 1, 4], strides = [1, 1, 1]} : vector<3x3x4xf32> to vector<1x1x4xf32>
    %65 = vector.shape_cast %64 : vector<1x1x4xf32> to vector<4xf32>
    %66 = vector.shape_cast %65 : vector<4xf32> to vector<1x1x4xf32>
    %67 = vector.broadcast %66 : vector<1x1x4xf32> to vector<16x16x4xf32>
    %68 = arith.mulf %63, %67 : vector<16x16x4xf32>
    %69 = arith.addf %60, %68 : vector<16x16x4xf32>
    %c2_i32_20 = arith.constant 2 : i32
    %70 = arith.addi %4, %c2_i32_20 : i32
    %71 = arith.index_cast %70 : i32 to index
    %c1_21 = arith.constant 1 : index
    %c0_22 = arith.constant 0 : index
    %72 = vector.load %arg9[%71, %c1_21, %c0_22] : memref<18x18x4xf32, #tpu.memory_space<vmem>>, vector<16x16x4xf32>
    %73 = vector.extract_strided_slice %5 {offsets = [2, 1, 0], sizes = [1, 1, 4], strides = [1, 1, 1]} : vector<3x3x4xf32> to vector<1x1x4xf32>
    %74 = vector.shape_cast %73 : vector<1x1x4xf32> to vector<4xf32>
    %75 = vector.shape_cast %74 : vector<4xf32> to vector<1x1x4xf32>
    %76 = vector.broadcast %75 : vector<1x1x4xf32> to vector<16x16x4xf32>
    %77 = arith.mulf %72, %76 : vector<16x16x4xf32>
    %78 = arith.addf %69, %77 : vector<16x16x4xf32>
    %c2_i32_23 = arith.constant 2 : i32
    %79 = arith.addi %4, %c2_i32_23 : i32
    %80 = arith.index_cast %79 : i32 to index
    %c2_24 = arith.constant 2 : index
    %c0_25 = arith.constant 0 : index
    %81 = vector.load %arg9[%80, %c2_24, %c0_25] : memref<18x18x4xf32, #tpu.memory_space<vmem>>, vector<16x16x4xf32>
    %82 = vector.extract_strided_slice %5 {offsets = [2, 2, 0], sizes = [1, 1, 4], strides = [1, 1, 1]} : vector<3x3x4xf32> to vector<1x1x4xf32>
    %83 = vector.shape_cast %82 : vector<1x1x4xf32> to vector<4xf32>
    %84 = vector.shape_cast %83 : vector<4xf32> to vector<1x1x4xf32>
    %85 = vector.broadcast %84 : vector<1x1x4xf32> to vector<16x16x4xf32>
    %86 = arith.mulf %81, %85 : vector<16x16x4xf32>
    %87 = arith.addf %78, %86 : vector<16x16x4xf32>
    %c0_26 = arith.constant 0 : index
    %c0_27 = arith.constant 0 : index
    %88 = vector.load %arg6[%c0_26, %c0_27] : memref<4x8xf32, #tpu.memory_space<vmem>>, vector<4x8xf32>
    %89 = vector.shape_cast %87 : vector<16x16x4xf32> to vector<256x4xf32>
    %cst_28 = arith.constant dense<0.000000e+00> : vector<256x8xf32>
    %90 = tpu.matmul %89, %88, %cst_28 {dimension_numbers = #tpu.dot_dimension_numbers<[1], [0], [0], [1], [0, 0, 1, 1], [], []>} : vector<256x4xf32>, vector<4x8xf32>, vector<256x8xf32> -> vector<256x8xf32>
    %91 = vector.shape_cast %90 : vector<256x8xf32> to vector<1x16x16x8xf32>
    %c0_29 = arith.constant 0 : index
    %c0_30 = arith.constant 0 : index
    %c0_31 = arith.constant 0 : index
    %c0_32 = arith.constant 0 : index
    %92 = vector.load %arg7[%c0_29, %c0_30, %c0_31, %c0_32] : memref<1x16x16x8xf32, #tpu.memory_space<vmem>>, vector<1x16x16x8xf32>
    tpu.vector_store %arg7[%c0_29, %c0_30, %c0_31, %c0_32], %91 {strides = array<i32>} : memref<1x16x16x8xf32, #tpu.memory_space<vmem>>, vector<1x16x16x8xf32>,
    %c0_33 = arith.constant 0 : index
    %c0_34 = arith.constant 0 : index
    %c0_35 = arith.constant 0 : index
    %93 = vector.load %arg8[%c0_33, %c0_34, %c0_35] : memref<1x2x8xf32, #tpu.memory_space<vmem>>, vector<1x2x8xf32>
    %cst_36 = arith.constant dense<0.000000e+00> : vector<8xf32>
    %94 = vector.multi_reduction <add>, %90, %cst_36 [0] : vector<256x8xf32> to vector<8xf32>
    %95 = arith.mulf %90, %90 : vector<256x8xf32>
    %cst_37 = arith.constant dense<0.000000e+00> : vector<8xf32>
    %96 = vector.multi_reduction <add>, %95, %cst_37 [0] : vector<256x8xf32> to vector<8xf32>
    %97 = vector.shape_cast %94 : vector<8xf32> to vector<1x8xf32>
    %98 = vector.shape_cast %96 : vector<8xf32> to vector<1x8xf32>
    %99 = tpu.concatenate %97, %98 in 0 : vector<1x8xf32>, vector<1x8xf32> -> vector<2x8xf32>
    %100 = vector.shape_cast %99 : vector<2x8xf32> to vector<1x2x8xf32>
    %101 = arith.addf %93, %100 : vector<1x2x8xf32>
    %c0_38 = arith.constant 0 : index
    %c0_39 = arith.constant 0 : index
    %c0_40 = arith.constant 0 : index
    %102 = vector.load %arg8[%c0_38, %c0_39, %c0_40] : memref<1x2x8xf32, #tpu.memory_space<vmem>>, vector<1x2x8xf32>
    tpu.vector_store %arg8[%c0_38, %c0_39, %c0_40], %101 {strides = array<i32>} : memref<1x2x8xf32, #tpu.memory_space<vmem>>, vector<1x2x8xf32>,
    return
  }
  func.func @transform_0(%arg0: i32, %arg1: i32) -> (i32, i32, i32, i32) {
    %c0_i32 = arith.constant 0 : i32
    %c0_i32_0 = arith.constant 0 : i32
    %c0_i32_1 = arith.constant 0 : i32
    %c0_i32_2 = arith.constant 0 : i32
    return %arg0, %c0_i32, %c0_i32_0, %c0_i32_1 : i32, i32, i32, i32
  }
  func.func @transform_1(%arg0: i32, %arg1: i32) -> (i32, i32) {
    %c0_i32 = arith.constant 0 : i32
    %c0_i32_0 = arith.constant 0 : i32
    %c0_i32_1 = arith.constant 0 : i32
    return %c0_i32, %c0_i32_0 : i32, i32
  }
  func.func @transform_2(%arg0: i32, %arg1: i32) -> (i32, i32) {
    %c0_i32 = arith.constant 0 : i32
    %c0_i32_0 = arith.constant 0 : i32
    %c0_i32_1 = arith.constant 0 : i32
    return %c0_i32, %c0_i32_0 : i32, i32
  }
  func.func @transform_3(%arg0: i32, %arg1: i32) -> (i32, i32, i32) {
    %c0_i32 = arith.constant 0 : i32
    %c0_i32_0 = arith.constant 0 : i32
    %c0_i32_1 = arith.constant 0 : i32
    %c0_i32_2 = arith.constant 0 : i32
    return %c0_i32, %c0_i32_0, %c0_i32_1 : i32, i32, i32
  }
  func.func @transform_4(%arg0: i32, %arg1: i32) -> (i32, i32) {
    %c0_i32 = arith.constant 0 : i32
    %c0_i32_0 = arith.constant 0 : i32
    %c0_i32_1 = arith.constant 0 : i32
    return %c0_i32, %c0_i32_0 : i32, i32
  }
  func.func @transform_5(%arg0: i32, %arg1: i32) -> (i32, i32, i32, i32) {
    %c0_i32 = arith.constant 0 : i32
    %c0_i32_0 = arith.constant 0 : i32
    %c0_i32_1 = arith.constant 0 : i32
    return %arg0, %arg1, %c0_i32, %c0_i32_0 : i32, i32, i32, i32
  }
  func.func @transform_6(%arg0: i32, %arg1: i32) -> (i32, i32, i32) {
    %c0_i32 = arith.constant 0 : i32
    %c0_i32_0 = arith.constant 0 : i32
    %c0_i32_1 = arith.constant 0 : i32
    return %arg0, %c0_i32, %c0_i32_0 : i32, i32, i32
  }
}

</mosaic_0001>

<bundles_post_ra>
// kernel: sep_conv_forward.5
= control target key start
LH: loop header
LB: loop body
LE: loop exit
PB: predicated region body
PF: predicated region fallthrough
CT: control target
= control target key end

     0   :  { %s94_s0 = inlined_call_operand.vmem [shape: f32[32,128], index: 0, kind: input, shape index: {}]   ;;  %s95_s1 = inlined_call_operand.vmem [shape: f32[1,128], index: 1, kind: input, shape index: {}]   ;;  %s96_s2 = inlined_call_operand.vmem [shape: f32[1,128], index: 2, kind: input, shape index: {}]   ;;  %s97_s3 = inlined_call_operand.vmem [shape: f32[32,128], index: 3, kind: output, shape index: {}]  }
   0x1   :  { %v14_v0 = vld [vmem:[%s94_s0] sm:$0xff]  ;;  %v15_v3 = vld [vmem:[%s94_s0 + $0x8] sm:$0xff]  ;;  %v16_v6 = vld [vmem:[%s94_s0 + $0x10] sm:$0xff] }
   0x2   :  { %v42_v1 = vld [vmem:[%s95_s1] ss:$0 sm:$0xff]  ;;  %v17_v7 = vld [vmem:[%s94_s0 + $0x18] sm:$0xff] }
   0x3   :  { %v43_v2 = vld [vmem:[%s96_s2] ss:$0 sm:$0xff]  ;;  %v22_v4 = vmul.f32 %v42_v1, %v14_v0  ;;  %v23_v5 = vmul.f32 %v42_v1, %v15_v3  ;;  %v24_v8 = vmul.f32 %v42_v1, %v16_v6  ;;  %v25_v9 = vmul.f32 %v42_v1, %v17_v7 }
   0x5   :  { %v30_v10 = vadd.f32 %v43_v2, %v22_v4  ;;  %v31_v11 = vadd.f32 %v43_v2, %v23_v5  ;;  %v32_v12 = vadd.f32 %v43_v2, %v24_v8  ;;  %v33_v13 = vadd.f32 %v43_v2, %v25_v9 }
   0x7   :  { %34 = vst [vmem:[%s97_s3] sm:$0xff] %v30_v10 }
   0x8   :  { %35 = vst [vmem:[%s97_s3 + $0x8] sm:$0xff] %v31_v11 }
   0x9   :  { %36 = vst [vmem:[%s97_s3 + $0x10] sm:$0xff] %v32_v12 }
   0xa   :  { %37 = vst [vmem:[%s97_s3 + $0x18] sm:$0xff] %v33_v13 }

// kernel: sep_conv_forward.3
= control target key start
LH: loop header
LB: loop body
LE: loop exit
PB: predicated region body
PF: predicated region fallthrough
CT: control target
= control target key end

     0   :  { %s2339_s21 = smov 0   ;;  %s2341_s22 = smov 0   ;;  %s3756_s0 = inlined_call_operand.vmem [shape: f32[2,16,16,4], index: 0, kind: input, shape index: {}]   ;;  %s3757_s1 = inlined_call_operand.vmem [shape: f32[1,4], index: 1, kind: input, shape index: {}]   ;;  %s3758_s2 = inlined_call_operand.vmem [shape: f32[1,4], index: 2, kind: input, shape index: {}]   ;;  %s3759_s3 = inlined_call_operand.vmem [shape: f32[3,3,4], index: 3, kind: input, shape index: {}]   ;;  %s3760_s4 = inlined_call_operand.vmem [shape: f32[4,4], index: 4, kind: input, shape index: {}]   ;;  %s3761_s5 = inlined_call_operand.vmem [shape: f32[2,16,16,4], index: 5, kind: output, shape index: {0}]   ;;  %s3762_s6 = inlined_call_operand.vmem [shape: f32[2,2,4], index: 6, kind: output, shape index: {1}]  }
   0x1   :  { %s2343_s23 = smov 0  }
   0x2 LB: > { %s29_s24 = sadd.s32 1, %s2297_s22  ;;  %p2012_p0 = scmp.ge.s32.totalorder %s2301_s23, 1  ;;  %s2301_s23 = sphi %s2343_s23, %s17_s23   ;;  %s2297_s22 = sphi %s2341_s22, %s3966_s22   ;;  %s2293_s21 = sphi %s2339_s21, %s3965_s21  }
   0x3   : > { %p31_p1 = scmp.ge.s32.totalorder %s29_s24, 2  ;;  %p229_p2 = scmp.lt.s32.totalorder %s2301_s23, 3 }
   0x5   : > { %s3968_s24 = smov (%p31_p1, %s29_s24), 0  ;;  %p230_p3 = pnand %p2012_p0, %p229_p2 }
   0x7   : > { %233 = sbr.rel (%p230_p3) target bundleno = 396 (0x18c), region = 40 }
   0xc   : > { %v1457_v0 = vld [vmem:[%s3760_s4] sm:$0xf]  ;;  %vm1555_vm0 = vcmask 1043456   ;;  %p268_p4 = scmp.lt.s32.totalorder %s2293_s21, 1  ;;  %vm292_vm1 = vcmask 24576   ;;  %v3763_v1 = vmov 0.0  }
   0xd   : > { %2210 = vmatpush.msk.msra.mxu0 %vm1555_vm0, %v1457_v0  ;;  %293 = vst.msk [vmem:[#allocation2] sm:$0x1] %vm292_vm1, %v3763_v1  ;;  %vm329_vm2 = vcmask 31744   ;;  %2247 = vmatpush.msk.msra.mxu1 %vm1555_vm0, %v1457_v0  ;;  %v2371_v2 = vld [vmem:[%s3757_s1] ss:$0 sm:$0xff]  ;;  %vm332_vm13 = vcmask 25600  }
   0xe   : > { %s3970_s21 = smov (!%p268_p4, %s2293_s21), 1  ;;  %294 = vst.msk [vmem:[#allocation2 + $0x18] sm:$0x1] %vm292_vm1, %v3763_v1  ;;  %2248 = vmatpush.msk.msra.mxu2 %vm1555_vm0, %v1457_v0  ;;  %2249 = vmatpush.msk.msra.mxu3 %vm1555_vm0, %v1457_v0  ;;  %v2388_v3 = vld [vmem:[%s3758_s2] ss:$0 sm:$0xff] }
   0xf   : > { %295 = vst.msk [vmem:[#allocation2 + $0x30] sm:$0x1] %vm292_vm1, %v3763_v1  ;;  %s2245_s29 = sshll.u32 %s3970_s21, 8  ;;  %v573_v4 = vld [vmem:[%s3759_s3] sm:$0x7]  ;;  %s2017_s28 = sshll.u32 %s3970_s21, 1 }
  0x10   : > { %3839 = vst [vmem:[#allocation3_spill] sm:$0xff] %v2371_v2  ;;  %s2381_s8 = scalar_lea.vmem %s3756_s0, %s2245_s29  ;;  %v2403_v13 = vperm.slane %v573_v4, 0  ;;  %v2410_v17 = vperm.slane %v573_v4, 1  ;;  %v2415_v19 = vperm.slane %v573_v4, 2  ;;  %v574_v33 = vld [vmem:[%s3759_s3 + $0x4] sm:$0x7]  ;;  %s3501_s27 = scalar_lea.vmem %s3761_s5, %s2245_s29 }
  0x11   : > { %330 = vst.msk [vmem:[#allocation2] sm:$0xff] %vm329_vm2, %v3763_v1  ;;  %v338_v5 = vld [vmem:[%s2381_s8] sm:$0xff]  ;;  %v339_v6 = vld [vmem:[%s2381_s8 + $0x8] sm:$0xff]  ;;  %v340_v7 = vld [vmem:[%s2381_s8 + $0x10] sm:$0xff]  ;;  %v2437_v40 = vperm.slane %v574_v33, 0  ;;  %v2439_v41 = vperm.slane %v574_v33, 1  ;;  %s3573_s7 = scalar_lea.vmem %s3762_s6, %s2017_s28 }
  0x12   : > { %331 = vst.msk [vmem:[#allocation2 + $0x8] sm:$0xff] %vm329_vm2, %v3763_v1  ;;  %v341_v8 = vld [vmem:[%s2381_s8 + $0x18] sm:$0xff]  ;;  %v374_v9 = vmul.f32 %v2371_v2, %v338_v5  ;;  %v375_v10 = vmul.f32 %v2371_v2, %v339_v6  ;;  %v376_v11 = vmul.f32 %v2371_v2, %v340_v7  ;;  %v344_v34 = vld [vmem:[%s2381_s8 + $0x30] sm:$0xff]  ;;  %v575_v39 = vld [vmem:[%s3759_s3 + $0x8] sm:$0x7]  ;;  %v2448_v46 = vperm.slane %v574_v33, 2 }
  0x13   : > { %3840 = vst [vmem:[#allocation4_spill] sm:$0xff] %v2388_v3  ;;  %v377_v12 = vmul.f32 %v2371_v2, %v341_v8  ;;  %v380_v37 = vmul.f32 %v2371_v2, %v344_v34  ;;  %v345_v38 = vld [vmem:[%s2381_s8 + $0x38] sm:$0xff]  ;;  %v346_v44 = vld [vmem:[%s2381_s8 + $0x40] sm:$0xff]  ;;  %v2454_v51 = vperm.slane %v575_v39, 0  ;;  %v2462_v55 = vperm.slane %v575_v39, 1  ;;  %v347_v59 = vld [vmem:[%s2381_s8 + $0x48] sm:$0xff] }
  0x14   : > { %296 = vst.msk [vmem:[#allocation2 + $0x48] sm:$0x1] %vm292_vm1, %v3763_v1  ;;  %v410_v14 = vadd.f32 %v2388_v3, %v374_v9  ;;  %v411_v15 = vadd.f32 %v2388_v3, %v375_v10  ;;  %v412_v16 = vadd.f32 %v2388_v3, %v376_v11  ;;  %v381_v42 = vmul.f32 %v2371_v2, %v345_v38  ;;  %v342_v7 = vld [vmem:[%s2381_s8 + $0x20] sm:$0xff]  ;;  %v348_v8 = vld [vmem:[%s2381_s8 + $0x50] sm:$0xff] }
  0x15   : > { %297 = vst.msk [vmem:[#allocation2 + $0x60] sm:$0x1] %vm292_vm1, %v3763_v1  ;;  %v413_v18 = vadd.f32 %v2388_v3, %v377_v12  ;;  %v416_v43 = vadd.f32 %v2388_v3, %v380_v37  ;;  %v382_v47 = vmul.f32 %v2371_v2, %v346_v44  ;;  %v2468_v58 = vperm.slane %v575_v39, 2 }
  0x16   : > { %298 = vst.msk [vmem:[#allocation2 + $0x78] sm:$0x1] %vm292_vm1, %v3763_v1  ;;  %vm442_vm3 = vcmp.ge.f32.partialorder %v410_v14, 0.0  ;;  %vm443_vm4 = vcmp.ge.f32.partialorder %v411_v15, 0.0  ;;  %vm444_vm5 = vcmp.ge.f32.partialorder %v412_v16, 0.0  ;;  %v417_v48 = vadd.f32 %v2388_v3, %v381_v42 }
  0x17   : > { %299 = vst.msk [vmem:[#allocation2 + $0x90] sm:$0x1] %vm292_vm1, %v3763_v1  ;;  %v474_v20 = vmul.f32 0.1, %v410_v14  ;;  %vm445_vm6 = vcmp.ge.f32.partialorder %v413_v18, 0.0  ;;  %v418_v60 = vadd.f32 %v2388_v3, %v382_v47  ;;  %vm448_vm7 = vcmp.ge.f32.partialorder %v416_v43, 0.0 }
  0x18   : > { %v578_v21 = vld [vmem:[#allocation2] sm:$0xff]  ;;  %v475_v22 = vmul.f32 0.1, %v411_v15  ;;  %v476_v23 = vmul.f32 0.1, %v412_v16  ;;  %v383_v4 = vmul.f32 %v2371_v2, %v347_v59  ;;  %vm449_vm8 = vcmp.ge.f32.partialorder %v417_v48, 0.0 }
  0x19   : > { %v611_v24 = vmul.f32 %v2403_v13, %v578_v21  ;;  %v675_v25 = vld [vmem:[#allocation2 + $0x1] sm:$0xff]  ;;  %v477_v26 = vmul.f32 0.1, %v413_v18  ;;  %v506_v27 = vsel %vm442_vm3, %v410_v14, %v474_v20  ;;  %300 = vst.msk [vmem:[#allocation2 + $0xa8] sm:$0x1] %vm292_vm1, %v3763_v1  ;;  %v378_v12 = vmul.f32 %v2371_v2, %v342_v7 }
  0x1a   : > { %v708_v28 = vmul.f32 %v2410_v17, %v675_v25  ;;  %v772_v29 = vld [vmem:[#allocation2 + $0x2] sm:$0xff]  ;;  %v507_v30 = vsel %vm443_vm4, %v411_v15, %v475_v22  ;;  %v508_v31 = vsel %vm444_vm5, %v412_v16, %v476_v23  ;;  %539 = vst.msk [vmem:[#allocation2 + $0x19] sm:$0xff] %vm329_vm2, %v506_v27  ;;  %v480_v56 = vmul.f32 0.1, %v416_v43  ;;  %v352_v15 = vld [vmem:[%s2381_s8 + $0x70] sm:$0xff] }
  0x1b   : > { %v509_v32 = vsel %vm445_vm6, %v413_v18, %v477_v26  ;;  %540 = vst.msk [vmem:[#allocation2 + $0x21] sm:$0xff] %vm329_vm2, %v507_v30  ;;  %v805_v36 = vmul.f32 %v2415_v19, %v772_v29  ;;  %v579_v0 = vld [vmem:[#allocation2 + $0x8] sm:$0xff]  ;;  %v481_v5 = vmul.f32 0.1, %v417_v48  ;;  %v384_v14 = vmul.f32 %v2371_v2, %v348_v8  ;;  %v349_v29 = vld [vmem:[%s2381_s8 + $0x58] sm:$0xff] }
  0x1c   : > { %541 = vst.msk [vmem:[#allocation2 + $0x31] sm:$0xff] %vm329_vm2, %v508_v31  ;;  %v740_v35 = vadd.f32 %v708_v28, %v611_v24  ;;  %v2501_v18 = vmul.f32 %v2403_v13, %v579_v0  ;;  %v419_v20 = vadd.f32 %v2388_v3, %v383_v4  ;;  %v2505_v21 = vsel %vm448_vm7, %v416_v43, %v480_v56  ;;  %v343_v28 = vld [vmem:[%s2381_s8 + $0x28] sm:$0xff] }
  0x1d   : > { %542 = vst.msk [vmem:[#allocation2 + $0x39] sm:$0xff] %vm329_vm2, %v509_v32  ;;  %v414_v24 = vadd.f32 %v2388_v3, %v378_v12  ;;  %v482_v25 = vmul.f32 0.1, %v418_v60  ;;  %vm450_vm9 = vcmp.ge.f32.partialorder %v418_v60, 0.0  ;;  %v2523_v30 = vsel %vm449_vm8, %v417_v48, %v481_v5  ;;  %v355_v4 = vld [vmem:[%s2381_s8 + $0x88] sm:$0xff]  ;;  %v356_v5 = vld [vmem:[%s2381_s8 + $0x90] sm:$0xff] }
  0x1e   : > { %301 = vst.msk [vmem:[#allocation2 + $0xc0] sm:$0x1] %vm292_vm1, %v3763_v1  ;;  %v837_v45 = vadd.f32 %v805_v36, %v740_v35  ;;  %v2526_v31 = vmul.f32 %v2371_v2, %v352_v15  ;;  %v379_v33 = vmul.f32 %v2371_v2, %v343_v28  ;;  %v385_v34 = vmul.f32 %v2371_v2, %v349_v29  ;;  %v353_v36 = vld [vmem:[%s2381_s8 + $0x78] sm:$0xff] }
  0x1f   : > { %302 = vst.msk [vmem:[#allocation2 + $0xd8] sm:$0x1] %vm292_vm1, %v3763_v1  ;;  %v2533_v35 = vadd.f32 %v2388_v3, %v384_v14  ;;  %v478_v37 = vmul.f32 0.1, %v414_v24  ;;  %v483_v42 = vmul.f32 0.1, %v419_v20 }
  0x20   : > { %303 = vst.msk [vmem:[#allocation2 + $0xf0] sm:$0x1] %vm292_vm1, %v3763_v1  ;;  %v415_v47 = vadd.f32 %v2388_v3, %v379_v33  ;;  %vm446_vm10 = vcmp.ge.f32.partialorder %v414_v24, 0.0  ;;  %vm451_vm11 = vcmp.ge.f32.partialorder %v419_v20, 0.0  ;;  %v421_v59 = vadd.f32 %v2388_v3, %v385_v34  ;;  %v357_v33 = vld [vmem:[%s2381_s8 + $0x98] sm:$0xff] }
  0x21   : > { %v2018_v49 = vld [vmem:[#allocation2 + $0x18] sm:$0xff]  ;;  %304 = vst.msk [vmem:[#allocation2 + $0x108] sm:$0x1] %vm292_vm1, %v3763_v1  ;;  %vm452_vm12 = vcmp.ge.f32.partialorder %v2533_v35, 0.0  ;;  %v484_v8 = vmul.f32 0.1, %v2533_v35 }
  0x22   : > { %v2050_v50 = vld [vmem:[#allocation2 + $0x19] sm:$0xff]  ;;  %v905_v52 = vmul.f32 %v2018_v49, %v2437_v40  ;;  %305 = vst.msk [vmem:[#allocation2 + $0x120] sm:$0x1] %vm292_vm1, %v3763_v1  ;;  %v2518_v27 = vld [vmem:[#allocation2 + $0x21] sm:$0xff]  ;;  %v613_v38 = vmul.f32 %v2018_v49, %v2403_v13  ;;  %v479_v7 = vmul.f32 0.1, %v415_v47 }
  0x23   : > { %v1002_v53 = vmul.f32 %v2050_v50, %v2439_v41  ;;  %v2460_v54 = vld [vmem:[#allocation2 + $0x1a] sm:$0xff]  ;;  %v2466_v57 = vld [vmem:[#allocation2 + $0x30] sm:$0xff]  ;;  %306 = vst.msk [vmem:[#allocation2 + $0x138] sm:$0x1] %vm292_vm1, %v3763_v1  ;;  %v710_v39 = vmul.f32 %v2050_v50, %v2410_v17  ;;  %v2544_v44 = vmul.f32 %v2518_v27, %v2439_v41  ;;  %v2554_v50 = vsel %vm450_vm9, %v418_v60, %v482_v25 }
  0x24   : > { %v937_v61 = vadd.f32 %v905_v52, %v837_v45  ;;  %v1099_v62 = vmul.f32 %v2460_v54, %v2448_v46  ;;  %v2476_v63 = vld [vmem:[#allocation2 + $0x31] sm:$0xff]  ;;  %307 = vst.msk [vmem:[#allocation2 + $0x150] sm:$0x1] %vm292_vm1, %v3763_v1  ;;  %v1199_v10 = vmul.f32 %v2466_v57, %v2454_v51  ;;  %v2491_v11 = vld [vmem:[#allocation2 + $0x20] sm:$0xff]  ;;  %v807_v49 = vmul.f32 %v2460_v54, %v2415_v19 }
  0x25   : > { %v2481_v6 = vld [vmem:[#allocation2 + $0x32] sm:$0xff]  ;;  %308 = vst.msk [vmem:[#allocation2 + $0x168] sm:$0x1] %vm292_vm1, %v3763_v1  ;;  %v1296_v16 = vmul.f32 %v2476_v63, %v2462_v55  ;;  %v2516_v26 = vmul.f32 %v2491_v11, %v2437_v40  ;;  %v742_v48 = vadd.f32 %v710_v39, %v613_v38  ;;  %v354_v52 = vld [vmem:[%s2381_s8 + $0x80] sm:$0xff]  ;;  %v2570_v60 = vsel %vm446_vm10, %v414_v24, %v478_v37 }
  0x26   : > { %v1034_v9 = vadd.f32 %v1002_v53, %v937_v61  ;;  %309 = vst.msk [vmem:[#allocation2 + $0x180] sm:$0x1] %vm292_vm1, %v3763_v1  ;;  %v1393_v23 = vmul.f32 %v2481_v6, %v2468_v58  ;;  %v2546_v45 = vld [vmem:[#allocation2 + $0x38] sm:$0xff]  ;;  %v389_v61 = vmul.f32 %v2371_v2, %v353_v36  ;;  %v907_v0 = vmul.f32 %v2466_v57, %v2437_v40 }
  0x27   : > { %310 = vst.msk [vmem:[#allocation2 + $0x198] sm:$0x1] %vm292_vm1, %v3763_v1  ;;  %v2559_v56 = vld [vmem:[#allocation2 + $0x39] sm:$0xff]  ;;  %v2568_v54 = vmul.f32 %v2546_v45, %v2454_v51  ;;  %vm447_vm14 = vcmp.ge.f32.partialorder %v415_v47, 0.0  ;;  %v1004_v15 = vmul.f32 %v2476_v63, %v2439_v41  ;;  %vm453_vm15 = vcmp.ge.f32.partialorder %v421_v59, 0.0 }
  0x28   : > { %v1131_v22 = vadd.f32 %v1099_v62, %v1034_v9  ;;  %311 = vst.msk [vmem:[#allocation2 + $0x11] sm:$0x1] %vm292_vm1, %v3763_v1  ;;  %v839_v62 = vadd.f32 %v807_v49, %v742_v48  ;;  %v2581_v9 = vsel %vm451_vm11, %v419_v20, %v483_v42  ;;  %v2588_v12 = vmul.f32 %v2559_v56, %v2462_v55 }
  0x29   : > { %312 = vst.msk [vmem:[#allocation2 + $0x29] sm:$0x1] %vm292_vm1, %v3763_v1  ;;  %v391_v20 = vmul.f32 %v2371_v2, %v355_v4  ;;  %v1101_v28 = vmul.f32 %v2481_v6, %v2448_v46  ;;  %v614_v29 = vmul.f32 %v2491_v11, %v2403_v13  ;;  %v511_v34 = vsel %vm447_vm14, %v415_v47, %v479_v7 }
  0x2a   : > { %v1231_v32 = vadd.f32 %v1199_v10, %v1131_v22  ;;  %313 = vst.msk [vmem:[#allocation2 + $0x41] sm:$0x1] %vm292_vm1, %v3763_v1  ;;  %v390_v10 = vmul.f32 %v2371_v2, %v354_v52  ;;  %v939_v14 = vadd.f32 %v907_v0, %v839_v62  ;;  %v392_v22 = vmul.f32 %v2371_v2, %v356_v5 }
  0x2b   : > { %314 = vst.msk [vmem:[#allocation2 + $0x59] sm:$0x1] %vm292_vm1, %v3763_v1  ;;  %v393_v36 = vmul.f32 %v2371_v2, %v357_v33  ;;  %v424_v37 = vadd.f32 %v2388_v3, %v2526_v31  ;;  %v425_v38 = vadd.f32 %v2388_v3, %v389_v61  ;;  %v2619_v11 = vsel %vm452_vm12, %v2533_v35, %v484_v8  ;;  %v350_v61 = vld [vmem:[%s2381_s8 + $0x60] sm:$0xff] }
  0x2c   : > { %v1328_v43 = vadd.f32 %v1296_v16, %v1231_v32  ;;  %315 = vst.msk [vmem:[#allocation2 + $0x71] sm:$0x1] %vm292_vm1, %v3763_v1  ;;  %v485_v16 = vmul.f32 0.1, %v421_v59  ;;  %v1036_v25 = vadd.f32 %v1004_v15, %v939_v14  ;;  %v711_v32 = vmul.f32 %v2518_v27, %v2410_v17 }
  0x2d   : > { %316 = vst.msk [vmem:[#allocation2 + $0x89] sm:$0x1] %vm292_vm1, %v3763_v1  ;;  %v426_v42 = vadd.f32 %v2388_v3, %v390_v10  ;;  %v427_v35 = vadd.f32 %v2388_v3, %v391_v20  ;;  %v908_v52 = vmul.f32 %v2546_v45, %v2437_v40  ;;  %vm456_vm0 = vcmp.ge.f32.partialorder %v424_v37, 0.0  ;;  %v351_v10 = vld [vmem:[%s2381_s8 + $0x68] sm:$0xff] }
  0x2e   : > { %v1425_v53 = vadd.f32 %v1393_v23, %v1328_v43  ;;  %317 = vst.msk [vmem:[#allocation2 + $0xa1] sm:$0x1] %vm292_vm1, %v3763_v1  ;;  %v743_v27 = vadd.f32 %v711_v32, %v614_v29  ;;  %v2633_v47 = vsel %vm453_vm15, %v421_v59, %v485_v16  ;;  %v2638_v48 = vadd.f32 %v1101_v28, %v1036_v25 }
  0x2f   : > { %318 = vst.msk [vmem:[#allocation2 + $0xb9] sm:$0x1] %vm292_vm1, %v3763_v1  ;;  %v429_v59 = vadd.f32 %v2388_v3, %v393_v36  ;;  %vm457_vm3 = vcmp.ge.f32.partialorder %v425_v38, 0.0  ;;  %v488_v62 = vmul.f32 0.1, %v424_v37  ;;  %v1005_v4 = vmul.f32 %v2559_v56, %v2439_v41 }
  0x30   : > { %2211 = vmatmul.msk.f32.vlgmr.msra.gmra.mxu0 %vm329_vm2, %v1425_v53  ;;  %319 = vst.msk [vmem:[#allocation2 + $0xd1] sm:$0x1] %vm292_vm1, %v3763_v1  ;;  %v2083_v23 = vld [vmem:[#allocation2 + $0x22] sm:$0xff]  ;;  %v428_v53 = vadd.f32 %v2388_v3, %v392_v22  ;;  %v489_v5 = vmul.f32 0.1, %v425_v38  ;;  %vm458_vm4 = vcmp.ge.f32.partialorder %v426_v42, 0.0  ;;  %v386_v14 = vmul.f32 %v2371_v2, %v350_v61 }
  0x31   : > { %320 = vst.msk [vmem:[#allocation2 + $0xe9] sm:$0x1] %vm292_vm1, %v3763_v1  ;;  %v2598_v24 = vld [vmem:[#allocation2 + $0x3a] sm:$0xff]  ;;  %v808_v39 = vmul.f32 %v2083_v23, %v2415_v19  ;;  %v2626_v31 = vmul.f32 %v2083_v23, %v2448_v46  ;;  %v490_v7 = vmul.f32 0.1, %v426_v42  ;;  %vm459_vm5 = vcmp.ge.f32.partialorder %v427_v35, 0.0 }
  0x32   : > { %321 = vst.msk [vmem:[#allocation2 + $0x101] sm:$0x1] %vm292_vm1, %v3763_v1  ;;  %v2630_v43 = vmul.f32 %v2598_v24, %v2468_v58  ;;  %v491_v8 = vmul.f32 0.1, %v427_v35  ;;  %v1102_v16 = vmul.f32 %v2598_v24, %v2448_v46  ;;  %v492_v20 = vmul.f32 0.1, %v428_v53 }
  0x33   : > { %322 = vst.msk [vmem:[#allocation2 + $0x119] sm:$0x1] %vm292_vm1, %v3763_v1  ;;  %v840_v49 = vadd.f32 %v808_v39, %v743_v27  ;;  %v360_v22 = vld [vmem:[%s2381_s8 + $0xb0] sm:$0xff]  ;;  %vm461_vm6 = vcmp.ge.f32.partialorder %v429_v59, 0.0  ;;  %v493_v23 = vmul.f32 0.1, %v429_v59  ;;  %v615_v25 = vmul.f32 %v2466_v57, %v2403_v13 }
  0x34   : > { %323 = vst.msk [vmem:[#allocation2 + $0x131] sm:$0x1] %vm292_vm1, %v3763_v1  ;;  %v712_v28 = vmul.f32 %v2476_v63, %v2410_v17  ;;  %v520_v29 = vsel %vm456_vm0, %v424_v37, %v488_v62  ;;  %v2670_v32 = vsel %vm457_vm3, %v425_v38, %v489_v5  ;;  %v2673_v33 = vsel %vm458_vm4, %v426_v42, %v490_v7  ;;  %v361_v39 = vld [vmem:[%s2381_s8 + $0xb8] sm:$0xff]  ;;  %v362_v37 = vld [vmem:[%s2381_s8 + $0xc0] sm:$0xff] }
  0x35   : > { %324 = vst.msk [vmem:[#allocation2 + $0x149] sm:$0x1] %vm292_vm1, %v3763_v1  ;;  %v940_v0 = vadd.f32 %v908_v52, %v840_v49  ;;  %v387_v36 = vmul.f32 %v2371_v2, %v351_v10  ;;  %v809_v63 = vmul.f32 %v2481_v6, %v2415_v19  ;;  %v422_v27 = vadd.f32 %v2388_v3, %v386_v14  ;;  %v358_v6 = vld [vmem:[%s2381_s8 + $0xa0] sm:$0xff] }
  0x36   : > { %325 = vst.msk [vmem:[#allocation2 + $0x161] sm:$0x1] %vm292_vm1, %v3763_v1  ;;  %v744_v57 = vadd.f32 %v712_v28, %v615_v25  ;;  %v396_v38 = vmul.f32 %v2371_v2, %v360_v22  ;;  %v2688_v49 = vsel %vm459_vm5, %v427_v35, %v491_v8  ;;  %v2698_v61 = vsel %vm461_vm6, %v429_v59, %v493_v23 }
  0x37   : > { %326 = vst.msk [vmem:[#allocation2 + $0x179] sm:$0x1] %vm292_vm1, %v3763_v1  ;;  %v1037_v15 = vadd.f32 %v1005_v4, %v940_v0  ;;  %v423_v52 = vadd.f32 %v2388_v3, %v387_v36  ;;  %vm454_vm7 = vcmp.ge.f32.partialorder %v422_v27, 0.0  ;;  %v486_v62 = vmul.f32 0.1, %v422_v27 }
  0x38   : > { %327 = vst.msk [vmem:[#allocation2 + $0x191] sm:$0x1] %vm292_vm1, %v3763_v1  ;;  %v397_v0 = vmul.f32 %v2371_v2, %v361_v39  ;;  %v398_v4 = vmul.f32 %v2371_v2, %v362_v37  ;;  %v2708_v59 = vadd.f32 %v809_v63, %v744_v57  ;;  %v2716_v8 = vadd.f32 %v2388_v3, %v396_v38 }
  0x39   : > { %328 = vst.msk [vmem:[#allocation2 + $0x1a9] sm:$0x1] %vm292_vm1, %v3763_v1  ;;  %vm460_vm1 = vcmp.ge.f32.partialorder %v428_v53, 0.0  ;;  %v2685_v42 = vadd.f32 %v1102_v16, %v1037_v15  ;;  %vm455_vm8 = vcmp.ge.f32.partialorder %v423_v52, 0.0  ;;  %v487_v35 = vmul.f32 0.1, %v423_v52 }
  0x3a   : > { %336 = vst.msk [vmem:[#allocation2 + $0x1a0] sm:$0xff] %vm329_vm2, %v3763_v1  ;;  %v2710_v7 = vsel %vm454_vm7, %v422_v27, %v486_v62  ;;  %v364_v16 = vld [vmem:[%s2381_s8 + $0xd0] sm:$0xff]  ;;  %v2733_v22 = vmul.f32 %v2546_v45, %v2403_v13  ;;  %v2737_v23 = vmul.f32 %v2559_v56, %v2410_v17  ;;  %v2754_v45 = vmul.f32 %v2598_v24, %v2415_v19 }
  0x3b   : > { %333 = vst.msk [vmem:[#allocation2 + $0x10] sm:$0x3] %vm332_vm13, %v3763_v1  ;;  %v2722_v15 = vsel %vm455_vm8, %v423_v52, %v487_v35  ;;  %v2743_v25 = vmul.f32 %v2371_v2, %v364_v16  ;;  %v2757_v56 = vadd.f32 %v2388_v3, %v397_v0  ;;  %vm1875_vm7 = vcmask 1040384  }
  0x3c   : > { %335 = vst.msk [vmem:[#allocation2 + $0x198] sm:$0xff] %vm329_vm2, %v3763_v1 }
  0x3d   : > { %337 = vst.msk [vmem:[#allocation2 + $0x1a8] sm:$0x3] %vm332_vm13, %v3763_v1 }
  0x3e   : > { %543 = vst.msk [vmem:[#allocation2 + $0x49] sm:$0xff] %vm329_vm2, %v2570_v60  ;;  %v2691_v60 = vsel %vm460_vm1, %v428_v53, %v492_v20  ;;  %v363_v53 = vld [vmem:[%s2381_s8 + $0xc8] sm:$0xff] }
  0x3f   : > { %544 = vst.msk [vmem:[#allocation2 + $0x51] sm:$0xff] %vm329_vm2, %v511_v34  ;;  %v394_v34 = vmul.f32 %v2371_v2, %v358_v6  ;;  %v2727_v20 = vmul.f32 %v2371_v2, %v363_v53 }
  0x40   : > { %545 = vst.msk [vmem:[#allocation2 + $0x61] sm:$0xff] %vm329_vm2, %v2505_v21 }
  0x41   : > { %546 = vst.msk [vmem:[#allocation2 + $0x69] sm:$0xff] %vm329_vm2, %v2523_v30  ;;  %v2713_v30 = vadd.f32 %v2388_v3, %v394_v34 }
  0x42   : > { %v676_v21 = vld [vmem:[#allocation2 + $0x9] sm:$0xff]  ;;  %547 = vst.msk [vmem:[#allocation2 + $0x79] sm:$0xff] %vm329_vm2, %v2554_v50 }
  0x43   : > { %v773_v5 = vld [vmem:[#allocation2 + $0xa] sm:$0xff]  ;;  %3841 = vst [vmem:[#allocation5_spill] sm:$0xff] %v2713_v30  ;;  %v709_v10 = vmul.f32 %v2410_v17, %v676_v21 }
  0x44   : > { %3842 = vst [vmem:[#allocation6_spill] sm:$0xff] %v2716_v8  ;;  %v806_v14 = vmul.f32 %v2415_v19, %v773_v5  ;;  %v359_v50 = vld [vmem:[%s2381_s8 + $0xa8] sm:$0xff] }
  0x45   : > { %548 = vst.msk [vmem:[#allocation2 + $0x81] sm:$0xff] %vm329_vm2, %v2581_v9  ;;  %v2740_v9 = vmul.f32 %v2371_v2, %v359_v50  ;;  %v741_v28 = vadd.f32 %v709_v10, %v2501_v18  ;;  %v2746_v36 = vld [vmem:[#allocation2 + $0x48] sm:$0xff] }
  0x46   : > { %3843 = vst [vmem:[#allocation7_spill] sm:$0xff] %v2727_v20  ;;  %v2748_v57 = vld [vmem:[#allocation2 + $0x49] sm:$0xff]  ;;  %v1201_v18 = vmul.f32 %v2746_v36, %v2454_v51  ;;  %v2775_v24 = vmul.f32 %v2746_v36, %v2437_v40  ;;  %v2791_v35 = vld [vmem:[#allocation2 + $0x52] sm:$0xff] }
  0x47   : > { %549 = vst.msk [vmem:[#allocation2 + $0x91] sm:$0xff] %vm329_vm2, %v2619_v11  ;;  %v2760_v11 = vadd.f32 %v2388_v3, %v398_v4  ;;  %v1298_v63 = vmul.f32 %v2748_v57, %v2462_v55  ;;  %v2766_v27 = vld [vmem:[#allocation2 + $0x4a] sm:$0xff]  ;;  %v2779_v37 = vmul.f32 %v2748_v57, %v2439_v41  ;;  %v838_v38 = vadd.f32 %v806_v14, %v741_v28  ;;  %v2783_v6 = vld [vmem:[#allocation2 + $0x60] sm:$0xff] }
  0x48   : > { %3844 = vst [vmem:[#allocation8_spill] sm:$0xff] %v2740_v9  ;;  %v2768_v39 = vld [vmem:[#allocation2 + $0x50] sm:$0xff]  ;;  %v1395_v52 = vmul.f32 %v2766_v27, %v2468_v58  ;;  %v2785_v62 = vld [vmem:[#allocation2 + $0x61] sm:$0xff]  ;;  %v1233_v53 = vadd.f32 %v1201_v18, %v2638_v48  ;;  %v619_v0 = vmul.f32 %v2403_v13, %v2783_v6  ;;  %v1396_v5 = vmul.f32 %v2791_v35, %v2468_v58 }
  0x49   : > { %3845 = vst [vmem:[#allocation9_spill] sm:$0xff] %v2743_v25  ;;  %v1202_v34 = vmul.f32 %v2768_v39, %v2454_v51  ;;  %v716_v4 = vmul.f32 %v2410_v17, %v2785_v62  ;;  %v2800_v21 = vld [vmem:[#allocation2 + $0x62] sm:$0xff]  ;;  %v938_v48 = vadd.f32 %v2516_v26, %v838_v38  ;;  %v2813_v50 = vld [vmem:[#allocation2 + $0x78] sm:$0xff]  ;;  %v2820_v1 = vld [vmem:[#allocation2 + $0x6a] sm:$0xff] }
  0x4a   : > { %3846 = vst [vmem:[#allocation10_spill] sm:$0xff] %v2746_v36  ;;  %v2804_v10 = vld [vmem:[#allocation2 + $0x68] sm:$0xff]  ;;  %v2815_v16 = vld [vmem:[#allocation2 + $0x79] sm:$0xff]  ;;  %v913_v26 = vmul.f32 %v2813_v50, %v2437_v40  ;;  %v814_v30 = vmul.f32 %v2415_v19, %v2820_v1 }
  0x4b   : > { %3847 = vst [vmem:[#allocation11_spill] sm:$0xff] %v2748_v57  ;;  %v2806_v14 = vld [vmem:[#allocation2 + $0x69] sm:$0xff]  ;;  %v1234_v28 = vadd.f32 %v1202_v34, %v2685_v42  ;;  %v620_v18 = vmul.f32 %v2403_v13, %v2804_v10  ;;  %v748_v57 = vadd.f32 %v716_v4, %v619_v0  ;;  %v1010_v38 = vmul.f32 %v2815_v16, %v2439_v41 }
  0x4c   : > { %550 = vst.msk [vmem:[#allocation2 + $0x99] sm:$0xff] %vm329_vm2, %v2633_v47  ;;  %v2770_v47 = vld [vmem:[#allocation2 + $0x51] sm:$0xff]  ;;  %v2828_v36 = vld [vmem:[#allocation2 + $0x7a] sm:$0xff]  ;;  %v1035_v34 = vadd.f32 %v2544_v44, %v938_v48  ;;  %v717_v4 = vmul.f32 %v2410_v17, %v2806_v14 }
  0x4d   : > { %3848 = vst [vmem:[#allocation12_spill] sm:$0xff] %v2757_v56  ;;  %v2832_v42 = vld [vmem:[#allocation2 + $0x81] sm:$0xff] }
  0x4e   : > { %3849 = vst [vmem:[#allocation13_spill] sm:$0xff] %v2760_v11  ;;  %v2830_v11 = vld [vmem:[#allocation2 + $0x80] sm:$0xff] }
  0x4f   : > { %3850 = vst [vmem:[#allocation14_spill] sm:$0xff] %v2770_v47  ;;  %v2845_v56 = vld [vmem:[#allocation2 + $0x82] sm:$0xff] }
  0x50   : > { %553 = vst.msk [vmem:[#allocation2 + $0xc1] sm:$0xff] %vm329_vm2, %v520_v29  ;;  %v1299_v29 = vmul.f32 %v2770_v47, %v2462_v55 }
  0x51   : > { %3851 = vst [vmem:[#allocation15_spill] sm:$0xff] %v2791_v35 }
  0x52   : > { %554 = vst.msk [vmem:[#allocation2 + $0xc9] sm:$0xff] %vm329_vm2, %v2670_v32  ;;  %v813_v32 = vmul.f32 %v2415_v19, %v2800_v21  ;;  %v1331_v0 = vadd.f32 %v1299_v29, %v1234_v28 }
  0x53   : > { %3852 = vst [vmem:[#allocation16_spill] sm:$0xff] %v2804_v10  ;;  %v2855_v25 = vld [vmem:[#allocation2 + $0x92] sm:$0xff] }
  0x54   : > { %3853 = vst [vmem:[#allocation17_spill] sm:$0xff] %v2806_v14  ;;  %v2857_v29 = vld [vmem:[#allocation2 + $0x98] sm:$0xff] }
  0x55   : > { %555 = vst.msk [vmem:[#allocation2 + $0xd9] sm:$0xff] %vm329_vm2, %v2673_v33  ;;  %v1330_v33 = vadd.f32 %v1298_v63, %v1233_v53  ;;  %v2839_v63 = vld [vmem:[#allocation2 + $0x90] sm:$0xff]  ;;  %v2859_v28 = vld [vmem:[#allocation2 + $0x99] sm:$0xff] }
  0x56   : > { %3854 = vst [vmem:[#allocation18_spill] sm:$0xff] %v2813_v50  ;;  %v2841_v53 = vld [vmem:[#allocation2 + $0x91] sm:$0xff]  ;;  %v1207_v44 = vmul.f32 %v2839_v63, %v2454_v51 }
  0x57   : > { %3855 = vst [vmem:[#allocation19_spill] sm:$0xff] %v2815_v16  ;;  %v2849_v8 = vadd.f32 %v1395_v52, %v1330_v33  ;;  %v1304_v48 = vmul.f32 %v2841_v53, %v2462_v55  ;;  %v2866_v52 = vadd.f32 %v1396_v5, %v1331_v0  ;;  %v2868_v33 = vld [vmem:[#allocation2 + $0x9a] sm:$0xff]  ;;  %v1108_v0 = vmul.f32 %v2845_v56, %v2448_v46 }
  0x58   : > { %3856 = vst [vmem:[#allocation20_spill] sm:$0xff] %v2820_v1  ;;  %v2870_v20 = vld [vmem:[#allocation2 + $0xc0] sm:$0xff] }
  0x59   : > { %556 = vst.msk [vmem:[#allocation2 + $0xe1] sm:$0xff] %vm329_vm2, %v2688_v49  ;;  %v1107_v49 = vmul.f32 %v2828_v36, %v2448_v46  ;;  %v2880_v5 = vld [vmem:[#allocation2 + $0xc1] sm:$0xff] }
  0x5a   : > { %3857 = vst [vmem:[#allocation21_spill] sm:$0xff] %v2828_v36 }
  0x5b   : > { %3858 = vst [vmem:[#allocation22_spill] sm:$0xff] %v2830_v11 }
  0x5c   : > { %3859 = vst [vmem:[#allocation23_spill] sm:$0xff] %v2832_v42 }
  0x5d   : > { %557 = vst.msk [vmem:[#allocation2 + $0xf1] sm:$0xff] %vm329_vm2, %v2691_v60  ;;  %v845_v60 = vadd.f32 %v813_v32, %v748_v57  ;;  %v1401_v57 = vmul.f32 %v2855_v25, %v2468_v58  ;;  %v749_v32 = vadd.f32 %v717_v4, %v620_v18  ;;  %v2882_v18 = vld [vmem:[#allocation2 + $0xc2] sm:$0xff]  ;;  %v2891_v4 = vld [vmem:[#allocation2 + $0xd8] sm:$0xff] }
  0x5e   : > { %3860 = vst [vmem:[#allocation24_spill] sm:$0xff] %v2845_v56 }
  0x5f   : > { %558 = vst.msk [vmem:[#allocation2 + $0xf9] sm:$0xff] %vm329_vm2, %v2698_v61  ;;  %v1132_v61 = vadd.f32 %v2626_v31, %v1035_v34  ;;  %v945_v2 = vadd.f32 %v913_v26, %v845_v60  ;;  %v914_v31 = vmul.f32 %v2830_v11, %v2437_v40  ;;  %v1305_v26 = vmul.f32 %v2859_v28, %v2462_v55  ;;  %v2893_v60 = vld [vmem:[#allocation2 + $0xd9] sm:$0xff] }
  0x60   : > { %3861 = vst [vmem:[#allocation25_spill] sm:$0xff] %v2857_v29  ;;  %v846_v9 = vadd.f32 %v814_v30, %v749_v32 }
  0x61   : > { %3862 = vst [vmem:[#allocation26_spill] sm:$0xff] %v2859_v28  ;;  %v1232_v34 = vadd.f32 %v2568_v54, %v1132_v61  ;;  %v1042_v3 = vadd.f32 %v1010_v38, %v945_v2  ;;  %v627_v54 = vmul.f32 %v2403_v13, %v2870_v20  ;;  %v2899_v61 = vld [vmem:[#allocation2 + $0xda] sm:$0xff]  ;;  %v821_v28 = vmul.f32 %v2415_v19, %v2882_v18 }
  0x62   : > { %551 = vst.msk [vmem:[#allocation2 + $0xa9] sm:$0xff] %vm329_vm2, %v2710_v7  ;;  %v1011_v7 = vmul.f32 %v2832_v42, %v2439_v41  ;;  %v921_v2 = vmul.f32 %v2891_v4, %v2437_v40 }
  0x63   : > { %3863 = vst [vmem:[#allocation27_spill] sm:$0xff] %v2866_v52  ;;  %v1402_v52 = vmul.f32 %v2868_v33, %v2468_v58  ;;  %v1329_v56 = vadd.f32 %v2588_v12, %v1232_v34  ;;  %v1139_v32 = vadd.f32 %v1107_v49, %v1042_v3  ;;  %v1115_v12 = vmul.f32 %v2899_v61, %v2448_v46 }
  0x64   : > { %3864 = vst [vmem:[#allocation28_spill] sm:$0xff] %v2868_v33  ;;  %v2908_v30 = vld [vmem:[#allocation2 + $0xf0] sm:$0xff]  ;;  %v946_v33 = vadd.f32 %v914_v31, %v846_v9  ;;  %v941_v49 = vadd.f32 %v2775_v24, %v2708_v59  ;;  %v621_v24 = vmul.f32 %v2813_v50, %v2403_v13 }
  0x65   : > { %3865 = vst [vmem:[#allocation29_spill] sm:$0xff] %v2870_v20  ;;  %v2910_v38 = vld [vmem:[#allocation2 + $0xf1] sm:$0xff]  ;;  %v1018_v20 = vmul.f32 %v2893_v60, %v2439_v41  ;;  %v1239_v11 = vadd.f32 %v1207_v44, %v1139_v32  ;;  %v1300_v44 = vmul.f32 %v2462_v55, %v2785_v62  ;;  %v2959_v50 = vld [vmem:[#allocation2 + $0xc9] sm:$0xff] }
  0x66   : > { %552 = vst.msk [vmem:[#allocation2 + $0xb1] sm:$0xff] %vm329_vm2, %v2722_v15  ;;  %v1208_v15 = vmul.f32 %v2857_v29, %v2454_v51  ;;  %v724_v29 = vmul.f32 %v2410_v17, %v2880_v5  ;;  %v2916_v34 = vld [vmem:[#allocation2 + $0xf2] sm:$0xff]  ;;  %v1312_v42 = vmul.f32 %v2910_v38, %v2462_v55  ;;  %v1043_v3 = vadd.f32 %v1011_v7, %v946_v33 }
  0x67   : > { %3866 = vst [vmem:[#allocation30_spill] sm:$0xff] %v2880_v5  ;;  %v1426_v5 = vadd.f32 %v2630_v43, %v1329_v56  ;;  %v2925_v9 = vmul.f32 %v2916_v34, %v2468_v58  ;;  %v1103_v43 = vmul.f32 %v2766_v27, %v2448_v46  ;;  %v1203_v56 = vmul.f32 %v2454_v51, %v2783_v6 }
  0x68   : > { %3867 = vst [vmem:[#allocation31_spill] sm:$0xff] %v2882_v18  ;;  %v756_v18 = vadd.f32 %v724_v29, %v627_v54  ;;  %v1336_v29 = vadd.f32 %v1304_v48, %v1239_v11  ;;  %v1140_v33 = vadd.f32 %v1108_v0, %v1043_v3  ;;  %v1038_v7 = vadd.f32 %v2779_v37, %v941_v49  ;;  %v2953_v3 = vld [vmem:[#allocation2 + $0xc8] sm:$0xff] }
  0x69   : > { %3868 = vst [vmem:[#allocation32_spill] sm:$0xff] %v2891_v4  ;;  %v1215_v4 = vmul.f32 %v2908_v30, %v2454_v51  ;;  %2212 = vmatmul.msk.f32.gmra.mxu0 %vm329_vm2, %v1426_v5  ;;  %v1397_v54 = vmul.f32 %v2468_v58, %v2800_v21  ;;  %v815_v5 = vmul.f32 %v2828_v36, %v2415_v19  ;;  %v2947_v32 = vld [vmem:[#allocation2 + $0xa9] sm:$0xff] }
  0x6a   : > { %v853_v31 = vadd.f32 %v821_v28, %v756_v18  ;;  %v718_v28 = vmul.f32 %v2815_v16, %v2410_v17  ;;  %v2945_v18 = vld [vmem:[#allocation2 + $0xa8] sm:$0xff]  ;;  %3870 = vst [vmem:[#allocation34_spill] sm:$0xff] %v2947_v32  ;;  %v1433_v11 = vadd.f32 %v1401_v57, %v1336_v29  ;;  %v1240_v48 = vadd.f32 %v1208_v15, %v1140_v33  ;;  %v2968_v33 = vld [vmem:[#allocation2 + $0xe0] sm:$0xff] }
  0x6b   : > { %3869 = vst [vmem:[#allocation33_spill] sm:$0xff] %v2945_v18  ;;  %v1135_v37 = vadd.f32 %v1103_v43, %v1038_v7  ;;  %v915_v0 = vmul.f32 %v2839_v63, %v2437_v40  ;;  %v1012_v16 = vmul.f32 %v2841_v53, %v2439_v41  ;;  %v1109_v36 = vmul.f32 %v2855_v25, %v2448_v46  ;;  %v2961_v57 = vld [vmem:[#allocation2 + $0xca] sm:$0xff]  ;;  %v2970_v7 = vld [vmem:[#allocation2 + $0xe1] sm:$0xff] }
  0x6c   : > { %v953_v59 = vadd.f32 %v921_v2, %v853_v31  ;;  %3872 = vst [vmem:[#allocation36_spill] sm:$0xff] %v2953_v3  ;;  %v750_v31 = vadd.f32 %v718_v28, %v621_v24  ;;  %2219 = vmatmul.msk.f32.vlgmr.msra.gmra.mxu1 %vm329_vm2, %v1433_v11  ;;  %v1337_v15 = vadd.f32 %v1305_v26, %v1240_v48  ;;  %v2976_v26 = vld [vmem:[#allocation2 + $0xe2] sm:$0xff] }
  0x6d   : > { %v2951_v2 = vld [vmem:[#allocation2 + $0xaa] sm:$0xff]  ;;  %3873 = vst [vmem:[#allocation37_spill] sm:$0xff] %v2959_v50  ;;  %v1235_v43 = vadd.f32 %v1203_v56, %v1135_v37  ;;  %v1209_v29 = vmul.f32 %v2945_v18, %v2454_v51  ;;  %v628_v11 = vmul.f32 %v2403_v13, %v2953_v3  ;;  %v2978_v56 = vld [vmem:[#allocation2 + $0xf8] sm:$0xff]  ;;  %v822_v18 = vmul.f32 %v2415_v19, %v2961_v57 }
  0x6e   : > { %3871 = vst [vmem:[#allocation35_spill] sm:$0xff] %v2951_v2  ;;  %v1050_v49 = vadd.f32 %v1018_v20, %v953_v59  ;;  %v1306_v20 = vmul.f32 %v2947_v32, %v2462_v55  ;;  %v847_v24 = vadd.f32 %v815_v5, %v750_v31  ;;  %v1403_v28 = vmul.f32 %v2951_v2, %v2468_v58  ;;  %v2986_v5 = vld [vmem:[#allocation2 + $0xfa] sm:$0xff] }
  0x6f   : > { %3874 = vst [vmem:[#allocation38_spill] sm:$0xff] %v2961_v57  ;;  %v1434_v48 = vadd.f32 %v1402_v52, %v1337_v15  ;;  %v1332_v37 = vadd.f32 %v1300_v44, %v1235_v43  ;;  %v725_v32 = vmul.f32 %v2410_v17, %v2959_v50  ;;  %v922_v3 = vmul.f32 %v2968_v33, %v2437_v40 }
  0x70   : > { %3875 = vst [vmem:[#allocation39_spill] sm:$0xff] %v2968_v33  ;;  %v1147_v59 = vadd.f32 %v1115_v12, %v1050_v49  ;;  %v2984_v12 = vld [vmem:[#allocation2 + $0xf9] sm:$0xff]  ;;  %v947_v31 = vadd.f32 %v915_v0, %v847_v24  ;;  %v1019_v52 = vmul.f32 %v2970_v7, %v2439_v41  ;;  %v1116_v43 = vmul.f32 %v2976_v26, %v2448_v46 }
  0x71   : > { %3876 = vst [vmem:[#allocation40_spill] sm:$0xff] %v2970_v7  ;;  %2213 = vmatmul.msk.f32.gmra.mxu0 %vm329_vm2, %v2849_v8  ;;  %v2994_v44 = vadd.f32 %v1397_v54, %v1332_v37  ;;  %v757_v15 = vadd.f32 %v725_v32, %v628_v11  ;;  %v1216_v57 = vmul.f32 %v2978_v56, %v2454_v51 }
  0x72   : > { %3877 = vst [vmem:[#allocation41_spill] sm:$0xff] %v2976_v26  ;;  %v1247_v49 = vadd.f32 %v1215_v4, %v1147_v59  ;;  %v1044_v2 = vadd.f32 %v1012_v16, %v947_v31  ;;  %v1313_v8 = vmul.f32 %v2984_v12, %v2462_v55  ;;  %v1410_v4 = vmul.f32 %v2986_v5, %v2468_v58  ;;  %v3030_v31 = vld [vmem:[#allocation2 + $0xb1] sm:$0xff] }
  0x73   : > { %3878 = vst [vmem:[#allocation42_spill] sm:$0xff] %v2978_v56  ;;  %v854_v0 = vadd.f32 %v822_v18, %v757_v15  ;;  %v745_v54 = vadd.f32 %v2737_v23, %v2733_v22  ;;  %v910_v32 = vmul.f32 %v2768_v39, %v2437_v40  ;;  %v1007_v59 = vmul.f32 %v2770_v47, %v2439_v41  ;;  %v3032_v15 = vld [vmem:[#allocation2 + $0xb2] sm:$0xff] }
  0x74   : > { %3879 = vst [vmem:[#allocation43_spill] sm:$0xff] %v2984_v12  ;;  %v1344_v50 = vadd.f32 %v1312_v42, %v1247_v49  ;;  %v1141_v42 = vadd.f32 %v1109_v36, %v1044_v2  ;;  %v1104_v16 = vmul.f32 %v2791_v35, %v2448_v46  ;;  %v1204_v11 = vmul.f32 %v2454_v51, %v2804_v10  ;;  %v3021_v49 = vld [vmem:[#allocation2 + $0xb0] sm:$0xff]  ;;  %v3888_v10 = vld [vmem:[#allocation28_spill] sm:$0xff] }
  0x75   : > { %3880 = vst [vmem:[#allocation44_spill] sm:$0xff] %v2986_v5  ;;  %2220 = vmatmul.msk.f32.gmra.mxu1 %vm329_vm2, %v1434_v48  ;;  %v954_v18 = vadd.f32 %v922_v3, %v854_v0  ;;  %v842_v22 = vadd.f32 %v2754_v45, %v745_v54  ;;  %v1301_v23 = vmul.f32 %v2462_v55, %v2806_v14  ;;  %v3883_v2 = vld [vmem:[#allocation23_spill] sm:$0xff]  ;;  %v3884_v3 = vld [vmem:[#allocation24_spill] sm:$0xff] }
  0x76   : > { %v1441_v24 = vadd.f32 %v2925_v9, %v1344_v50  ;;  %v1398_v37 = vmul.f32 %v2468_v58, %v2820_v1  ;;  %3881 = vst [vmem:[#allocation45_spill] sm:$0xff] %v3021_v49  ;;  %v1241_v36 = vadd.f32 %v1209_v29, %v1141_v42  ;;  %v3882_v50 = vld [vmem:[#allocation22_spill] sm:$0xff]  ;;  %v719_v48 = vmul.f32 %v3883_v2, %v2410_v17  ;;  %v3885_v1 = vld [vmem:[#allocation25_spill] sm:$0xff]  ;;  %v3887_v42 = vld [vmem:[#allocation27_spill] sm:$0xff] }
  0x77   : > { %v622_v9 = vmul.f32 %v3882_v50, %v2403_v13  ;;  %v816_v45 = vmul.f32 %v3884_v3, %v2415_v19  ;;  %v1051_v0 = vadd.f32 %v1019_v52, %v954_v18  ;;  %v942_v54 = vadd.f32 %v910_v32, %v842_v22  ;;  %v3886_v29 = vld [vmem:[#allocation26_spill] sm:$0xff] }
  0x78   : > { %2227 = vmatmul.msk.f32.vlgmr.msra.gmra.mxu2 %vm329_vm2, %v1441_v24  ;;  %v916_v14 = vmul.f32 %v3885_v1, %v2437_v40  ;;  %v1013_v24 = vmul.f32 %v3886_v29, %v2439_v41  ;;  %v1338_v50 = vadd.f32 %v1306_v20, %v1241_v36  ;;  %v1110_v3 = vmul.f32 %v3888_v10, %v2448_v46  ;;  %v3889_v1 = vld [vmem:[#allocation8_spill] sm:$0xff]  ;;  %v3891_v36 = vld [vmem:[#allocation5_spill] sm:$0xff] }
  0x79   : > { %2214 = vmatmul.msk.f32.gmra.mxu0 %vm329_vm2, %v3887_v42  ;;  %v751_v2 = vadd.f32 %v719_v48, %v622_v9  ;;  %v1210_v35 = vmul.f32 %v3021_v49, %v2454_v51  ;;  %v1148_v47 = vadd.f32 %v1116_v43, %v1051_v0  ;;  %v1039_v52 = vadd.f32 %v1007_v59, %v942_v54  ;;  %v3890_v42 = vld [vmem:[#allocation4_spill] sm:$0xff] }
  0x7a   : > { %v1307_v32 = vmul.f32 %v3030_v31, %v2462_v55  ;;  %v1404_v18 = vmul.f32 %v3032_v15, %v2468_v58  ;;  %v1435_v22 = vadd.f32 %v1403_v28, %v1338_v50  ;;  %v431_v20 = vadd.f32 %v3890_v42, %v3889_v1  ;;  %v3892_v43 = vld [vmem:[#allocation32_spill] sm:$0xff] }
  0x7b   : > { %v848_v29 = vadd.f32 %v816_v45, %v751_v2  ;;  %vm462_vm9 = vcmp.ge.f32.partialorder %v3891_v36, 0.0  ;;  %v1248_v9 = vadd.f32 %v1216_v57, %v1148_v47  ;;  %v1136_v48 = vadd.f32 %v1104_v16, %v1039_v52  ;;  %v365_v57 = vld [vmem:[%s2381_s8 + $0xd8] sm:$0xff] }
  0x7c   : > { %v494_v49 = vmul.f32 0.1, %v3891_v36  ;;  %v629_v59 = vmul.f32 %v3892_v43, %v2403_v13  ;;  %vm463_vm10 = vcmp.ge.f32.partialorder %v431_v20, 0.0  ;;  %v495_v54 = vmul.f32 0.1, %v431_v20  ;;  %v3897_v43 = vld [vmem:[#allocation12_spill] sm:$0xff] }
  0x7d   : > { %v948_v0 = vadd.f32 %v916_v14, %v848_v29  ;;  %v726_v28 = vmul.f32 %v2893_v60, %v2410_v17  ;;  %2221 = vmatmul.msk.f32.gmra.mxu1 %vm329_vm2, %v1435_v22  ;;  %v1345_v50 = vadd.f32 %v1313_v8, %v1248_v9  ;;  %v1236_v2 = vadd.f32 %v1204_v11, %v1136_v48  ;;  %v3896_v48 = vld [vmem:[#allocation6_spill] sm:$0xff] }
  0x7e   : > { %v526_v1 = vsel %vm462_vm9, %v3891_v36, %v494_v49  ;;  %v823_v47 = vmul.f32 %v2899_v61, %v2415_v19  ;;  %v527_v45 = vsel %vm463_vm10, %v431_v20, %v495_v54  ;;  %v923_v29 = vmul.f32 %v2908_v30, %v2437_v40  ;;  %v3894_v20 = vld [vmem:[#allocation7_spill] sm:$0xff] }
  0x7f   : > { %v1045_v16 = vadd.f32 %v1013_v24, %v948_v0  ;;  %559 = vst.msk [vmem:[#allocation2 + $0x109] sm:$0xff] %vm329_vm2, %v526_v1  ;;  %v758_v14 = vadd.f32 %v726_v28, %v629_v59  ;;  %v1442_v52 = vadd.f32 %v1410_v4, %v1345_v50  ;;  %v1333_v60 = vadd.f32 %v1301_v23, %v1236_v2  ;;  %v3893_v24 = vld [vmem:[#allocation3_spill] sm:$0xff]  ;;  %v3895_v23 = vld [vmem:[#allocation9_spill] sm:$0xff] }
  0x80   : > { %560 = vst.msk [vmem:[#allocation2 + $0x111] sm:$0xff] %vm329_vm2, %v527_v45  ;;  %v1020_v8 = vmul.f32 %v2910_v38, %v2439_v41  ;;  %v1117_v11 = vmul.f32 %v2916_v34, %v2448_v46  ;;  %v401_v22 = vmul.f32 %v3893_v24, %v365_v57  ;;  %v435_v36 = vadd.f32 %v3890_v42, %v3894_v20  ;;  %v3899_v24 = vld [vmem:[#allocation10_spill] sm:$0xff] }
  0x81   : > { %2215 = vmatmul.msk.f32.gmra.mxu0 %vm329_vm2, %v2994_v44  ;;  %v1142_v61 = vadd.f32 %v1110_v3, %v1045_v16  ;;  %v855_v49 = vadd.f32 %v823_v47, %v758_v14  ;;  %2228 = vmatmul.msk.f32.gmra.mxu2 %vm329_vm2, %v1442_v52  ;;  %v1430_v4 = vadd.f32 %v1398_v37, %v1333_v60  ;;  %vm464_vm11 = vcmp.ge.f32.partialorder %v3896_v48, 0.0  ;;  %v3898_v3 = vld [vmem:[#allocation13_spill] sm:$0xff] }
  0x82   : > { %v436_v9 = vadd.f32 %v3890_v42, %v3895_v23  ;;  %vm465_vm12 = vcmp.ge.f32.partialorder %v3897_v43, 0.0  ;;  %v437_v44 = vadd.f32 %v3890_v42, %v401_v22  ;;  %vm466_vm14 = vcmp.ge.f32.partialorder %v3898_v3, 0.0 }
  0x83   : > { %v1242_v59 = vadd.f32 %v1210_v35, %v1142_v61  ;;  %v955_v0 = vadd.f32 %v923_v29, %v855_v49  ;;  %vm467_vm15 = vcmp.ge.f32.partialorder %v435_v36, 0.0  ;;  %v496_v54 = vmul.f32 0.1, %v3896_v48 }
  0x84   : > { %vm468_vm0 = vcmp.ge.f32.partialorder %v436_v9, 0.0  ;;  %v497_v28 = vmul.f32 0.1, %v3897_v43  ;;  %vm469_vm3 = vcmp.ge.f32.partialorder %v437_v44, 0.0  ;;  %v498_v2 = vmul.f32 0.1, %v3898_v3 }
  0x85   : > { %v1339_v37 = vadd.f32 %v1307_v32, %v1242_v59  ;;  %v1052_v50 = vadd.f32 %v1020_v8, %v955_v0  ;;  %v499_v35 = vmul.f32 0.1, %v435_v36  ;;  %v500_v57 = vmul.f32 0.1, %v436_v9 }
  0x86   : > { %v3084_v1 = vld [vmem:[#allocation2 + $0x108] sm:$0xff]  ;;  %v528_v42 = vsel %vm464_vm11, %v3896_v48, %v496_v54  ;;  %v529_v16 = vsel %vm465_vm12, %v3897_v43, %v497_v28  ;;  %v501_v8 = vmul.f32 0.1, %v437_v44  ;;  %v530_v61 = vsel %vm466_vm14, %v3898_v3, %v498_v2 }
  0x87   : > { %v3086_v47 = vld [vmem:[#allocation2 + $0x109] sm:$0xff]  ;;  %v1436_v45 = vadd.f32 %v1404_v18, %v1339_v37  ;;  %v1149_v32 = vadd.f32 %v1117_v11, %v1052_v50  ;;  %v1217_v14 = vmul.f32 %v3084_v1, %v2454_v51  ;;  %561 = vst.msk [vmem:[#allocation2 + $0x121] sm:$0xff] %vm329_vm2, %v528_v42  ;;  %v531_v18 = vsel %vm467_vm15, %v435_v36, %v499_v35  ;;  %v3903_v37 = vld [vmem:[#allocation21_spill] sm:$0xff] }
  0x88   : > { %v1314_v29 = vmul.f32 %v3086_v47, %v2462_v55  ;;  %v3098_v52 = vld [vmem:[#allocation2 + $0x10a] sm:$0xff]  ;;  %562 = vst.msk [vmem:[#allocation2 + $0x129] sm:$0xff] %vm329_vm2, %v529_v16  ;;  %v532_v49 = vsel %vm468_vm0, %v436_v9, %v500_v57  ;;  %v617_v22 = vmul.f32 %v3899_v24, %v2403_v13  ;;  %v533_v20 = vsel %vm469_vm3, %v437_v44, %v501_v8  ;;  %v3905_v42 = vld [vmem:[#allocation33_spill] sm:$0xff] }
  0x89   : > { %v1411_v60 = vmul.f32 %v3098_v52, %v2468_v58  ;;  %2216 = vmatmul.msk.f32.gmra.mxu0 %vm329_vm2, %v1430_v4  ;;  %2222 = vmatmul.msk.f32.gmra.mxu1 %vm329_vm2, %v1436_v45  ;;  %v1249_v11 = vadd.f32 %v1217_v14, %v1149_v32  ;;  %563 = vst.msk [vmem:[#allocation2 + $0x139] sm:$0xff] %vm329_vm2, %v530_v61  ;;  %v3900_v36 = vld [vmem:[#allocation11_spill] sm:$0xff]  ;;  %v3901_v44 = vld [vmem:[#allocation18_spill] sm:$0xff]  ;;  %v3908_v8 = vld [vmem:[#allocation29_spill] sm:$0xff] }
  0x8a   : > { %564 = vst.msk [vmem:[#allocation2 + $0x141] sm:$0xff] %vm329_vm2, %v531_v18  ;;  %v714_v23 = vmul.f32 %v3900_v36, %v2410_v17  ;;  %v811_v4 = vmul.f32 %v2766_v27, %v2415_v19  ;;  %v911_v9 = vmul.f32 %v2437_v40, %v2783_v6  ;;  %v1008_v43 = vmul.f32 %v2439_v41, %v2785_v62  ;;  %v3902_v27 = vld [vmem:[#allocation19_spill] sm:$0xff] }
  0x8b   : > { %v1346_v48 = vadd.f32 %v1314_v29, %v1249_v11  ;;  %565 = vst.msk [vmem:[#allocation2 + $0x151] sm:$0xff] %vm329_vm2, %v532_v49  ;;  %v1105_v59 = vmul.f32 %v2448_v46, %v2800_v21  ;;  %v1205_v3 = vmul.f32 %v3901_v44, %v2454_v51  ;;  %v3132_v54 = vmul.f32 %v3902_v27, %v2462_v55  ;;  %v3907_v32 = vld [vmem:[#allocation35_spill] sm:$0xff] }
  0x8c   : > { %566 = vst.msk [vmem:[#allocation2 + $0x159] sm:$0xff] %vm329_vm2, %v533_v20  ;;  %v746_v0 = vadd.f32 %v714_v23, %v617_v22  ;;  %v623_v28 = vmul.f32 %v2839_v63, %v2403_v13  ;;  %v3138_v62 = vmul.f32 %v3903_v37, %v2468_v58  ;;  %v720_v21 = vmul.f32 %v2841_v53, %v2410_v17  ;;  %v3906_v63 = vld [vmem:[#allocation34_spill] sm:$0xff]  ;;  %v3912_v44 = vld [vmem:[#allocation31_spill] sm:$0xff] }
  0x8d   : > { %v1443_v6 = vadd.f32 %v1411_v60, %v1346_v48  ;;  %v817_v50 = vmul.f32 %v2855_v25, %v2415_v19  ;;  %v917_v16 = vmul.f32 %v3905_v42, %v2437_v40  ;;  %v1014_v45 = vmul.f32 %v3906_v63, %v2439_v41  ;;  %v3911_v22 = vld [vmem:[#allocation30_spill] sm:$0xff] }
  0x8e   : > { %v3144_v2 = vld [vmem:[#allocation2 + $0x120] sm:$0xff]  ;;  %v843_v57 = vadd.f32 %v811_v4, %v746_v0  ;;  %v1111_v14 = vmul.f32 %v3907_v32, %v2448_v46  ;;  %v752_v60 = vadd.f32 %v720_v21, %v623_v28  ;;  %v1211_v61 = vmul.f32 %v2454_v51, %v3908_v8 }
  0x8f   : > { %v3146_v35 = vld [vmem:[#allocation2 + $0x121] sm:$0xff]  ;;  %2229 = vmatmul.msk.f32.gmra.mxu2 %vm329_vm2, %v1443_v6  ;;  %v635_v53 = vmul.f32 %v2403_v13, %v3144_v2  ;;  %v1308_v20 = vmul.f32 %v2462_v55, %v3911_v22  ;;  %v630_v36 = vmul.f32 %v2968_v33, %v2403_v13  ;;  %v1405_v27 = vmul.f32 %v2468_v58, %v3912_v44  ;;  %v3195_v22 = vld [vmem:[#allocation2 + $0x110] sm:$0xff] }
  0x90   : > { %3904 = vst [vmem:[#allocation27_spill] sm:$0xff] %v3146_v35  ;;  %v732_v25 = vmul.f32 %v2410_v17, %v3146_v35  ;;  %v3159_v29 = vld [vmem:[#allocation2 + $0x122] sm:$0xff]  ;;  %v3165_v11 = vld [vmem:[#allocation2 + $0x138] sm:$0xff]  ;;  %v943_v24 = vadd.f32 %v911_v9, %v843_v57  ;;  %v849_v0 = vadd.f32 %v817_v50, %v752_v60  ;;  %v727_v21 = vmul.f32 %v2970_v7, %v2410_v17  ;;  %v3211_v63 = vld [vmem:[#allocation2 + $0x12a] sm:$0xff] }
  0x91   : > { %v829_v18 = vmul.f32 %v2415_v19, %v3159_v29  ;;  %3909 = vst [vmem:[#allocation28_spill] sm:$0xff] %v3165_v11  ;;  %v3167_v49 = vld [vmem:[#allocation2 + $0x139] sm:$0xff]  ;;  %v929_v4 = vmul.f32 %v3165_v11, %v2437_v40  ;;  %v824_v57 = vmul.f32 %v2976_v26, %v2415_v19  ;;  %v924_v26 = vmul.f32 %v2978_v56, %v2437_v40 }
  0x92   : > { %3910 = vst [vmem:[#allocation8_spill] sm:$0xff] %v3167_v49  ;;  %v764_v23 = vadd.f32 %v732_v25, %v635_v53  ;;  %v3175_v48 = vld [vmem:[#allocation2 + $0x13a] sm:$0xff]  ;;  %v1026_v28 = vmul.f32 %v3167_v49, %v2439_v41  ;;  %v3181_v9 = vld [vmem:[#allocation2 + $0x150] sm:$0xff]  ;;  %v1040_v37 = vadd.f32 %v1008_v43, %v943_v24  ;;  %v949_v8 = vadd.f32 %v917_v16, %v849_v0 }
  0x93   : > { %v3183_v6 = vld [vmem:[#allocation2 + $0x151] sm:$0xff]  ;;  %v1123_v50 = vmul.f32 %v3175_v48, %v2448_v46  ;;  %v1223_v25 = vmul.f32 %v3181_v9, %v2454_v51  ;;  %3913 = vst [vmem:[#allocation4_spill] sm:$0xff] %v3195_v22  ;;  %v759_v44 = vadd.f32 %v727_v21, %v630_v36  ;;  %v1021_v16 = vmul.f32 %v2984_v12, %v2439_v41  ;;  %v3209_v0 = vld [vmem:[#allocation2 + $0x129] sm:$0xff] }
  0x94   : > { %v861_v53 = vadd.f32 %v829_v18, %v764_v23  ;;  %v3193_v60 = vld [vmem:[#allocation2 + $0x152] sm:$0xff]  ;;  %v1320_v43 = vmul.f32 %v3183_v6, %v2462_v55  ;;  %v1137_v24 = vadd.f32 %v1105_v59, %v1040_v37  ;;  %v3203_v23 = vld [vmem:[#allocation2 + $0x128] sm:$0xff]  ;;  %v1046_v32 = vadd.f32 %v1014_v45, %v949_v8  ;;  %3916 = vst [vmem:[#allocation3_spill] sm:$0xff] %v3209_v0 }
  0x95   : > { %v3201_v18 = vld [vmem:[#allocation2 + $0x111] sm:$0xff]  ;;  %3915 = vst [vmem:[#allocation32_spill] sm:$0xff] %v3203_v23  ;;  %v1417_v33 = vmul.f32 %v3193_v60, %v2468_v58  ;;  %v856_v36 = vadd.f32 %v824_v57, %v759_v44  ;;  %v1118_v37 = vmul.f32 %v2986_v5, %v2448_v46  ;;  %v1218_v21 = vmul.f32 %v3195_v22, %v2454_v51  ;;  %v3232_v5 = vld [vmem:[#allocation2 + $0x142] sm:$0xff] }
  0x96   : > { %3914 = vst [vmem:[#allocation5_spill] sm:$0xff] %v3201_v18  ;;  %v961_v7 = vadd.f32 %v929_v4, %v861_v53  ;;  %v1237_v59 = vadd.f32 %v1205_v3, %v1137_v24  ;;  %v3217_v4 = vld [vmem:[#allocation2 + $0x112] sm:$0xff]  ;;  %v3219_v53 = vld [vmem:[#allocation2 + $0x140] sm:$0xff]  ;;  %v1143_v8 = vadd.f32 %v1111_v14, %v1046_v32  ;;  %v1315_v12 = vmul.f32 %v3201_v18, %v2462_v55 }
  0x97   : > { %3917 = vst [vmem:[#allocation7_spill] sm:$0xff] %v3211_v63  ;;  %v636_v56 = vmul.f32 %v2403_v13, %v3203_v23  ;;  %v3225_v3 = vld [vmem:[#allocation2 + $0x141] sm:$0xff]  ;;  %v956_v24 = vadd.f32 %v924_v26, %v856_v36  ;;  %v733_v44 = vmul.f32 %v2410_v17, %v3209_v0  ;;  %v830_v22 = vmul.f32 %v2415_v19, %v3211_v63 }
  0x98   : > { %3918 = vst [vmem:[#allocation9_spill] sm:$0xff] %v3217_v4  ;;  %v1058_v45 = vadd.f32 %v1026_v28, %v961_v7  ;;  %v1334_v57 = vadd.f32 %v3132_v54, %v1237_v59  ;;  %v3234_v7 = vld [vmem:[#allocation2 + $0x158] sm:$0xff]  ;;  %v1243_v14 = vadd.f32 %v1211_v61, %v1143_v8  ;;  %v1412_v28 = vmul.f32 %v3217_v4, %v2468_v58 }
  0x99   : > { %3919 = vst [vmem:[#allocation6_spill] sm:$0xff] %v3219_v53  ;;  %v930_v23 = vmul.f32 %v3219_v53, %v2437_v40  ;;  %v3240_v54 = vld [vmem:[#allocation2 + $0x159] sm:$0xff]  ;;  %v1053_v59 = vadd.f32 %v1021_v16, %v956_v24  ;;  %v765_v36 = vadd.f32 %v733_v44, %v636_v56  ;;  %v1027_v63 = vmul.f32 %v3225_v3, %v2439_v41  ;;  %v3922_v16 = vld [vmem:[#allocation14_spill] sm:$0xff]  ;;  %v3923_v24 = vld [vmem:[#allocation15_spill] sm:$0xff] }
  0x9a   : > { %3920 = vst [vmem:[#allocation12_spill] sm:$0xff] %v3225_v3  ;;  %v1155_v32 = vadd.f32 %v1123_v50, %v1058_v45  ;;  %v1431_v26 = vadd.f32 %v3138_v62, %v1334_v57  ;;  %v1340_v18 = vadd.f32 %v1308_v20, %v1243_v14  ;;  %v1124_v61 = vmul.f32 %v3232_v5, %v2448_v46  ;;  %v3249_v45 = vld [vmem:[#allocation2 + $0x15a] sm:$0xff] }
  0x9b   : > { %3921 = vst [vmem:[#allocation13_spill] sm:$0xff] %v3232_v5  ;;  %v1224_v50 = vmul.f32 %v3234_v7, %v2454_v51  ;;  %v1150_v8 = vadd.f32 %v1118_v37, %v1053_v59  ;;  %v862_v53 = vadd.f32 %v830_v22, %v765_v36  ;;  %v1321_v56 = vmul.f32 %v3240_v54, %v2462_v55  ;;  %v3924_v22 = vld [vmem:[#allocation16_spill] sm:$0xff] }
  0x9c   : > { %v1255_v0 = vadd.f32 %v1223_v25, %v1155_v32  ;;  %2217 = vmatmul.msk.f32.gmra.mxu0 %vm329_vm2, %v1431_v26  ;;  %v618_v62 = vmul.f32 %v2768_v39, %v2403_v13  ;;  %v1437_v20 = vadd.f32 %v1405_v27, %v1340_v18  ;;  %v715_v57 = vmul.f32 %v3922_v16, %v2410_v17  ;;  %v3926_v18 = vld [vmem:[#allocation20_spill] sm:$0xff] }
  0x9d   : > { %v812_v44 = vmul.f32 %v3923_v24, %v2415_v19  ;;  %v1250_v32 = vadd.f32 %v1218_v21, %v1150_v8  ;;  %v962_v14 = vadd.f32 %v930_v23, %v862_v53  ;;  %v1418_v37 = vmul.f32 %v3249_v45, %v2468_v58  ;;  %v3927_v23 = vld [vmem:[#allocation22_spill] sm:$0xff]  ;;  %v3928_v53 = vld [vmem:[#allocation23_spill] sm:$0xff] }
  0x9e   : > { %v1352_v25 = vadd.f32 %v1320_v43, %v1255_v0  ;;  %v912_v26 = vmul.f32 %v2437_v40, %v3924_v22  ;;  %2223 = vmatmul.msk.f32.gmra.mxu1 %vm329_vm2, %v1437_v20  ;;  %v747_v39 = vadd.f32 %v715_v57, %v618_v62  ;;  %v3925_v43 = vld [vmem:[#allocation17_spill] sm:$0xff]  ;;  %v1106_v0 = vmul.f32 %v2448_v46, %v3926_v18  ;;  %v3930_v20 = vld [vmem:[#allocation26_spill] sm:$0xff] }
  0x9f   : > { %v1009_v27 = vmul.f32 %v2439_v41, %v3925_v43  ;;  %v1347_v36 = vadd.f32 %v1315_v12, %v1250_v32  ;;  %v1059_v16 = vadd.f32 %v1027_v63, %v962_v14  ;;  %v1206_v21 = vmul.f32 %v3927_v23, %v2454_v51  ;;  %v3931_v32 = vld [vmem:[#allocation24_spill] sm:$0xff]  ;;  %v3932_v22 = vld [vmem:[#allocation45_spill] sm:$0xff] }
  0xa0   : > { %v1449_v59 = vadd.f32 %v1417_v33, %v1352_v25  ;;  %v1303_v8 = vmul.f32 %v3928_v53, %v2462_v55  ;;  %v844_v33 = vadd.f32 %v812_v44, %v747_v39  ;;  %v3929_v25 = vld [vmem:[#allocation25_spill] sm:$0xff]  ;;  %v721_v57 = vmul.f32 %v3930_v20, %v2410_v17 }
  0xa1   : > { %v624_v62 = vmul.f32 %v3929_v25, %v2403_v13  ;;  %v818_v24 = vmul.f32 %v3888_v10, %v2415_v19  ;;  %v1444_v12 = vadd.f32 %v1412_v28, %v1347_v36  ;;  %v1156_v63 = vadd.f32 %v1124_v61, %v1059_v16  ;;  %v3933_v28 = vld [vmem:[#allocation36_spill] sm:$0xff]  ;;  %v3934_v36 = vld [vmem:[#allocation37_spill] sm:$0xff] }
  0xa2   : > { %2235 = vmatmul.msk.f32.vlgmr.msra.gmra.mxu3 %vm329_vm2, %v1449_v59  ;;  %v1400_v14 = vmul.f32 %v3931_v32, %v2468_v58  ;;  %v918_v43 = vmul.f32 %v3932_v22, %v2437_v40  ;;  %v944_v59 = vadd.f32 %v912_v26, %v844_v33  ;;  %v1015_v39 = vmul.f32 %v3030_v31, %v2439_v41 }
  0xa3   : > { %v753_v44 = vadd.f32 %v721_v57, %v624_v62  ;;  %v1112_v18 = vmul.f32 %v3032_v15, %v2448_v46  ;;  %2230 = vmatmul.msk.f32.gmra.mxu2 %vm329_vm2, %v1444_v12  ;;  %v1256_v10 = vadd.f32 %v1224_v50, %v1156_v63  ;;  %v1212_v61 = vmul.f32 %v2454_v51, %v3933_v28  ;;  %v366_v62 = vld [vmem:[%s2381_s8 + $0xe0] sm:$0xff]  ;;  %v3935_v50 = vld [vmem:[#allocation38_spill] sm:$0xff] }
  0xa4   : > { %v1309_v16 = vmul.f32 %v2462_v55, %v3934_v36  ;;  %v631_v26 = vmul.f32 %v2908_v30, %v2403_v13  ;;  %v1041_v23 = vadd.f32 %v1009_v27, %v944_v59  ;;  %v728_v33 = vmul.f32 %v2910_v38, %v2410_v17  ;;  %v367_v30 = vld [vmem:[%s2381_s8 + $0xe8] sm:$0xff] }
  0xa5   : > { %v850_v53 = vadd.f32 %v818_v24, %v753_v44  ;;  %v825_v25 = vmul.f32 %v2916_v34, %v2415_v19  ;;  %v1353_v20 = vadd.f32 %v1321_v56, %v1256_v10  ;;  %v1406_v57 = vmul.f32 %v2468_v58, %v3935_v50  ;;  %v3316_v44 = vld [vmem:[%s3757_s1] ss:$0 sm:$0xff] }
  0xa6   : > { %v925_v12 = vmul.f32 %v3084_v1, %v2437_v40  ;;  %v1022_v63 = vmul.f32 %v3086_v47, %v2439_v41  ;;  %v1138_v27 = vadd.f32 %v1106_v0, %v1041_v23  ;;  %v760_v32 = vadd.f32 %v728_v33, %v631_v26  ;;  %3936 = vst [vmem:[#allocation10_spill] sm:$0xff] %v3316_v44 }
  0xa7   : > { %v950_v24 = vadd.f32 %v918_v43, %v850_v53  ;;  %v1119_v38 = vmul.f32 %v3098_v52, %v2448_v46  ;;  %v1450_v59 = vadd.f32 %v1418_v37, %v1353_v20  ;;  %v1219_v34 = vmul.f32 %v2454_v51, %v3144_v2  ;;  %v3324_v37 = vld [vmem:[%s3758_s2] ss:$0 sm:$0xff] }
  0xa8   : > { %v1316_v56 = vmul.f32 %v2462_v55, %v3146_v35  ;;  %v402_v10 = vmul.f32 %v3316_v44, %v366_v62  ;;  %v1238_v0 = vadd.f32 %v1206_v21, %v1138_v27  ;;  %v857_v26 = vadd.f32 %v825_v25, %v760_v32 }
  0xa9   : > { %v1047_v43 = vadd.f32 %v1015_v39, %v950_v24  ;;  %v403_v23 = vmul.f32 %v3316_v44, %v367_v30  ;;  %v637_v33 = vmul.f32 %v3165_v11, %v2403_v13  ;;  %v734_v62 = vmul.f32 %v3167_v49, %v2410_v17 }
  0xaa   : > { %2236 = vmatmul.msk.f32.gmra.mxu3 %vm329_vm2, %v1450_v59  ;;  %v438_v53 = vadd.f32 %v3324_v37, %v402_v10  ;;  %v831_v21 = vmul.f32 %v3175_v48, %v2415_v19  ;;  %v1335_v39 = vadd.f32 %v1303_v8, %v1238_v0  ;;  %v957_v20 = vadd.f32 %v925_v12, %v857_v26 }
  0xab   : > { %v1144_v25 = vadd.f32 %v1112_v18, %v1047_v43  ;;  %v439_v30 = vadd.f32 %v3324_v37, %v403_v23  ;;  %v766_v24 = vadd.f32 %v734_v62, %v637_v33  ;;  %v931_v32 = vmul.f32 %v3181_v9, %v2437_v40  ;;  %v2032_v43 = vld [vmem:[#allocation2 + $0xc0] sm:$0xff]  ;;  %v3937_v23 = vld [vmem:[#allocation34_spill] sm:$0xff]  ;;  %v2128_v62 = vld [vmem:[#allocation2 + $0xd8] sm:$0xff] }
  0xac   : > { %vm470_vm4 = vcmp.ge.f32.partialorder %v438_v53, 0.0  ;;  %v502_v27 = vmul.f32 0.1, %v438_v53  ;;  %v1432_v59 = vadd.f32 %v1400_v14, %v1335_v39  ;;  %v1054_v44 = vadd.f32 %v1022_v63, %v957_v20  ;;  %v2064_v14 = vld [vmem:[#allocation2 + $0xc1] sm:$0xff] }
  0xad   : > { %v1244_v10 = vadd.f32 %v1212_v61, %v1144_v25  ;;  %vm471_vm5 = vcmp.ge.f32.partialorder %v439_v30, 0.0  ;;  %v503_v11 = vmul.f32 0.1, %v439_v30  ;;  %v863_v35 = vadd.f32 %v831_v21, %v766_v24  ;;  %v2096_v33 = vld [vmem:[#allocation2 + $0xc2] sm:$0xff]  ;;  %v2160_v21 = vld [vmem:[#allocation2 + $0xd9] sm:$0xff] }
  0xae   : > { %v534_v49 = vsel %vm470_vm4, %v438_v53, %v502_v27  ;;  %v1028_v8 = vmul.f32 %v3183_v6, %v2439_v41  ;;  %2218 = vmatmul.msk.f32.gmra.mxu0 %vm329_vm2, %v1432_v59  ;;  %v1151_v12 = vadd.f32 %v1119_v38, %v1054_v44  ;;  %v1413_v0 = vmul.f32 %v2468_v58, %v3159_v29  ;;  %v3938_v44 = vld [vmem:[#allocation35_spill] sm:$0xff]  ;;  %v3939_v59 = vld [vmem:[#allocation42_spill] sm:$0xff] }
  0xaf   : > { %v1341_v18 = vadd.f32 %v1309_v16, %v1244_v10  ;;  %567 = vst.msk [vmem:[#allocation2 + $0x169] sm:$0xff] %vm329_vm2, %v534_v49  ;;  %v535_v61 = vsel %vm471_vm5, %v439_v30, %v503_v11  ;;  %v963_v63 = vadd.f32 %v931_v32, %v863_v35  ;;  %v625_v26 = vmul.f32 %v3905_v42, %v2403_v13  ;;  %v2192_v35 = vld [vmem:[#allocation2 + $0xda] sm:$0xff] }
  0xb0   : > { %v722_v53 = vmul.f32 %v3937_v23, %v2410_v17  ;;  %v1251_v38 = vadd.f32 %v1219_v34, %v1151_v12  ;;  %568 = vst.msk [vmem:[#allocation2 + $0x171] sm:$0xff] %vm329_vm2, %v535_v61  ;;  %v1125_v49 = vmul.f32 %v3193_v60, %v2448_v46  ;;  %v819_v11 = vmul.f32 %v3938_v44, %v2415_v19  ;;  %v3942_v61 = vld [vmem:[#allocation4_spill] sm:$0xff] }
  0xb1   : > { %v1438_v16 = vadd.f32 %v1406_v57, %v1341_v18  ;;  %v1060_v39 = vadd.f32 %v1028_v8, %v963_v63  ;;  %v919_v42 = vmul.f32 %v2032_v43, %v2437_v40  ;;  %v1016_v20 = vmul.f32 %v2064_v14, %v2439_v41  ;;  %v3940_v8 = vld [vmem:[#allocation43_spill] sm:$0xff]  ;;  %v3941_v14 = vld [vmem:[#allocation44_spill] sm:$0xff] }
  0xb2   : > { %v754_v25 = vadd.f32 %v722_v53, %v625_v26  ;;  %v1348_v30 = vadd.f32 %v1316_v56, %v1251_v38  ;;  %v1113_v57 = vmul.f32 %v2096_v33, %v2448_v46  ;;  %v1213_v34 = vmul.f32 %v2128_v62, %v2454_v51  ;;  %v3943_v62 = vld [vmem:[#allocation5_spill] sm:$0xff] }
  0xb3   : > { %2224 = vmatmul.msk.f32.gmra.mxu1 %vm329_vm2, %v1438_v16  ;;  %v1310_v27 = vmul.f32 %v2160_v21, %v2462_v55  ;;  %v1407_v32 = vmul.f32 %v2192_v35, %v2468_v58  ;;  %v632_v10 = vmul.f32 %v3939_v59, %v2403_v13  ;;  %v729_v18 = vmul.f32 %v3940_v8, %v2410_v17 }
  0xb4   : > { %v851_v24 = vadd.f32 %v819_v11, %v754_v25  ;;  %v1445_v12 = vadd.f32 %v1413_v0, %v1348_v30  ;;  %v1157_v43 = vadd.f32 %v1125_v49, %v1060_v39  ;;  %v826_v56 = vmul.f32 %v3941_v14, %v2415_v19  ;;  %v3944_v49 = vld [vmem:[#allocation32_spill] sm:$0xff]  ;;  %v3945_v11 = vld [vmem:[#allocation3_spill] sm:$0xff]  ;;  %v3946_v30 = vld [vmem:[#allocation6_spill] sm:$0xff] }
  0xb5   : > { %v926_v63 = vmul.f32 %v3942_v61, %v2437_v40  ;;  %v761_v33 = vadd.f32 %v729_v18, %v632_v10  ;;  %v1023_v21 = vmul.f32 %v3943_v62, %v2439_v41  ;;  %v1120_v16 = vmul.f32 %v3217_v4, %v2448_v46 }
  0xb6   : > { %v3366_v26 = vld [vmem:[#allocation2 + $0x168] sm:$0xff]  ;;  %v951_v53 = vadd.f32 %v919_v42, %v851_v24  ;;  %2231 = vmatmul.msk.f32.gmra.mxu2 %vm329_vm2, %v1445_v12  ;;  %v1220_v44 = vmul.f32 %v2454_v51, %v3944_v49  ;;  %v1317_v35 = vmul.f32 %v2462_v55, %v3945_v11  ;;  %v638_v24 = vmul.f32 %v3946_v30, %v2403_v13  ;;  %v3948_v12 = vld [vmem:[#allocation7_spill] sm:$0xff] }
  0xb7   : > { %v3368_v23 = vld [vmem:[#allocation2 + $0x169] sm:$0xff]  ;;  %v1225_v0 = vmul.f32 %v3366_v26, %v2454_v51  ;;  %v858_v42 = vadd.f32 %v826_v56, %v761_v33  ;;  %v735_v59 = vmul.f32 %v3225_v3, %v2410_v17  ;;  %v1414_v14 = vmul.f32 %v2468_v58, %v3948_v12  ;;  %v3407_v49 = vld [vmem:[#allocation2 + $0x172] sm:$0xff] }
  0xb8   : > { %v1322_v38 = vmul.f32 %v3368_v23, %v2462_v55  ;;  %v3383_v39 = vld [vmem:[#allocation2 + $0x16a] sm:$0xff]  ;;  %v1048_v25 = vadd.f32 %v1016_v20, %v951_v53  ;;  %v832_v11 = vmul.f32 %v3232_v5, %v2415_v19  ;;  %v932_v3 = vmul.f32 %v3234_v7, %v2437_v40 }
  0xb9   : > { %v3389_v10 = vld [vmem:[#allocation2 + $0x170] sm:$0xff]  ;;  %v1257_v8 = vadd.f32 %v1225_v0, %v1157_v43  ;;  %v1419_v18 = vmul.f32 %v3383_v39, %v2468_v58  ;;  %v958_v53 = vadd.f32 %v926_v63, %v858_v42  ;;  %v767_v33 = vadd.f32 %v735_v59, %v638_v24 }
  0xba   : > { %3947 = vst [vmem:[#allocation11_spill] sm:$0xff] %v3389_v10  ;;  %v3397_v20 = vld [vmem:[#allocation2 + $0x171] sm:$0xff]  ;;  %v1145_v56 = vadd.f32 %v1113_v57, %v1048_v25  ;;  %v1029_v43 = vmul.f32 %v3240_v54, %v2439_v41  ;;  %v1126_v0 = vmul.f32 %v3249_v45, %v2448_v46  ;;  %v1226_v12 = vmul.f32 %v3389_v10, %v2454_v51 }
  0xbb   : > { %v1354_v30 = vadd.f32 %v1322_v38, %v1257_v8  ;;  %v1055_v4 = vadd.f32 %v1023_v21, %v958_v53  ;;  %v864_v57 = vadd.f32 %v832_v11, %v767_v33  ;;  %v1323_v63 = vmul.f32 %v3397_v20, %v2462_v55  ;;  %v368_v53 = vld [vmem:[%s2381_s8 + $0xf0] sm:$0xff] }
  0xbc   : > { %v1245_v5 = vadd.f32 %v1213_v34, %v1145_v56  ;;  %v626_v38 = vmul.f32 %v3932_v22, %v2403_v13  ;;  %v723_v42 = vmul.f32 %v3030_v31, %v2410_v17  ;;  %v820_v24 = vmul.f32 %v3032_v15, %v2415_v19 }
  0xbd   : > { %v1451_v25 = vadd.f32 %v1419_v18, %v1354_v30  ;;  %v1152_v8 = vadd.f32 %v1120_v16, %v1055_v4  ;;  %v964_v10 = vadd.f32 %v932_v3, %v864_v57  ;;  %v1420_v34 = vmul.f32 %v3407_v49, %v2468_v58  ;;  %v3949_v3 = vld [vmem:[#allocation39_spill] sm:$0xff]  ;;  %v3950_v30 = vld [vmem:[#allocation40_spill] sm:$0xff] }
  0xbe   : > { %v1342_v59 = vadd.f32 %v1310_v27, %v1245_v5  ;;  %v755_v21 = vadd.f32 %v723_v42, %v626_v38  ;;  %v920_v11 = vmul.f32 %v2437_v40, %v3933_v28  ;;  %v1017_v22 = vmul.f32 %v2439_v41, %v3934_v36 }
  0xbf   : > { %2237 = vmatmul.msk.f32.gmra.mxu3 %vm329_vm2, %v1451_v25  ;;  %v1114_v31 = vmul.f32 %v2448_v46, %v3935_v50  ;;  %v1252_v5 = vadd.f32 %v1220_v44, %v1152_v8  ;;  %v1061_v4 = vadd.f32 %v1029_v43, %v964_v10  ;;  %v1214_v27 = vmul.f32 %v3949_v3, %v2454_v51  ;;  %v3951_v44 = vld [vmem:[#allocation41_spill] sm:$0xff]  ;;  %v3954_v8 = vld [vmem:[#allocation8_spill] sm:$0xff] }
  0xc0   : > { %v1439_v15 = vadd.f32 %v1407_v32, %v1342_v59  ;;  %v852_v16 = vadd.f32 %v820_v24, %v755_v21  ;;  %v1311_v18 = vmul.f32 %v3950_v30, %v2462_v55  ;;  %v633_v28 = vmul.f32 %v3084_v1, %v2403_v13  ;;  %v3952_v1 = vld [vmem:[#allocation27_spill] sm:$0xff] }
  0xc1   : > { %v730_v36 = vmul.f32 %v3086_v47, %v2410_v17  ;;  %v1349_v50 = vadd.f32 %v1317_v35, %v1252_v5  ;;  %v1158_v32 = vadd.f32 %v1126_v0, %v1061_v4  ;;  %v1408_v10 = vmul.f32 %v3951_v44, %v2468_v58  ;;  %v369_v47 = vld [vmem:[%s2381_s8 + $0xf8] sm:$0xff] }
  0xc2   : > { %2225 = vmatmul.msk.f32.gmra.mxu1 %vm329_vm2, %v1439_v15  ;;  %v827_v56 = vmul.f32 %v3098_v52, %v2415_v19  ;;  %v952_v33 = vadd.f32 %v920_v11, %v852_v16  ;;  %v927_v57 = vmul.f32 %v2437_v40, %v3144_v2  ;;  %v1024_v25 = vmul.f32 %v2439_v41, %v3952_v1  ;;  %v3953_v0 = vld [vmem:[#allocation28_spill] sm:$0xff]  ;;  %v3955_v11 = vld [vmem:[#allocation10_spill] sm:$0xff] }
  0xc3   : > { %v762_v43 = vadd.f32 %v730_v36, %v633_v28  ;;  %v1446_v38 = vadd.f32 %v1414_v14, %v1349_v50  ;;  %v1258_v42 = vadd.f32 %v1226_v12, %v1158_v32  ;;  %v1121_v35 = vmul.f32 %v2448_v46, %v3159_v29 }
  0xc4   : > { %v1221_v24 = vmul.f32 %v3953_v0, %v2454_v51  ;;  %v1049_v59 = vadd.f32 %v1017_v22, %v952_v33  ;;  %v1318_v21 = vmul.f32 %v3954_v8, %v2462_v55  ;;  %v404_v15 = vmul.f32 %v3955_v11, %v368_v53  ;;  %v3959_v8 = vld [vmem:[#allocation7_spill] sm:$0xff] }
  0xc5   : > { %v859_v52 = vadd.f32 %v827_v56, %v762_v43  ;;  %2232 = vmatmul.msk.f32.gmra.mxu2 %vm329_vm2, %v1446_v38  ;;  %v1355_v2 = vadd.f32 %v1323_v63, %v1258_v42  ;;  %v405_v5 = vmul.f32 %v3955_v11, %v369_v47  ;;  %v639_v12 = vmul.f32 %v3181_v9, %v2403_v13  ;;  %v3957_v38 = vld [vmem:[#allocation32_spill] sm:$0xff] }
  0xc6   : > { %v736_v29 = vmul.f32 %v3183_v6, %v2410_v17  ;;  %v1146_v14 = vadd.f32 %v1114_v31, %v1049_v59  ;;  %v440_v22 = vadd.f32 %v3324_v37, %v404_v15  ;;  %v833_v3 = vmul.f32 %v3193_v60, %v2415_v19 }
  0xc7   : > { %v959_v4 = vadd.f32 %v927_v57, %v859_v52  ;;  %v1452_v16 = vadd.f32 %v1420_v34, %v1355_v2  ;;  %v441_v30 = vadd.f32 %v3324_v37, %v405_v5  ;;  %v933_v63 = vmul.f32 %v3366_v26, %v2437_v40  ;;  %v3960_v5 = vld [vmem:[#allocation11_spill] sm:$0xff] }
  0xc8   : > { %v768_v28 = vadd.f32 %v736_v29, %v639_v12  ;;  %v1246_v36 = vadd.f32 %v1214_v27, %v1146_v14  ;;  %vm472_vm1 = vcmp.ge.f32.partialorder %v440_v22, 0.0  ;;  %v504_v9 = vmul.f32 0.1, %v440_v22 }
  0xc9   : > { %v1056_v50 = vadd.f32 %v1024_v25, %v959_v4  ;;  %2238 = vmatmul.msk.f32.gmra.mxu3 %vm329_vm2, %v1452_v16  ;;  %vm473_vm6 = vcmp.ge.f32.partialorder %v441_v30, 0.0  ;;  %v505_v6 = vmul.f32 0.1, %v441_v30  ;;  %v1030_v32 = vmul.f32 %v3368_v23, %v2439_v41 }
  0xca   : > { %v865_v31 = vadd.f32 %v833_v3, %v768_v28  ;;  %v1343_v60 = vadd.f32 %v1311_v18, %v1246_v36  ;;  %v1415_v37 = vmul.f32 %v3175_v48, %v2468_v58  ;;  %v536_v44 = vsel %vm472_vm1, %v440_v22, %v504_v9  ;;  %v3956_v48 = vld [vmem:[#allocation9_spill] sm:$0xff]  ;;  %v3962_v9 = vld [vmem:[#allocation12_spill] sm:$0xff] }
  0xcb   : > { %v1153_v34 = vadd.f32 %v1121_v35, %v1056_v50  ;;  %v537_v56 = vsel %vm473_vm6, %v441_v30, %v505_v6  ;;  %569 = vst.msk [vmem:[#allocation2 + $0x181] sm:$0xff] %vm329_vm2, %v536_v44  ;;  %v634_v53 = vmul.f32 %v3942_v61, %v2403_v13  ;;  %v731_v33 = vmul.f32 %v3943_v62, %v2410_v17  ;;  %v1576_v50 = vpop.f32.mrf.mxu0 }
  0xcc   : > { %v965_v27 = vadd.f32 %v933_v63, %v865_v31  ;;  %v1440_v43 = vadd.f32 %v1408_v10, %v1343_v60  ;;  %570 = vst.msk [vmem:[#allocation2 + $0x189] sm:$0xff] %vm329_vm2, %v537_v56  ;;  %v1127_v18 = vmul.f32 %v3383_v39, %v2448_v46  ;;  %v828_v1 = vmul.f32 %v3956_v48, %v2415_v19  ;;  %v3958_v10 = vld [vmem:[#allocation3_spill] sm:$0xff]  ;;  %v3963_v31 = vld [vmem:[#allocation13_spill] sm:$0xff] }
  0xcd   : > { %v1253_v57 = vadd.f32 %v1221_v24, %v1153_v34  ;;  %v763_v47 = vadd.f32 %v731_v33, %v634_v53  ;;  %v928_v42 = vmul.f32 %v2437_v40, %v3957_v38  ;;  %v1025_v35 = vmul.f32 %v2439_v41, %v3958_v10  ;;  %1672 = vst.msk [vmem:[%s3501_s27] sm:$0xff] %vm329_vm2, %v1576_v50  ;;  %v2144_v38 = vld [vmem:[#allocation2 + $0x198] sm:$0xff] }
  0xce   : > { %v1062_v25 = vadd.f32 %v1030_v32, %v965_v27  ;;  %2226 = vmatmul.msk.f32.gmra.mxu1 %vm329_vm2, %v1440_v43  ;;  %v640_v0 = vmul.f32 %v3234_v7, %v2403_v13  ;;  %v737_v24 = vmul.f32 %v3240_v54, %v2410_v17  ;;  %v1122_v11 = vmul.f32 %v2448_v46, %v3959_v8 }
  0xcf   : > { %v1350_v61 = vadd.f32 %v1318_v21, %v1253_v57  ;;  %v860_v62 = vadd.f32 %v828_v1, %v763_v47  ;;  %v834_v15 = vmul.f32 %v3249_v45, %v2415_v19  ;;  %v934_v12 = vmul.f32 %v3960_v5, %v2437_v40  ;;  %v3961_v45 = vld [vmem:[#allocation6_spill] sm:$0xff] }
  0xd0   : > { %v1159_v52 = vadd.f32 %v1127_v18, %v1062_v25  ;;  %v769_v21 = vadd.f32 %v737_v24, %v640_v0  ;;  %v641_v29 = vmul.f32 %v3366_v26, %v2403_v13  ;;  %v1222_v14 = vmul.f32 %v3961_v45, %v2454_v51 }
  0xd1   : > { %v1447_v59 = vadd.f32 %v1415_v37, %v1350_v61  ;;  %v960_v2 = vadd.f32 %v928_v42, %v860_v62  ;;  %v1031_v4 = vmul.f32 %v3397_v20, %v2439_v41  ;;  %v738_v26 = vmul.f32 %v3368_v23, %v2410_v17 }
  0xd2   : > { %v2142_v7 = vld [vmem:[#allocation2 + $0x180] sm:$0xff]  ;;  %v835_v22 = vmul.f32 %v3383_v39, %v2415_v19  ;;  %v866_v63 = vadd.f32 %v834_v15, %v769_v21  ;;  %v1319_v6 = vmul.f32 %v3962_v9, %v2462_v55  ;;  %v1416_v32 = vmul.f32 %v3963_v31, %v2468_v58 }
  0xd3   : > { %2233 = vmatmul.msk.f32.gmra.mxu2 %vm329_vm2, %v1447_v59  ;;  %v2174_v54 = vld [vmem:[#allocation2 + $0x181] sm:$0xff]  ;;  %v1227_v3 = vmul.f32 %v2142_v7, %v2454_v51  ;;  %v1057_v28 = vadd.f32 %v1025_v35, %v960_v2  ;;  %v1128_v23 = vmul.f32 %v3407_v49, %v2448_v46  ;;  %v770_v60 = vadd.f32 %v738_v26, %v641_v29  ;;  %v2175_v27 = vld [vmem:[#allocation2 + $0x189] sm:$0xff]  ;;  %v2176_v2 = vld [vmem:[#allocation2 + $0x199] sm:$0xff] }
  0xd4   : > { %v1324_v16 = vmul.f32 %v2174_v54, %v2462_v55  ;;  %v2206_v30 = vld [vmem:[#allocation2 + $0x182] sm:$0xff]  ;;  %v966_v44 = vadd.f32 %v934_v12, %v866_v63  ;;  %v935_v33 = vmul.f32 %v2142_v7, %v2437_v40  ;;  %v1032_v43 = vmul.f32 %v2174_v54, %v2439_v41  ;;  %v2207_v25 = vld [vmem:[#allocation2 + $0x18a] sm:$0xff]  ;;  %v2208_v54 = vld [vmem:[#allocation2 + $0x19a] sm:$0xff] }
  0xd5   : > { %v2143_v36 = vld [vmem:[#allocation2 + $0x188] sm:$0xff]  ;;  %v1259_v39 = vadd.f32 %v1227_v3, %v1159_v52  ;;  %v1421_v34 = vmul.f32 %v2206_v30, %v2468_v58  ;;  %v1154_v37 = vadd.f32 %v1122_v11, %v1057_v28  ;;  %v867_v53 = vadd.f32 %v835_v22, %v770_v60 }
  0xd6   : > { %v1228_v56 = vmul.f32 %v2143_v36, %v2454_v51  ;;  %v1063_v48 = vadd.f32 %v1031_v4, %v966_v44  ;;  %v1129_v1 = vmul.f32 %v2206_v30, %v2448_v46  ;;  %v642_v42 = vmul.f32 %v3960_v5, %v2403_v13  ;;  %v2177_v3 = vld [vmem:[#allocation2 + $0x1a1] sm:$0xff] }
  0xd7   : > { %v1356_v57 = vadd.f32 %v1324_v16, %v1259_v39  ;;  %v1254_v18 = vadd.f32 %v1222_v14, %v1154_v37  ;;  %v967_v47 = vadd.f32 %v935_v33, %v867_v53  ;;  %v739_v61 = vmul.f32 %v3397_v20, %v2410_v17  ;;  %v2145_v14 = vld [vmem:[#allocation2 + $0x1a0] sm:$0xff] }
  0xd8   : > { %v836_v62 = vmul.f32 %v3407_v49, %v2415_v19  ;;  %v1160_v0 = vadd.f32 %v1128_v23, %v1063_v48  ;;  %v1325_v24 = vmul.f32 %v2175_v27, %v2462_v55  ;;  %v936_v8 = vmul.f32 %v2143_v36, %v2437_v40 }
  0xd9   : > { %v1453_v10 = vadd.f32 %v1421_v34, %v1356_v57  ;;  %v1351_v35 = vadd.f32 %v1319_v6, %v1254_v18  ;;  %v1064_v59 = vadd.f32 %v1032_v43, %v967_v47  ;;  %v771_v52 = vadd.f32 %v739_v61, %v642_v42 }
  0xda   : > { %v1260_v15 = vadd.f32 %v1228_v56, %v1160_v0  ;;  %v1422_v13 = vmul.f32 %v2207_v25, %v2468_v58  ;;  %v1229_v17 = vmul.f32 %v2144_v38, %v2454_v51  ;;  %v1033_v49 = vmul.f32 %v2175_v27, %v2439_v41 }
  0xdb   : > { %2239 = vmatmul.msk.f32.gmra.mxu3 %vm329_vm2, %v1453_v10  ;;  %v1448_v11 = vadd.f32 %v1416_v32, %v1351_v35  ;;  %v1161_v20 = vadd.f32 %v1129_v1, %v1064_v59  ;;  %v868_v19 = vadd.f32 %v836_v62, %v771_v52  ;;  %v1326_v29 = vmul.f32 %v2176_v2, %v2462_v55  ;;  %v2209_v32 = vld [vmem:[#allocation2 + $0x1a2] sm:$0xff] }
  0xdc   : > { %v1357_v21 = vadd.f32 %v1325_v24, %v1260_v15  ;;  %v1130_v7 = vmul.f32 %v2207_v25, %v2448_v46  ;;  %v1423_v26 = vmul.f32 %v2208_v54, %v2468_v58  ;;  %v1230_v22 = vmul.f32 %v2145_v14, %v2454_v51 }
  0xdd   : > { %2234 = vmatmul.msk.f32.gmra.mxu2 %vm329_vm2, %v1448_v11  ;;  %v968_v5 = vadd.f32 %v936_v8, %v868_v19  ;;  %v1261_v40 = vadd.f32 %v1229_v17, %v1161_v20  ;;  %v1774_v16 = vmul.f32 %v1576_v50, %v1576_v50  ;;  %v1705_v28 = vsel %vm329_vm2, %v1576_v50, 0.0 }
  0xde   : > { %v1454_v12 = vadd.f32 %v1422_v13, %v1357_v21  ;;  %v1327_v6 = vmul.f32 %v2177_v3, %v2462_v55  ;;  %v1424_v34 = vmul.f32 %v2209_v32, %v2468_v58  ;;  %v3964_v58 = vmov 0.0  }
  0xdf   : > { %v1065_v45 = vadd.f32 %v1033_v49, %v968_v5  ;;  %v1358_v4 = vadd.f32 %v1326_v29, %v1261_v40  ;;  %v1806_v51 = vsel %vm329_vm2, %v1774_v16, 0.0  ;;  %571 = vst.msk [vmem:[%s3573_s7] sm:$0x3] %vm332_vm13, %v3964_v58 }
  0xe1   : > { %v1162_v41 = vadd.f32 %v1130_v7, %v1065_v45  ;;  %v1455_v36 = vadd.f32 %v1423_v26, %v1358_v4 }
  0xe3   : > { %2240 = vmatmul.msk.f32.gmra.mxu3 %vm329_vm2, %v1454_v12  ;;  %v1262_v9 = vadd.f32 %v1230_v22, %v1162_v41 }
  0xe5   : > { %v1359_v39 = vadd.f32 %v1327_v6, %v1262_v9 }
  0xe6   : > { %v1579_v30 = vpop.f32.mrf.mxu0 }
  0xe7   : > { %1673 = vst.msk [vmem:[%s3501_s27 + $0x8] sm:$0xff] %vm329_vm2, %v1579_v30  ;;  %v1706_v46 = vsel %vm329_vm2, %v1579_v30, 0.0  ;;  %v1775_v63 = vmul.f32 %v1579_v30, %v1579_v30  ;;  %v1456_v56 = vadd.f32 %v1424_v34, %v1359_v39 }
  0xe8   : > { %v1707_v31 = vadd.f32 %v1706_v46, %v1705_v28 }
  0xe9   : > { %v1807_v23 = vsel %vm329_vm2, %v1775_v63, 0.0  ;;  %v3552_v50 = vpop.f32.mrf.mxu1 }
  0xea   : > { %v1808_v60 = vadd.f32 %v1807_v23, %v1806_v51  ;;  %1680 = vst.msk [vmem:[%s3501_s27 + $0x40] sm:$0xff] %vm329_vm2, %v3552_v50  ;;  %v1782_v45 = vmul.f32 %v3552_v50, %v3552_v50  ;;  %v1720_v3 = vsel %vm329_vm2, %v3552_v50, 0.0 }
  0xeb   : > { %2241 = vmatmul.msk.f32.gmra.mxu3 %vm329_vm2, %v1455_v36 }
  0xec   : > { %v1821_v36 = vsel %vm329_vm2, %v1782_v45, 0.0 }
  0xee   : > { %v1582_v55 = vpop.f32.mrf.mxu0 }
  0xef   : > { %1674 = vst.msk [vmem:[%s3501_s27 + $0x10] sm:$0xff] %vm329_vm2, %v1582_v55  ;;  %v1708_v37 = vsel %vm329_vm2, %v1582_v55, 0.0  ;;  %v1776_v44 = vmul.f32 %v1582_v55, %v1582_v55 }
  0xf0   : > { %v1709_v27 = vadd.f32 %v1708_v37, %v1707_v31 }
  0xf1   : > { %v1809_v53 = vsel %vm329_vm2, %v1776_v44, 0.0 }
  0xf2   : > { %v1810_v33 = vadd.f32 %v1809_v53, %v1808_v60  ;;  %v3563_v43 = vpop.f32.mrf.mxu1 }
  0xf3   : > { %2242 = vmatmul.msk.f32.gmra.mxu3 %vm329_vm2, %v1456_v56  ;;  %1681 = vst.msk [vmem:[%s3501_s27 + $0x48] sm:$0xff] %vm329_vm2, %v3563_v43  ;;  %v1783_v16 = vmul.f32 %v3563_v43, %v3563_v43  ;;  %v1722_v9 = vsel %vm329_vm2, %v3563_v43, 0.0 }
  0xf5   : > { %v1823_v51 = vsel %vm329_vm2, %v1783_v16, 0.0 }
  0xf6   : > { %v1585_v57 = vpop.f32.mrf.mxu0 }
  0xf7   : > { %1675 = vst.msk [vmem:[%s3501_s27 + $0x18] sm:$0xff] %vm329_vm2, %v1585_v57  ;;  %v1710_v18 = vsel %vm329_vm2, %v1585_v57, 0.0  ;;  %v1777_v48 = vmul.f32 %v1585_v57, %v1585_v57 }
  0xf8   : > { %v1711_v1 = vadd.f32 %v1710_v18, %v1709_v27 }
  0xf9   : > { %v1811_v25 = vsel %vm329_vm2, %v1777_v48, 0.0 }
  0xfa   : > { %v1812_v47 = vadd.f32 %v1811_v25, %v1810_v33  ;;  %v1606_v42 = vpop.f32.mrf.mxu1 }
  0xfb   : > { %v3582_v38 = vpop.f32.mrf.mxu2  ;;  %1682 = vst.msk [vmem:[%s3501_s27 + $0x50] sm:$0xff] %vm329_vm2, %v1606_v42  ;;  %v1784_v6 = vmul.f32 %v1606_v42, %v1606_v42  ;;  %v1724_v23 = vsel %vm329_vm2, %v1606_v42, 0.0 }
  0xfc   : > { %1688 = vst.msk [vmem:[%s3501_s27 + $0x80] sm:$0xff] %vm329_vm2, %v3582_v38 }
  0xfd   : > { %v1825_v34 = vsel %vm329_vm2, %v1784_v6, 0.0 }
  0xfe   : > { %v1588_v61 = vpop.f32.mrf.mxu0 }
  0xff   : > { %1676 = vst.msk [vmem:[%s3501_s27 + $0x20] sm:$0xff] %vm329_vm2, %v1588_v61  ;;  %v1712_v62 = vsel %vm329_vm2, %v1588_v61, 0.0  ;;  %v1778_v10 = vmul.f32 %v1588_v61, %v1588_v61 }
 0x100   : > { %v1713_v35 = vadd.f32 %v1712_v62, %v1711_v1 }
 0x101   : > { %v1813_v0 = vsel %vm329_vm2, %v1778_v10, 0.0 }
 0x102   : > { %v1814_v24 = vadd.f32 %v1813_v0, %v1812_v47 }
 0x104   : > { %v3593_v59 = vpop.f32.mrf.mxu2 }
 0x105   : > { %1689 = vst.msk [vmem:[%s3501_s27 + $0x88] sm:$0xff] %vm329_vm2, %v3593_v59  ;;  %v1738_v45 = vsel %vm329_vm2, %v3593_v59, 0.0 }
 0x106   : > { %v1591_v52 = vpop.f32.mrf.mxu0  ;;  %v1609_v8 = vpop.f32.mrf.mxu1 }
 0x107   : > { %1677 = vst.msk [vmem:[%s3501_s27 + $0x28] sm:$0xff] %vm329_vm2, %v1591_v52  ;;  %v1779_v20 = vmul.f32 %v1591_v52, %v1591_v52  ;;  %v1714_v2 = vsel %vm329_vm2, %v1591_v52, 0.0  ;;  %v1785_v60 = vmul.f32 %v1609_v8, %v1609_v8  ;;  %v1726_v55 = vsel %vm329_vm2, %v1609_v8, 0.0 }
 0x108   : > { %1683 = vst.msk [vmem:[%s3501_s27 + $0x58] sm:$0xff] %vm329_vm2, %v1609_v8  ;;  %v1715_v12 = vadd.f32 %v1714_v2, %v1713_v35 }
 0x109   : > { %v1815_v21 = vsel %vm329_vm2, %v1779_v20, 0.0  ;;  %v1827_v56 = vsel %vm329_vm2, %v1785_v60, 0.0 }
 0x10a   : > { %v1816_v29 = vadd.f32 %v1815_v21, %v1814_v24 }
 0x112   : > { %v3602_v11 = vpop.f32.mrf.mxu2 }
 0x113   : > { %1690 = vst.msk [vmem:[%s3501_s27 + $0x90] sm:$0xff] %vm329_vm2, %v3602_v11 }
 0x119   : > { %v1594_v15 = vpop.f32.mrf.mxu0 }
 0x11a   : > { %1678 = vst.msk [vmem:[%s3501_s27 + $0x30] sm:$0xff] %vm329_vm2, %v1594_v15  ;;  %v1780_v19 = vmul.f32 %v1594_v15, %v1594_v15  ;;  %v1716_v5 = vsel %vm329_vm2, %v1594_v15, 0.0 }
 0x11b   : > { %v1612_v13 = vpop.f32.mrf.mxu1  ;;  %v1717_v7 = vadd.f32 %v1716_v5, %v1715_v12  ;;  %v1736_v5 = vsel %vm329_vm2, %v3582_v38, 0.0  ;;  %v1791_v12 = vmul.f32 %v3593_v59, %v3593_v59 }
 0x11c   : > { %1684 = vst.msk [vmem:[%s3501_s27 + $0x60] sm:$0xff] %vm329_vm2, %v1612_v13  ;;  %v1817_v40 = vsel %vm329_vm2, %v1780_v19, 0.0  ;;  %v1786_v33 = vmul.f32 %v1612_v13, %v1612_v13  ;;  %v1728_v58 = vsel %vm329_vm2, %v1612_v13, 0.0  ;;  %v1790_v13 = vmul.f32 %v3582_v38, %v3582_v38 }
 0x11d   : > { %v1818_v41 = vadd.f32 %v1817_v40, %v1816_v29  ;;  %v1839_v38 = vsel %vm329_vm2, %v1791_v12, 0.0 }
 0x11e   : > { %v1829_v48 = vsel %vm329_vm2, %v1786_v33, 0.0 }
 0x125   : > { %v3611_v17 = vpop.f32.mrf.mxu3 }
 0x126   : > { %1696 = vst.msk [vmem:[%s3501_s27 + $0xc0] sm:$0xff] %vm329_vm2, %v3611_v17  ;;  %v3617_v49 = vpop.f32.mrf.mxu2 }
 0x127   : > { %1691 = vst.msk [vmem:[%s3501_s27 + $0x98] sm:$0xff] %vm329_vm2, %v3617_v49  ;;  %v1742_v59 = vsel %vm329_vm2, %v3617_v49, 0.0 }
 0x12b   : > { %v1597_v54 = vpop.f32.mrf.mxu0 }
 0x12c   : > { %1679 = vst.msk [vmem:[%s3501_s27 + $0x38] sm:$0xff] %vm329_vm2, %v1597_v54  ;;  %v1718_v14 = vsel %vm329_vm2, %v1597_v54, 0.0  ;;  %v1781_v4 = vmul.f32 %v1597_v54, %v1597_v54  ;;  %v1837_v54 = vsel %vm329_vm2, %v1790_v13, 0.0 }
 0x12d   : > { %v3630_v26 = vpop.f32.mrf.mxu3  ;;  %v1719_v22 = vadd.f32 %v1718_v14, %v1717_v7  ;;  %v1792_v14 = vmul.f32 %v3602_v11, %v3602_v11 }
 0x12e   : > { %1697 = vst.msk [vmem:[%s3501_s27 + $0xc8] sm:$0xff] %vm329_vm2, %v3630_v26  ;;  %v1819_v30 = vsel %vm329_vm2, %v1781_v4, 0.0 }
 0x12f   : > { %v1721_v28 = vadd.f32 %v1720_v3, %v1719_v22  ;;  %v1820_v46 = vadd.f32 %v1819_v30, %v1818_v41  ;;  %v1740_v22 = vsel %vm329_vm2, %v3602_v11, 0.0  ;;  %v1793_v3 = vmul.f32 %v3617_v49, %v3617_v49 }
 0x130   : > { %v1615_v63 = vpop.f32.mrf.mxu1 }
 0x131   : > { %1685 = vst.msk [vmem:[%s3501_s27 + $0x68] sm:$0xff] %vm329_vm2, %v1615_v63  ;;  %v1723_v31 = vadd.f32 %v1722_v9, %v1721_v28  ;;  %v1822_v32 = vadd.f32 %v1821_v36, %v1820_v46  ;;  %v1787_v1 = vmul.f32 %v1615_v63, %v1615_v63  ;;  %v1730_v47 = vsel %vm329_vm2, %v1615_v63, 0.0 }
 0x132   : > { %v1841_v28 = vsel %vm329_vm2, %v1792_v14, 0.0  ;;  %v1843_v6 = vsel %vm329_vm2, %v1793_v3, 0.0 }
 0x133   : > { %v1725_v50 = vadd.f32 %v1724_v23, %v1723_v31  ;;  %v1824_v39 = vadd.f32 %v1823_v51, %v1822_v32  ;;  %v1831_v61 = vsel %vm329_vm2, %v1787_v1, 0.0  ;;  %v1752_v1 = vsel %vm329_vm2, %v3611_v17, 0.0 }
 0x135   : > { %v1826_v37 = vadd.f32 %v1825_v34, %v1824_v39  ;;  %v1727_v44 = vadd.f32 %v1726_v55, %v1725_v50 }
 0x137   : > { %v1828_v27 = vadd.f32 %v1827_v56, %v1826_v37  ;;  %v1729_v57 = vadd.f32 %v1728_v58, %v1727_v44 }
 0x139   : > { %v1636_v53 = vpop.f32.mrf.mxu2  ;;  %v1830_v25 = vadd.f32 %v1829_v48, %v1828_v27  ;;  %v1731_v42 = vadd.f32 %v1730_v47, %v1729_v57 }
 0x13a   : > { %1692 = vst.msk [vmem:[%s3501_s27 + $0xa0] sm:$0xff] %vm329_vm2, %v1636_v53  ;;  %v1794_v46 = vmul.f32 %v1636_v53, %v1636_v53  ;;  %v1744_v31 = vsel %vm329_vm2, %v1636_v53, 0.0 }
 0x13b   : > { %v1832_v10 = vadd.f32 %v1831_v61, %v1830_v25  ;;  %v1799_v25 = vmul.f32 %v3630_v26, %v3630_v26 }
 0x13c   : > { %v1845_v23 = vsel %vm329_vm2, %v1794_v46, 0.0 }
 0x13f   : > { %v1618_v43 = vpop.f32.mrf.mxu1 }
 0x140   : > { %1686 = vst.msk [vmem:[%s3501_s27 + $0x70] sm:$0xff] %vm329_vm2, %v1618_v43  ;;  %v1788_v62 = vmul.f32 %v1618_v43, %v1618_v43  ;;  %v1732_v35 = vsel %vm329_vm2, %v1618_v43, 0.0  ;;  %v1798_v43 = vmul.f32 %v3611_v17, %v3611_v17  ;;  %v1855_v17 = vsel %vm329_vm2, %v1799_v25, 0.0 }
 0x141   : > { %v1733_v24 = vadd.f32 %v1732_v35, %v1731_v42 }
 0x142   : > { %v3655_v18 = vpop.f32.mrf.mxu3  ;;  %v1833_v52 = vsel %vm329_vm2, %v1788_v62, 0.0  ;;  %v1853_v62 = vsel %vm329_vm2, %v1798_v43, 0.0 }
 0x143   : > { %1698 = vst.msk [vmem:[%s3501_s27 + $0xd0] sm:$0xff] %vm329_vm2, %v3655_v18  ;;  %v1834_v8 = vadd.f32 %v1833_v52, %v1832_v10  ;;  %v1754_v10 = vsel %vm329_vm2, %v3630_v26, 0.0  ;;  %v1800_v35 = vmul.f32 %v3655_v18, %v3655_v18 }
 0x145   : > { %v1857_v26 = vsel %vm329_vm2, %v1800_v35, 0.0 }
 0x148   : > { %v1639_v0 = vpop.f32.mrf.mxu2 }
 0x149   : > { %1693 = vst.msk [vmem:[%s3501_s27 + $0xa8] sm:$0xff] %vm329_vm2, %v1639_v0  ;;  %v1795_v32 = vmul.f32 %v1639_v0, %v1639_v0  ;;  %v1746_v60 = vsel %vm329_vm2, %v1639_v0, 0.0 }
 0x14b   : > { %v1621_v15 = vpop.f32.mrf.mxu1  ;;  %v1847_v39 = vsel %vm329_vm2, %v1795_v32, 0.0 }
 0x14c   : > { %1687 = vst.msk [vmem:[%s3501_s27 + $0x78] sm:$0xff] %vm329_vm2, %v1621_v15  ;;  %v1734_v20 = vsel %vm329_vm2, %v1621_v15, 0.0  ;;  %v1789_v2 = vmul.f32 %v1621_v15, %v1621_v15  ;;  %v3672_v19 = vpop.f32.mrf.mxu3 }
 0x14d   : > { %v1735_v21 = vadd.f32 %v1734_v20, %v1733_v24  ;;  %1699 = vst.msk [vmem:[%s3501_s27 + $0xd8] sm:$0xff] %vm329_vm2, %v3672_v19  ;;  %v1801_v15 = vmul.f32 %v3672_v19, %v3672_v19 }
 0x14e   : > { %v1835_v40 = vsel %vm329_vm2, %v1789_v2, 0.0  ;;  %v1758_v2 = vsel %vm329_vm2, %v3672_v19, 0.0 }
 0x14f   : > { %v1737_v29 = vadd.f32 %v1736_v5, %v1735_v21  ;;  %v1836_v7 = vadd.f32 %v1835_v40, %v1834_v8  ;;  %v1756_v8 = vsel %vm329_vm2, %v3655_v18, 0.0  ;;  %v1859_v40 = vsel %vm329_vm2, %v1801_v15, 0.0 }
 0x151   : > { %v1739_v4 = vadd.f32 %v1738_v45, %v1737_v29  ;;  %v1838_v41 = vadd.f32 %v1837_v54, %v1836_v7 }
 0x153   : > { %v1741_v16 = vadd.f32 %v1740_v22, %v1739_v4  ;;  %v1840_v30 = vadd.f32 %v1839_v38, %v1838_v41 }
 0x155   : > { %v1842_v63 = vadd.f32 %v1841_v28, %v1840_v30  ;;  %v1743_v36 = vadd.f32 %v1742_v59, %v1741_v16 }
 0x156   : > { %v1642_v9 = vpop.f32.mrf.mxu2 }
 0x157   : > { %1694 = vst.msk [vmem:[%s3501_s27 + $0xb0] sm:$0xff] %vm329_vm2, %v1642_v9  ;;  %v1745_v11 = vadd.f32 %v1744_v31, %v1743_v36  ;;  %v1844_v51 = vadd.f32 %v1843_v6, %v1842_v63  ;;  %v1796_v34 = vmul.f32 %v1642_v9, %v1642_v9  ;;  %v1748_v37 = vsel %vm329_vm2, %v1642_v9, 0.0 }
 0x159   : > { %v1846_v49 = vadd.f32 %v1845_v23, %v1844_v51  ;;  %v1747_v50 = vadd.f32 %v1746_v60, %v1745_v11  ;;  %v1849_v27 = vsel %vm329_vm2, %v1796_v34, 0.0 }
 0x15b   : > { %v1848_v55 = vadd.f32 %v1847_v39, %v1846_v49  ;;  %v1749_v44 = vadd.f32 %v1748_v37, %v1747_v50  ;;  %v1704_v37 = vld [vmem:[%s3573_s7] sm:$0x3] }
 0x15d   : > { %v1850_v53 = vadd.f32 %v1849_v27, %v1848_v55 }
 0x15e   : > { %v1660_v56 = vpop.f32.mrf.mxu3 }
 0x15f   : > { %1700 = vst.msk [vmem:[%s3501_s27 + $0xe0] sm:$0xff] %vm329_vm2, %v1660_v56  ;;  %v1802_v21 = vmul.f32 %v1660_v56, %v1660_v56  ;;  %v1760_v18 = vsel %vm329_vm2, %v1660_v56, 0.0 }
 0x160   : > { %v1645_v33 = vpop.f32.mrf.mxu2 }
 0x161   : > { %1695 = vst.msk [vmem:[%s3501_s27 + $0xb8] sm:$0xff] %vm329_vm2, %v1645_v33  ;;  %v1750_v58 = vsel %vm329_vm2, %v1645_v33, 0.0  ;;  %v1797_v57 = vmul.f32 %v1645_v33, %v1645_v33  ;;  %v1861_v54 = vsel %vm329_vm2, %v1802_v21, 0.0 }
 0x162   : > { %v1751_v48 = vadd.f32 %v1750_v58, %v1749_v44 }
 0x163   : > { %v1851_v47 = vsel %vm329_vm2, %v1797_v57, 0.0 }
 0x164   : > { %v1753_v42 = vadd.f32 %v1752_v1, %v1751_v48  ;;  %v1852_v61 = vadd.f32 %v1851_v47, %v1850_v53 }
 0x166   : > { %v1755_v0 = vadd.f32 %v1754_v10, %v1753_v42  ;;  %v1854_v24 = vadd.f32 %v1853_v62, %v1852_v61  ;;  %v1663_v52 = vpop.f32.mrf.mxu3 }
 0x167   : > { %1701 = vst.msk [vmem:[%s3501_s27 + $0xe8] sm:$0xff] %vm329_vm2, %v1663_v52  ;;  %v1803_v45 = vmul.f32 %v1663_v52, %v1663_v52  ;;  %v1762_v41 = vsel %vm329_vm2, %v1663_v52, 0.0 }
 0x168   : > { %v1757_v13 = vadd.f32 %v1756_v8, %v1755_v0  ;;  %v1856_v20 = vadd.f32 %v1855_v17, %v1854_v24 }
 0x169   : > { %v1863_v38 = vsel %vm329_vm2, %v1803_v45, 0.0 }
 0x16a   : > { %v1858_v5 = vadd.f32 %v1857_v26, %v1856_v20  ;;  %v1759_v12 = vadd.f32 %v1758_v2, %v1757_v13 }
 0x16c   : > { %v1761_v29 = vadd.f32 %v1760_v18, %v1759_v12  ;;  %v1860_v7 = vadd.f32 %v1859_v40, %v1858_v5 }
 0x16e   : > { %v1862_v14 = vadd.f32 %v1861_v54, %v1860_v7  ;;  %v1666_v4 = vpop.f32.mrf.mxu3  ;;  %v1763_v19 = vadd.f32 %v1762_v41, %v1761_v29 }
 0x16f   : > { %1702 = vst.msk [vmem:[%s3501_s27 + $0xf0] sm:$0xff] %vm329_vm2, %v1666_v4  ;;  %v1804_v22 = vmul.f32 %v1666_v4, %v1666_v4  ;;  %v1764_v16 = vsel %vm329_vm2, %v1666_v4, 0.0 }
 0x170   : > { %v1864_v3 = vadd.f32 %v1863_v38, %v1862_v14  ;;  %v1765_v30 = vadd.f32 %v1764_v16, %v1763_v19 }
 0x171   : > { %v1865_v28 = vsel %vm329_vm2, %v1804_v22, 0.0 }
 0x172   : > { %v1866_v59 = vadd.f32 %v1865_v28, %v1864_v3 }
 0x176   : > { %v1669_v46 = vpop.f32.mrf.mxu3 }
 0x177   : > { %1703 = vst.msk [vmem:[%s3501_s27 + $0xf8] sm:$0xff] %vm329_vm2, %v1669_v46  ;;  %v1766_v63 = vsel %vm329_vm2, %v1669_v46, 0.0  ;;  %v1805_v36 = vmul.f32 %v1669_v46, %v1669_v46 }
 0x178   : > { %v1767_v9 = vadd.f32 %v1766_v63, %v1765_v30 }
 0x179   : > { %v1867_v6 = vsel %vm329_vm2, %v1805_v36, 0.0 }
 0x17a   : > { %v1768_v31 = vrot.slane %v1767_v9, 4  ;;  %v1868_v11 = vadd.f32 %v1867_v6, %v1866_v59 }
 0x17c   : > { %v1769_v32 = vadd.f32 %v1768_v31, %v1767_v9  ;;  %v1869_v51 = vrot.slane %v1868_v11, 4 }
 0x17e   : > { %v1770_v23 = vrot.slane %v1769_v32, 2  ;;  %v1870_v60 = vadd.f32 %v1869_v51, %v1868_v11 }
 0x180   : > { %v1771_v49 = vadd.f32 %v1770_v23, %v1769_v32  ;;  %v1871_v50 = vrot.slane %v1870_v60, 2 }
 0x182   : > { %v1772_v39 = vrot.slane %v1771_v49, 1  ;;  %v1872_v34 = vadd.f32 %v1871_v50, %v1870_v60 }
 0x184   : > { %v1873_v55 = vrot.slane %v1872_v34, 1  ;;  %v1773_v44 = vadd.f32 %v1772_v39, %v1771_v49 }
 0x186   : > { %v1874_v56 = vadd.f32 %v1873_v55, %v1872_v34 }
 0x188   : > { %v1876_v27 = vsel %vm1875_vm7, %v1773_v44, %v1874_v56 }
 0x189   : > { %v1877_v53 = vadd.f32 %v1876_v27, %v1704_v37 }
 0x18b   : > { %1879 = vst.msk [vmem:[%s3573_s7] sm:$0x3] %vm332_vm13, %v1877_v53 }
 0x18c PF: > { %s17_s23 = sadd.s32 1, %s2301_s23   ;;  %s3965_s21 = smov %s2297_s22 }
 0x18d   : > { %p14_p5 = scmp.ge.s32.totalorder %s17_s23, 4   ;;  %s3966_s22 = smov %s3968_s24 }
 0x18f   :  { %16 = sbr.rel (!%p14_p5) target bundleno = 2 (0x2), region = 91 }

// kernel: sep_conv_forward.4
= control target key start
LH: loop header
LB: loop body
LE: loop exit
PB: predicated region body
PF: predicated region fallthrough
CT: control target
= control target key end

     0   :  { %s2341_s21 = smov 0   ;;  %s2343_s22 = smov 0   ;;  %s3752_s0 = inlined_call_operand.vmem [shape: f32[2,16,16,4], index: 0, kind: input, shape index: {}]   ;;  %s3753_s1 = inlined_call_operand.vmem [shape: f32[1,4], index: 1, kind: input, shape index: {}]   ;;  %s3754_s2 = inlined_call_operand.vmem [shape: f32[1,4], index: 2, kind: input, shape index: {}]   ;;  %s3755_s3 = inlined_call_operand.vmem [shape: f32[3,3,4], index: 3, kind: input, shape index: {}]   ;;  %s3756_s4 = inlined_call_operand.vmem [shape: f32[4,8], index: 4, kind: input, shape index: {}]   ;;  %s3757_s5 = inlined_call_operand.vmem [shape: f32[2,16,16,8], index: 5, kind: output, shape index: {0}]   ;;  %s3758_s6 = inlined_call_operand.vmem [shape: f32[2,2,8], index: 6, kind: output, shape index: {1}]  }
   0x1   :  { %s2345_s23 = smov 0  }
   0x2 LB: > { %s29_s24 = sadd.s32 1, %s2299_s22  ;;  %p2014_p0 = scmp.ge.s32.totalorder %s2303_s23, 1  ;;  %s2303_s23 = sphi %s2345_s23, %s17_s23   ;;  %s2299_s22 = sphi %s2343_s22, %s3962_s22   ;;  %s2295_s21 = sphi %s2341_s21, %s3961_s21  }
   0x3   : > { %p31_p1 = scmp.ge.s32.totalorder %s29_s24, 2  ;;  %p229_p2 = scmp.lt.s32.totalorder %s2303_s23, 3 }
   0x5   : > { %s3964_s24 = smov (%p31_p1, %s29_s24), 0  ;;  %p230_p3 = pnand %p2014_p0, %p229_p2 }
   0x7   : > { %233 = sbr.rel (%p230_p3) target bundleno = 396 (0x18c), region = 40 }
   0xc   : > { %v1458_v0 = vld [vmem:[%s3756_s4] sm:$0xf]  ;;  %vm1556_vm0 = vcmask 1043456   ;;  %p268_p4 = scmp.lt.s32.totalorder %s2295_s21, 1  ;;  %vm292_vm1 = vcmask 24576   ;;  %v3759_v1 = vmov 0.0  }
   0xd   : > { %2212 = vmatpush.msk.msra.mxu0 %vm1556_vm0, %v1458_v0  ;;  %293 = vst.msk [vmem:[#allocation2] sm:$0x1] %vm292_vm1, %v3759_v1  ;;  %vm329_vm2 = vcmask 31744   ;;  %2249 = vmatpush.msk.msra.mxu1 %vm1556_vm0, %v1458_v0  ;;  %v2373_v2 = vld [vmem:[%s3753_s1] ss:$0 sm:$0xff]  ;;  %vm332_vm13 = vcmask 25600  }
   0xe   : > { %s3966_s21 = smov (!%p268_p4, %s2295_s21), 1  ;;  %294 = vst.msk [vmem:[#allocation2 + $0x18] sm:$0x1] %vm292_vm1, %v3759_v1  ;;  %2250 = vmatpush.msk.msra.mxu2 %vm1556_vm0, %v1458_v0  ;;  %2251 = vmatpush.msk.msra.mxu3 %vm1556_vm0, %v1458_v0  ;;  %v2390_v3 = vld [vmem:[%s3754_s2] ss:$0 sm:$0xff] }
   0xf   : > { %295 = vst.msk [vmem:[#allocation2 + $0x30] sm:$0x1] %vm292_vm1, %v3759_v1  ;;  %s2247_s29 = sshll.u32 %s3966_s21, 8  ;;  %v574_v4 = vld [vmem:[%s3755_s3] sm:$0x7]  ;;  %s2019_s28 = sshll.u32 %s3966_s21, 1 }
  0x10   : > { %3835 = vst [vmem:[#allocation3_spill] sm:$0xff] %v2373_v2  ;;  %s2383_s8 = scalar_lea.vmem %s3752_s0, %s2247_s29  ;;  %v2405_v13 = vperm.slane %v574_v4, 0  ;;  %v2412_v17 = vperm.slane %v574_v4, 1  ;;  %v2417_v19 = vperm.slane %v574_v4, 2  ;;  %v575_v33 = vld [vmem:[%s3755_s3 + $0x4] sm:$0x7]  ;;  %s3533_s27 = scalar_lea.vmem %s3757_s5, %s2247_s29 }
  0x11   : > { %330 = vst.msk [vmem:[#allocation2] sm:$0xff] %vm329_vm2, %v3759_v1  ;;  %v338_v5 = vld [vmem:[%s2383_s8] sm:$0xff]  ;;  %v339_v6 = vld [vmem:[%s2383_s8 + $0x8] sm:$0xff]  ;;  %v340_v7 = vld [vmem:[%s2383_s8 + $0x10] sm:$0xff]  ;;  %v2439_v40 = vperm.slane %v575_v33, 0  ;;  %v2441_v41 = vperm.slane %v575_v33, 1  ;;  %s3678_s30 = scalar_lea.vmem %s3758_s6, %s2019_s28 }
  0x12   : > { %331 = vst.msk [vmem:[#allocation2 + $0x8] sm:$0xff] %vm329_vm2, %v3759_v1  ;;  %v341_v8 = vld [vmem:[%s2383_s8 + $0x18] sm:$0xff]  ;;  %v374_v9 = vmul.f32 %v2373_v2, %v338_v5  ;;  %v375_v10 = vmul.f32 %v2373_v2, %v339_v6  ;;  %v376_v11 = vmul.f32 %v2373_v2, %v340_v7  ;;  %v344_v34 = vld [vmem:[%s2383_s8 + $0x30] sm:$0xff]  ;;  %v576_v39 = vld [vmem:[%s3755_s3 + $0x8] sm:$0x7]  ;;  %v2450_v46 = vperm.slane %v575_v33, 2 }
  0x13   : > { %3836 = vst [vmem:[#allocation4_spill] sm:$0xff] %v2390_v3  ;;  %v377_v12 = vmul.f32 %v2373_v2, %v341_v8  ;;  %v380_v37 = vmul.f32 %v2373_v2, %v344_v34  ;;  %v345_v38 = vld [vmem:[%s2383_s8 + $0x38] sm:$0xff]  ;;  %v346_v44 = vld [vmem:[%s2383_s8 + $0x40] sm:$0xff]  ;;  %v2456_v51 = vperm.slane %v576_v39, 0  ;;  %v2464_v55 = vperm.slane %v576_v39, 1  ;;  %v347_v59 = vld [vmem:[%s2383_s8 + $0x48] sm:$0xff] }
  0x14   : > { %296 = vst.msk [vmem:[#allocation2 + $0x48] sm:$0x1] %vm292_vm1, %v3759_v1  ;;  %v410_v14 = vadd.f32 %v2390_v3, %v374_v9  ;;  %v411_v15 = vadd.f32 %v2390_v3, %v375_v10  ;;  %v412_v16 = vadd.f32 %v2390_v3, %v376_v11  ;;  %v381_v42 = vmul.f32 %v2373_v2, %v345_v38  ;;  %v342_v7 = vld [vmem:[%s2383_s8 + $0x20] sm:$0xff]  ;;  %v348_v8 = vld [vmem:[%s2383_s8 + $0x50] sm:$0xff] }
  0x15   : > { %297 = vst.msk [vmem:[#allocation2 + $0x60] sm:$0x1] %vm292_vm1, %v3759_v1  ;;  %v413_v18 = vadd.f32 %v2390_v3, %v377_v12  ;;  %v416_v43 = vadd.f32 %v2390_v3, %v380_v37  ;;  %v382_v47 = vmul.f32 %v2373_v2, %v346_v44  ;;  %v2470_v58 = vperm.slane %v576_v39, 2 }
  0x16   : > { %298 = vst.msk [vmem:[#allocation2 + $0x78] sm:$0x1] %vm292_vm1, %v3759_v1  ;;  %vm442_vm3 = vcmp.ge.f32.partialorder %v410_v14, 0.0  ;;  %vm443_vm4 = vcmp.ge.f32.partialorder %v411_v15, 0.0  ;;  %vm444_vm5 = vcmp.ge.f32.partialorder %v412_v16, 0.0  ;;  %v417_v48 = vadd.f32 %v2390_v3, %v381_v42 }
  0x17   : > { %299 = vst.msk [vmem:[#allocation2 + $0x90] sm:$0x1] %vm292_vm1, %v3759_v1  ;;  %v474_v20 = vmul.f32 0.1, %v410_v14  ;;  %vm445_vm6 = vcmp.ge.f32.partialorder %v413_v18, 0.0  ;;  %v418_v60 = vadd.f32 %v2390_v3, %v382_v47  ;;  %vm448_vm7 = vcmp.ge.f32.partialorder %v416_v43, 0.0 }
  0x18   : > { %v579_v21 = vld [vmem:[#allocation2] sm:$0xff]  ;;  %v475_v22 = vmul.f32 0.1, %v411_v15  ;;  %v476_v23 = vmul.f32 0.1, %v412_v16  ;;  %v383_v4 = vmul.f32 %v2373_v2, %v347_v59  ;;  %vm449_vm8 = vcmp.ge.f32.partialorder %v417_v48, 0.0 }
  0x19   : > { %v612_v24 = vmul.f32 %v2405_v13, %v579_v21  ;;  %v676_v25 = vld [vmem:[#allocation2 + $0x1] sm:$0xff]  ;;  %v477_v26 = vmul.f32 0.1, %v413_v18  ;;  %v506_v27 = vsel %vm442_vm3, %v410_v14, %v474_v20  ;;  %300 = vst.msk [vmem:[#allocation2 + $0xa8] sm:$0x1] %vm292_vm1, %v3759_v1  ;;  %v378_v12 = vmul.f32 %v2373_v2, %v342_v7 }
  0x1a   : > { %v709_v28 = vmul.f32 %v2412_v17, %v676_v25  ;;  %v773_v29 = vld [vmem:[#allocation2 + $0x2] sm:$0xff]  ;;  %v507_v30 = vsel %vm443_vm4, %v411_v15, %v475_v22  ;;  %v508_v31 = vsel %vm444_vm5, %v412_v16, %v476_v23  ;;  %539 = vst.msk [vmem:[#allocation2 + $0x19] sm:$0xff] %vm329_vm2, %v506_v27  ;;  %v480_v56 = vmul.f32 0.1, %v416_v43  ;;  %v352_v15 = vld [vmem:[%s2383_s8 + $0x70] sm:$0xff] }
  0x1b   : > { %v509_v32 = vsel %vm445_vm6, %v413_v18, %v477_v26  ;;  %540 = vst.msk [vmem:[#allocation2 + $0x21] sm:$0xff] %vm329_vm2, %v507_v30  ;;  %v806_v36 = vmul.f32 %v2417_v19, %v773_v29  ;;  %v580_v0 = vld [vmem:[#allocation2 + $0x8] sm:$0xff]  ;;  %v481_v5 = vmul.f32 0.1, %v417_v48  ;;  %v384_v14 = vmul.f32 %v2373_v2, %v348_v8  ;;  %v349_v29 = vld [vmem:[%s2383_s8 + $0x58] sm:$0xff] }
  0x1c   : > { %541 = vst.msk [vmem:[#allocation2 + $0x31] sm:$0xff] %vm329_vm2, %v508_v31  ;;  %v741_v35 = vadd.f32 %v709_v28, %v612_v24  ;;  %v2503_v18 = vmul.f32 %v2405_v13, %v580_v0  ;;  %v419_v20 = vadd.f32 %v2390_v3, %v383_v4  ;;  %v2507_v21 = vsel %vm448_vm7, %v416_v43, %v480_v56  ;;  %v343_v28 = vld [vmem:[%s2383_s8 + $0x28] sm:$0xff] }
  0x1d   : > { %542 = vst.msk [vmem:[#allocation2 + $0x39] sm:$0xff] %vm329_vm2, %v509_v32  ;;  %v414_v24 = vadd.f32 %v2390_v3, %v378_v12  ;;  %v482_v25 = vmul.f32 0.1, %v418_v60  ;;  %vm450_vm9 = vcmp.ge.f32.partialorder %v418_v60, 0.0  ;;  %v2525_v30 = vsel %vm449_vm8, %v417_v48, %v481_v5  ;;  %v355_v4 = vld [vmem:[%s2383_s8 + $0x88] sm:$0xff]  ;;  %v356_v5 = vld [vmem:[%s2383_s8 + $0x90] sm:$0xff] }
  0x1e   : > { %301 = vst.msk [vmem:[#allocation2 + $0xc0] sm:$0x1] %vm292_vm1, %v3759_v1  ;;  %v838_v45 = vadd.f32 %v806_v36, %v741_v35  ;;  %v2528_v31 = vmul.f32 %v2373_v2, %v352_v15  ;;  %v379_v33 = vmul.f32 %v2373_v2, %v343_v28  ;;  %v385_v34 = vmul.f32 %v2373_v2, %v349_v29  ;;  %v353_v36 = vld [vmem:[%s2383_s8 + $0x78] sm:$0xff] }
  0x1f   : > { %302 = vst.msk [vmem:[#allocation2 + $0xd8] sm:$0x1] %vm292_vm1, %v3759_v1  ;;  %v2535_v35 = vadd.f32 %v2390_v3, %v384_v14  ;;  %v478_v37 = vmul.f32 0.1, %v414_v24  ;;  %v483_v42 = vmul.f32 0.1, %v419_v20 }
  0x20   : > { %303 = vst.msk [vmem:[#allocation2 + $0xf0] sm:$0x1] %vm292_vm1, %v3759_v1  ;;  %v415_v47 = vadd.f32 %v2390_v3, %v379_v33  ;;  %vm446_vm10 = vcmp.ge.f32.partialorder %v414_v24, 0.0  ;;  %vm451_vm11 = vcmp.ge.f32.partialorder %v419_v20, 0.0  ;;  %v421_v59 = vadd.f32 %v2390_v3, %v385_v34  ;;  %v357_v33 = vld [vmem:[%s2383_s8 + $0x98] sm:$0xff] }
  0x21   : > { %v2020_v49 = vld [vmem:[#allocation2 + $0x18] sm:$0xff]  ;;  %304 = vst.msk [vmem:[#allocation2 + $0x108] sm:$0x1] %vm292_vm1, %v3759_v1  ;;  %vm452_vm12 = vcmp.ge.f32.partialorder %v2535_v35, 0.0  ;;  %v484_v8 = vmul.f32 0.1, %v2535_v35 }
  0x22   : > { %v2052_v50 = vld [vmem:[#allocation2 + $0x19] sm:$0xff]  ;;  %v906_v52 = vmul.f32 %v2020_v49, %v2439_v40  ;;  %305 = vst.msk [vmem:[#allocation2 + $0x120] sm:$0x1] %vm292_vm1, %v3759_v1  ;;  %v2520_v27 = vld [vmem:[#allocation2 + $0x21] sm:$0xff]  ;;  %v614_v38 = vmul.f32 %v2020_v49, %v2405_v13  ;;  %v479_v7 = vmul.f32 0.1, %v415_v47 }
  0x23   : > { %v1003_v53 = vmul.f32 %v2052_v50, %v2441_v41  ;;  %v2462_v54 = vld [vmem:[#allocation2 + $0x1a] sm:$0xff]  ;;  %v2468_v57 = vld [vmem:[#allocation2 + $0x30] sm:$0xff]  ;;  %306 = vst.msk [vmem:[#allocation2 + $0x138] sm:$0x1] %vm292_vm1, %v3759_v1  ;;  %v711_v39 = vmul.f32 %v2052_v50, %v2412_v17  ;;  %v2546_v44 = vmul.f32 %v2520_v27, %v2441_v41  ;;  %v2556_v50 = vsel %vm450_vm9, %v418_v60, %v482_v25 }
  0x24   : > { %v938_v61 = vadd.f32 %v906_v52, %v838_v45  ;;  %v1100_v62 = vmul.f32 %v2462_v54, %v2450_v46  ;;  %v2478_v63 = vld [vmem:[#allocation2 + $0x31] sm:$0xff]  ;;  %307 = vst.msk [vmem:[#allocation2 + $0x150] sm:$0x1] %vm292_vm1, %v3759_v1  ;;  %v1200_v10 = vmul.f32 %v2468_v57, %v2456_v51  ;;  %v2493_v11 = vld [vmem:[#allocation2 + $0x20] sm:$0xff]  ;;  %v808_v49 = vmul.f32 %v2462_v54, %v2417_v19 }
  0x25   : > { %v2483_v6 = vld [vmem:[#allocation2 + $0x32] sm:$0xff]  ;;  %308 = vst.msk [vmem:[#allocation2 + $0x168] sm:$0x1] %vm292_vm1, %v3759_v1  ;;  %v1297_v16 = vmul.f32 %v2478_v63, %v2464_v55  ;;  %v2518_v26 = vmul.f32 %v2493_v11, %v2439_v40  ;;  %v743_v48 = vadd.f32 %v711_v39, %v614_v38  ;;  %v354_v52 = vld [vmem:[%s2383_s8 + $0x80] sm:$0xff]  ;;  %v2572_v60 = vsel %vm446_vm10, %v414_v24, %v478_v37 }
  0x26   : > { %v1035_v9 = vadd.f32 %v1003_v53, %v938_v61  ;;  %309 = vst.msk [vmem:[#allocation2 + $0x180] sm:$0x1] %vm292_vm1, %v3759_v1  ;;  %v1394_v23 = vmul.f32 %v2483_v6, %v2470_v58  ;;  %v2548_v45 = vld [vmem:[#allocation2 + $0x38] sm:$0xff]  ;;  %v389_v61 = vmul.f32 %v2373_v2, %v353_v36  ;;  %v908_v0 = vmul.f32 %v2468_v57, %v2439_v40 }
  0x27   : > { %310 = vst.msk [vmem:[#allocation2 + $0x198] sm:$0x1] %vm292_vm1, %v3759_v1  ;;  %v2561_v56 = vld [vmem:[#allocation2 + $0x39] sm:$0xff]  ;;  %v2570_v54 = vmul.f32 %v2548_v45, %v2456_v51  ;;  %vm447_vm14 = vcmp.ge.f32.partialorder %v415_v47, 0.0  ;;  %v1005_v15 = vmul.f32 %v2478_v63, %v2441_v41  ;;  %vm453_vm15 = vcmp.ge.f32.partialorder %v421_v59, 0.0 }
  0x28   : > { %v1132_v22 = vadd.f32 %v1100_v62, %v1035_v9  ;;  %311 = vst.msk [vmem:[#allocation2 + $0x11] sm:$0x1] %vm292_vm1, %v3759_v1  ;;  %v840_v62 = vadd.f32 %v808_v49, %v743_v48  ;;  %v2583_v9 = vsel %vm451_vm11, %v419_v20, %v483_v42  ;;  %v2590_v12 = vmul.f32 %v2561_v56, %v2464_v55 }
  0x29   : > { %312 = vst.msk [vmem:[#allocation2 + $0x29] sm:$0x1] %vm292_vm1, %v3759_v1  ;;  %v391_v20 = vmul.f32 %v2373_v2, %v355_v4  ;;  %v1102_v28 = vmul.f32 %v2483_v6, %v2450_v46  ;;  %v615_v29 = vmul.f32 %v2493_v11, %v2405_v13  ;;  %v511_v34 = vsel %vm447_vm14, %v415_v47, %v479_v7 }
  0x2a   : > { %v1232_v32 = vadd.f32 %v1200_v10, %v1132_v22  ;;  %313 = vst.msk [vmem:[#allocation2 + $0x41] sm:$0x1] %vm292_vm1, %v3759_v1  ;;  %v390_v10 = vmul.f32 %v2373_v2, %v354_v52  ;;  %v940_v14 = vadd.f32 %v908_v0, %v840_v62  ;;  %v392_v22 = vmul.f32 %v2373_v2, %v356_v5 }
  0x2b   : > { %314 = vst.msk [vmem:[#allocation2 + $0x59] sm:$0x1] %vm292_vm1, %v3759_v1  ;;  %v393_v36 = vmul.f32 %v2373_v2, %v357_v33  ;;  %v424_v37 = vadd.f32 %v2390_v3, %v2528_v31  ;;  %v425_v38 = vadd.f32 %v2390_v3, %v389_v61  ;;  %v2621_v11 = vsel %vm452_vm12, %v2535_v35, %v484_v8  ;;  %v350_v61 = vld [vmem:[%s2383_s8 + $0x60] sm:$0xff] }
  0x2c   : > { %v1329_v43 = vadd.f32 %v1297_v16, %v1232_v32  ;;  %315 = vst.msk [vmem:[#allocation2 + $0x71] sm:$0x1] %vm292_vm1, %v3759_v1  ;;  %v485_v16 = vmul.f32 0.1, %v421_v59  ;;  %v1037_v25 = vadd.f32 %v1005_v15, %v940_v14  ;;  %v712_v32 = vmul.f32 %v2520_v27, %v2412_v17 }
  0x2d   : > { %316 = vst.msk [vmem:[#allocation2 + $0x89] sm:$0x1] %vm292_vm1, %v3759_v1  ;;  %v426_v42 = vadd.f32 %v2390_v3, %v390_v10  ;;  %v427_v35 = vadd.f32 %v2390_v3, %v391_v20  ;;  %v909_v52 = vmul.f32 %v2548_v45, %v2439_v40  ;;  %vm456_vm0 = vcmp.ge.f32.partialorder %v424_v37, 0.0  ;;  %v351_v10 = vld [vmem:[%s2383_s8 + $0x68] sm:$0xff] }
  0x2e   : > { %v1426_v53 = vadd.f32 %v1394_v23, %v1329_v43  ;;  %317 = vst.msk [vmem:[#allocation2 + $0xa1] sm:$0x1] %vm292_vm1, %v3759_v1  ;;  %v744_v27 = vadd.f32 %v712_v32, %v615_v29  ;;  %v2635_v47 = vsel %vm453_vm15, %v421_v59, %v485_v16  ;;  %v2640_v48 = vadd.f32 %v1102_v28, %v1037_v25 }
  0x2f   : > { %318 = vst.msk [vmem:[#allocation2 + $0xb9] sm:$0x1] %vm292_vm1, %v3759_v1  ;;  %v429_v59 = vadd.f32 %v2390_v3, %v393_v36  ;;  %vm457_vm3 = vcmp.ge.f32.partialorder %v425_v38, 0.0  ;;  %v488_v62 = vmul.f32 0.1, %v424_v37  ;;  %v1006_v4 = vmul.f32 %v2561_v56, %v2441_v41 }
  0x30   : > { %2213 = vmatmul.msk.f32.vlgmr.msra.gmra.mxu0 %vm329_vm2, %v1426_v53  ;;  %319 = vst.msk [vmem:[#allocation2 + $0xd1] sm:$0x1] %vm292_vm1, %v3759_v1  ;;  %v2085_v23 = vld [vmem:[#allocation2 + $0x22] sm:$0xff]  ;;  %v428_v53 = vadd.f32 %v2390_v3, %v392_v22  ;;  %v489_v5 = vmul.f32 0.1, %v425_v38  ;;  %vm458_vm4 = vcmp.ge.f32.partialorder %v426_v42, 0.0  ;;  %v386_v14 = vmul.f32 %v2373_v2, %v350_v61 }
  0x31   : > { %320 = vst.msk [vmem:[#allocation2 + $0xe9] sm:$0x1] %vm292_vm1, %v3759_v1  ;;  %v2600_v24 = vld [vmem:[#allocation2 + $0x3a] sm:$0xff]  ;;  %v809_v39 = vmul.f32 %v2085_v23, %v2417_v19  ;;  %v2628_v31 = vmul.f32 %v2085_v23, %v2450_v46  ;;  %v490_v7 = vmul.f32 0.1, %v426_v42  ;;  %vm459_vm5 = vcmp.ge.f32.partialorder %v427_v35, 0.0 }
  0x32   : > { %321 = vst.msk [vmem:[#allocation2 + $0x101] sm:$0x1] %vm292_vm1, %v3759_v1  ;;  %v2632_v43 = vmul.f32 %v2600_v24, %v2470_v58  ;;  %v491_v8 = vmul.f32 0.1, %v427_v35  ;;  %v1103_v16 = vmul.f32 %v2600_v24, %v2450_v46  ;;  %v492_v20 = vmul.f32 0.1, %v428_v53 }
  0x33   : > { %322 = vst.msk [vmem:[#allocation2 + $0x119] sm:$0x1] %vm292_vm1, %v3759_v1  ;;  %v841_v49 = vadd.f32 %v809_v39, %v744_v27  ;;  %v360_v22 = vld [vmem:[%s2383_s8 + $0xb0] sm:$0xff]  ;;  %vm461_vm6 = vcmp.ge.f32.partialorder %v429_v59, 0.0  ;;  %v493_v23 = vmul.f32 0.1, %v429_v59  ;;  %v616_v25 = vmul.f32 %v2468_v57, %v2405_v13 }
  0x34   : > { %323 = vst.msk [vmem:[#allocation2 + $0x131] sm:$0x1] %vm292_vm1, %v3759_v1  ;;  %v713_v28 = vmul.f32 %v2478_v63, %v2412_v17  ;;  %v520_v29 = vsel %vm456_vm0, %v424_v37, %v488_v62  ;;  %v2672_v32 = vsel %vm457_vm3, %v425_v38, %v489_v5  ;;  %v2675_v33 = vsel %vm458_vm4, %v426_v42, %v490_v7  ;;  %v361_v39 = vld [vmem:[%s2383_s8 + $0xb8] sm:$0xff]  ;;  %v362_v37 = vld [vmem:[%s2383_s8 + $0xc0] sm:$0xff] }
  0x35   : > { %324 = vst.msk [vmem:[#allocation2 + $0x149] sm:$0x1] %vm292_vm1, %v3759_v1  ;;  %v941_v0 = vadd.f32 %v909_v52, %v841_v49  ;;  %v387_v36 = vmul.f32 %v2373_v2, %v351_v10  ;;  %v810_v63 = vmul.f32 %v2483_v6, %v2417_v19  ;;  %v422_v27 = vadd.f32 %v2390_v3, %v386_v14  ;;  %v358_v6 = vld [vmem:[%s2383_s8 + $0xa0] sm:$0xff] }
  0x36   : > { %325 = vst.msk [vmem:[#allocation2 + $0x161] sm:$0x1] %vm292_vm1, %v3759_v1  ;;  %v745_v57 = vadd.f32 %v713_v28, %v616_v25  ;;  %v396_v38 = vmul.f32 %v2373_v2, %v360_v22  ;;  %v2690_v49 = vsel %vm459_vm5, %v427_v35, %v491_v8  ;;  %v2700_v61 = vsel %vm461_vm6, %v429_v59, %v493_v23 }
  0x37   : > { %326 = vst.msk [vmem:[#allocation2 + $0x179] sm:$0x1] %vm292_vm1, %v3759_v1  ;;  %v1038_v15 = vadd.f32 %v1006_v4, %v941_v0  ;;  %v423_v52 = vadd.f32 %v2390_v3, %v387_v36  ;;  %vm454_vm7 = vcmp.ge.f32.partialorder %v422_v27, 0.0  ;;  %v486_v62 = vmul.f32 0.1, %v422_v27 }
  0x38   : > { %327 = vst.msk [vmem:[#allocation2 + $0x191] sm:$0x1] %vm292_vm1, %v3759_v1  ;;  %v397_v0 = vmul.f32 %v2373_v2, %v361_v39  ;;  %v398_v4 = vmul.f32 %v2373_v2, %v362_v37  ;;  %v2710_v59 = vadd.f32 %v810_v63, %v745_v57  ;;  %v2718_v8 = vadd.f32 %v2390_v3, %v396_v38 }
  0x39   : > { %328 = vst.msk [vmem:[#allocation2 + $0x1a9] sm:$0x1] %vm292_vm1, %v3759_v1  ;;  %vm460_vm1 = vcmp.ge.f32.partialorder %v428_v53, 0.0  ;;  %v2687_v42 = vadd.f32 %v1103_v16, %v1038_v15  ;;  %vm455_vm8 = vcmp.ge.f32.partialorder %v423_v52, 0.0  ;;  %v487_v35 = vmul.f32 0.1, %v423_v52 }
  0x3a   : > { %336 = vst.msk [vmem:[#allocation2 + $0x1a0] sm:$0xff] %vm329_vm2, %v3759_v1  ;;  %v2712_v7 = vsel %vm454_vm7, %v422_v27, %v486_v62  ;;  %v364_v16 = vld [vmem:[%s2383_s8 + $0xd0] sm:$0xff]  ;;  %v2735_v22 = vmul.f32 %v2548_v45, %v2405_v13  ;;  %v2739_v23 = vmul.f32 %v2561_v56, %v2412_v17  ;;  %v2756_v45 = vmul.f32 %v2600_v24, %v2417_v19 }
  0x3b   : > { %333 = vst.msk [vmem:[#allocation2 + $0x10] sm:$0x3] %vm332_vm13, %v3759_v1  ;;  %v2724_v15 = vsel %vm455_vm8, %v423_v52, %v487_v35  ;;  %v2745_v25 = vmul.f32 %v2373_v2, %v364_v16  ;;  %v2759_v56 = vadd.f32 %v2390_v3, %v397_v0  ;;  %vm1673_vm6 = vcmask 64512  }
  0x3c   : > { %335 = vst.msk [vmem:[#allocation2 + $0x198] sm:$0xff] %vm329_vm2, %v3759_v1  ;;  %vm1877_vm7 = vcmask 1040384  }
  0x3d   : > { %337 = vst.msk [vmem:[#allocation2 + $0x1a8] sm:$0x3] %vm332_vm13, %v3759_v1 }
  0x3e   : > { %543 = vst.msk [vmem:[#allocation2 + $0x49] sm:$0xff] %vm329_vm2, %v2572_v60  ;;  %v2693_v60 = vsel %vm460_vm1, %v428_v53, %v492_v20  ;;  %v363_v53 = vld [vmem:[%s2383_s8 + $0xc8] sm:$0xff] }
  0x3f   : > { %544 = vst.msk [vmem:[#allocation2 + $0x51] sm:$0xff] %vm329_vm2, %v511_v34  ;;  %v394_v34 = vmul.f32 %v2373_v2, %v358_v6  ;;  %v2729_v20 = vmul.f32 %v2373_v2, %v363_v53 }
  0x40   : > { %545 = vst.msk [vmem:[#allocation2 + $0x61] sm:$0xff] %vm329_vm2, %v2507_v21 }
  0x41   : > { %546 = vst.msk [vmem:[#allocation2 + $0x69] sm:$0xff] %vm329_vm2, %v2525_v30  ;;  %v2715_v30 = vadd.f32 %v2390_v3, %v394_v34 }
  0x42   : > { %v677_v21 = vld [vmem:[#allocation2 + $0x9] sm:$0xff]  ;;  %547 = vst.msk [vmem:[#allocation2 + $0x79] sm:$0xff] %vm329_vm2, %v2556_v50 }
  0x43   : > { %v774_v5 = vld [vmem:[#allocation2 + $0xa] sm:$0xff]  ;;  %3837 = vst [vmem:[#allocation5_spill] sm:$0xff] %v2715_v30  ;;  %v710_v10 = vmul.f32 %v2412_v17, %v677_v21 }
  0x44   : > { %3838 = vst [vmem:[#allocation6_spill] sm:$0xff] %v2718_v8  ;;  %v807_v14 = vmul.f32 %v2417_v19, %v774_v5  ;;  %v359_v50 = vld [vmem:[%s2383_s8 + $0xa8] sm:$0xff] }
  0x45   : > { %548 = vst.msk [vmem:[#allocation2 + $0x81] sm:$0xff] %vm329_vm2, %v2583_v9  ;;  %v2742_v9 = vmul.f32 %v2373_v2, %v359_v50  ;;  %v742_v28 = vadd.f32 %v710_v10, %v2503_v18  ;;  %v2748_v36 = vld [vmem:[#allocation2 + $0x48] sm:$0xff] }
  0x46   : > { %3839 = vst [vmem:[#allocation7_spill] sm:$0xff] %v2729_v20  ;;  %v2750_v57 = vld [vmem:[#allocation2 + $0x49] sm:$0xff]  ;;  %v1202_v18 = vmul.f32 %v2748_v36, %v2456_v51  ;;  %v2777_v24 = vmul.f32 %v2748_v36, %v2439_v40  ;;  %v2793_v35 = vld [vmem:[#allocation2 + $0x52] sm:$0xff] }
  0x47   : > { %549 = vst.msk [vmem:[#allocation2 + $0x91] sm:$0xff] %vm329_vm2, %v2621_v11  ;;  %v2762_v11 = vadd.f32 %v2390_v3, %v398_v4  ;;  %v1299_v63 = vmul.f32 %v2750_v57, %v2464_v55  ;;  %v2768_v27 = vld [vmem:[#allocation2 + $0x4a] sm:$0xff]  ;;  %v2781_v37 = vmul.f32 %v2750_v57, %v2441_v41  ;;  %v839_v38 = vadd.f32 %v807_v14, %v742_v28  ;;  %v2785_v6 = vld [vmem:[#allocation2 + $0x60] sm:$0xff] }
  0x48   : > { %3840 = vst [vmem:[#allocation8_spill] sm:$0xff] %v2742_v9  ;;  %v2770_v39 = vld [vmem:[#allocation2 + $0x50] sm:$0xff]  ;;  %v1396_v52 = vmul.f32 %v2768_v27, %v2470_v58  ;;  %v2787_v62 = vld [vmem:[#allocation2 + $0x61] sm:$0xff]  ;;  %v1234_v53 = vadd.f32 %v1202_v18, %v2640_v48  ;;  %v620_v0 = vmul.f32 %v2405_v13, %v2785_v6  ;;  %v1397_v5 = vmul.f32 %v2793_v35, %v2470_v58 }
  0x49   : > { %3841 = vst [vmem:[#allocation9_spill] sm:$0xff] %v2745_v25  ;;  %v1203_v34 = vmul.f32 %v2770_v39, %v2456_v51  ;;  %v717_v4 = vmul.f32 %v2412_v17, %v2787_v62  ;;  %v2802_v21 = vld [vmem:[#allocation2 + $0x62] sm:$0xff]  ;;  %v939_v48 = vadd.f32 %v2518_v26, %v839_v38  ;;  %v2815_v50 = vld [vmem:[#allocation2 + $0x78] sm:$0xff]  ;;  %v2822_v1 = vld [vmem:[#allocation2 + $0x6a] sm:$0xff] }
  0x4a   : > { %3842 = vst [vmem:[#allocation10_spill] sm:$0xff] %v2748_v36  ;;  %v2806_v10 = vld [vmem:[#allocation2 + $0x68] sm:$0xff]  ;;  %v2817_v16 = vld [vmem:[#allocation2 + $0x79] sm:$0xff]  ;;  %v914_v26 = vmul.f32 %v2815_v50, %v2439_v40  ;;  %v815_v30 = vmul.f32 %v2417_v19, %v2822_v1 }
  0x4b   : > { %3843 = vst [vmem:[#allocation11_spill] sm:$0xff] %v2750_v57  ;;  %v2808_v14 = vld [vmem:[#allocation2 + $0x69] sm:$0xff]  ;;  %v1235_v28 = vadd.f32 %v1203_v34, %v2687_v42  ;;  %v621_v18 = vmul.f32 %v2405_v13, %v2806_v10  ;;  %v749_v57 = vadd.f32 %v717_v4, %v620_v0  ;;  %v1011_v38 = vmul.f32 %v2817_v16, %v2441_v41 }
  0x4c   : > { %550 = vst.msk [vmem:[#allocation2 + $0x99] sm:$0xff] %vm329_vm2, %v2635_v47  ;;  %v2772_v47 = vld [vmem:[#allocation2 + $0x51] sm:$0xff]  ;;  %v2830_v36 = vld [vmem:[#allocation2 + $0x7a] sm:$0xff]  ;;  %v1036_v34 = vadd.f32 %v2546_v44, %v939_v48  ;;  %v718_v4 = vmul.f32 %v2412_v17, %v2808_v14 }
  0x4d   : > { %3844 = vst [vmem:[#allocation12_spill] sm:$0xff] %v2759_v56  ;;  %v2834_v42 = vld [vmem:[#allocation2 + $0x81] sm:$0xff] }
  0x4e   : > { %3845 = vst [vmem:[#allocation13_spill] sm:$0xff] %v2762_v11  ;;  %v2832_v11 = vld [vmem:[#allocation2 + $0x80] sm:$0xff] }
  0x4f   : > { %3846 = vst [vmem:[#allocation14_spill] sm:$0xff] %v2772_v47  ;;  %v2847_v56 = vld [vmem:[#allocation2 + $0x82] sm:$0xff] }
  0x50   : > { %553 = vst.msk [vmem:[#allocation2 + $0xc1] sm:$0xff] %vm329_vm2, %v520_v29  ;;  %v1300_v29 = vmul.f32 %v2772_v47, %v2464_v55 }
  0x51   : > { %3847 = vst [vmem:[#allocation15_spill] sm:$0xff] %v2793_v35 }
  0x52   : > { %554 = vst.msk [vmem:[#allocation2 + $0xc9] sm:$0xff] %vm329_vm2, %v2672_v32  ;;  %v814_v32 = vmul.f32 %v2417_v19, %v2802_v21  ;;  %v1332_v0 = vadd.f32 %v1300_v29, %v1235_v28 }
  0x53   : > { %3848 = vst [vmem:[#allocation16_spill] sm:$0xff] %v2806_v10  ;;  %v2857_v25 = vld [vmem:[#allocation2 + $0x92] sm:$0xff] }
  0x54   : > { %3849 = vst [vmem:[#allocation17_spill] sm:$0xff] %v2808_v14  ;;  %v2859_v29 = vld [vmem:[#allocation2 + $0x98] sm:$0xff] }
  0x55   : > { %555 = vst.msk [vmem:[#allocation2 + $0xd9] sm:$0xff] %vm329_vm2, %v2675_v33  ;;  %v1331_v33 = vadd.f32 %v1299_v63, %v1234_v53  ;;  %v2841_v63 = vld [vmem:[#allocation2 + $0x90] sm:$0xff]  ;;  %v2861_v28 = vld [vmem:[#allocation2 + $0x99] sm:$0xff] }
  0x56   : > { %3850 = vst [vmem:[#allocation18_spill] sm:$0xff] %v2815_v50  ;;  %v2843_v53 = vld [vmem:[#allocation2 + $0x91] sm:$0xff]  ;;  %v1208_v44 = vmul.f32 %v2841_v63, %v2456_v51 }
  0x57   : > { %3851 = vst [vmem:[#allocation19_spill] sm:$0xff] %v2817_v16  ;;  %v2851_v8 = vadd.f32 %v1396_v52, %v1331_v33  ;;  %v1305_v48 = vmul.f32 %v2843_v53, %v2464_v55  ;;  %v2868_v52 = vadd.f32 %v1397_v5, %v1332_v0  ;;  %v2870_v33 = vld [vmem:[#allocation2 + $0x9a] sm:$0xff]  ;;  %v1109_v0 = vmul.f32 %v2847_v56, %v2450_v46 }
  0x58   : > { %3852 = vst [vmem:[#allocation20_spill] sm:$0xff] %v2822_v1  ;;  %v2872_v20 = vld [vmem:[#allocation2 + $0xc0] sm:$0xff] }
  0x59   : > { %556 = vst.msk [vmem:[#allocation2 + $0xe1] sm:$0xff] %vm329_vm2, %v2690_v49  ;;  %v1108_v49 = vmul.f32 %v2830_v36, %v2450_v46  ;;  %v2882_v5 = vld [vmem:[#allocation2 + $0xc1] sm:$0xff] }
  0x5a   : > { %3853 = vst [vmem:[#allocation21_spill] sm:$0xff] %v2830_v36 }
  0x5b   : > { %3854 = vst [vmem:[#allocation22_spill] sm:$0xff] %v2832_v11 }
  0x5c   : > { %3855 = vst [vmem:[#allocation23_spill] sm:$0xff] %v2834_v42 }
  0x5d   : > { %557 = vst.msk [vmem:[#allocation2 + $0xf1] sm:$0xff] %vm329_vm2, %v2693_v60  ;;  %v846_v60 = vadd.f32 %v814_v32, %v749_v57  ;;  %v1402_v57 = vmul.f32 %v2857_v25, %v2470_v58  ;;  %v750_v32 = vadd.f32 %v718_v4, %v621_v18  ;;  %v2884_v18 = vld [vmem:[#allocation2 + $0xc2] sm:$0xff]  ;;  %v2893_v4 = vld [vmem:[#allocation2 + $0xd8] sm:$0xff] }
  0x5e   : > { %3856 = vst [vmem:[#allocation24_spill] sm:$0xff] %v2847_v56 }
  0x5f   : > { %558 = vst.msk [vmem:[#allocation2 + $0xf9] sm:$0xff] %vm329_vm2, %v2700_v61  ;;  %v1133_v61 = vadd.f32 %v2628_v31, %v1036_v34  ;;  %v946_v2 = vadd.f32 %v914_v26, %v846_v60  ;;  %v915_v31 = vmul.f32 %v2832_v11, %v2439_v40  ;;  %v1306_v26 = vmul.f32 %v2861_v28, %v2464_v55  ;;  %v2895_v60 = vld [vmem:[#allocation2 + $0xd9] sm:$0xff] }
  0x60   : > { %3857 = vst [vmem:[#allocation25_spill] sm:$0xff] %v2859_v29  ;;  %v847_v9 = vadd.f32 %v815_v30, %v750_v32 }
  0x61   : > { %3858 = vst [vmem:[#allocation26_spill] sm:$0xff] %v2861_v28  ;;  %v1233_v34 = vadd.f32 %v2570_v54, %v1133_v61  ;;  %v1043_v3 = vadd.f32 %v1011_v38, %v946_v2  ;;  %v628_v54 = vmul.f32 %v2405_v13, %v2872_v20  ;;  %v2901_v61 = vld [vmem:[#allocation2 + $0xda] sm:$0xff]  ;;  %v822_v28 = vmul.f32 %v2417_v19, %v2884_v18 }
  0x62   : > { %551 = vst.msk [vmem:[#allocation2 + $0xa9] sm:$0xff] %vm329_vm2, %v2712_v7  ;;  %v1012_v7 = vmul.f32 %v2834_v42, %v2441_v41  ;;  %v922_v2 = vmul.f32 %v2893_v4, %v2439_v40 }
  0x63   : > { %3859 = vst [vmem:[#allocation27_spill] sm:$0xff] %v2868_v52  ;;  %v1403_v52 = vmul.f32 %v2870_v33, %v2470_v58  ;;  %v1330_v56 = vadd.f32 %v2590_v12, %v1233_v34  ;;  %v1140_v32 = vadd.f32 %v1108_v49, %v1043_v3  ;;  %v1116_v12 = vmul.f32 %v2901_v61, %v2450_v46 }
  0x64   : > { %3860 = vst [vmem:[#allocation28_spill] sm:$0xff] %v2870_v33  ;;  %v2910_v30 = vld [vmem:[#allocation2 + $0xf0] sm:$0xff]  ;;  %v947_v33 = vadd.f32 %v915_v31, %v847_v9  ;;  %v942_v49 = vadd.f32 %v2777_v24, %v2710_v59  ;;  %v622_v24 = vmul.f32 %v2815_v50, %v2405_v13 }
  0x65   : > { %3861 = vst [vmem:[#allocation29_spill] sm:$0xff] %v2872_v20  ;;  %v2912_v38 = vld [vmem:[#allocation2 + $0xf1] sm:$0xff]  ;;  %v1019_v20 = vmul.f32 %v2895_v60, %v2441_v41  ;;  %v1240_v11 = vadd.f32 %v1208_v44, %v1140_v32  ;;  %v1301_v44 = vmul.f32 %v2464_v55, %v2787_v62  ;;  %v2961_v50 = vld [vmem:[#allocation2 + $0xc9] sm:$0xff] }
  0x66   : > { %552 = vst.msk [vmem:[#allocation2 + $0xb1] sm:$0xff] %vm329_vm2, %v2724_v15  ;;  %v1209_v15 = vmul.f32 %v2859_v29, %v2456_v51  ;;  %v725_v29 = vmul.f32 %v2412_v17, %v2882_v5  ;;  %v2918_v34 = vld [vmem:[#allocation2 + $0xf2] sm:$0xff]  ;;  %v1313_v42 = vmul.f32 %v2912_v38, %v2464_v55  ;;  %v1044_v3 = vadd.f32 %v1012_v7, %v947_v33 }
  0x67   : > { %3862 = vst [vmem:[#allocation30_spill] sm:$0xff] %v2882_v5  ;;  %v1427_v5 = vadd.f32 %v2632_v43, %v1330_v56  ;;  %v2927_v9 = vmul.f32 %v2918_v34, %v2470_v58  ;;  %v1104_v43 = vmul.f32 %v2768_v27, %v2450_v46  ;;  %v1204_v56 = vmul.f32 %v2456_v51, %v2785_v6 }
  0x68   : > { %3863 = vst [vmem:[#allocation31_spill] sm:$0xff] %v2884_v18  ;;  %v757_v18 = vadd.f32 %v725_v29, %v628_v54  ;;  %v1337_v29 = vadd.f32 %v1305_v48, %v1240_v11  ;;  %v1141_v33 = vadd.f32 %v1109_v0, %v1044_v3  ;;  %v1039_v7 = vadd.f32 %v2781_v37, %v942_v49  ;;  %v2955_v3 = vld [vmem:[#allocation2 + $0xc8] sm:$0xff] }
  0x69   : > { %3864 = vst [vmem:[#allocation32_spill] sm:$0xff] %v2893_v4  ;;  %v1216_v4 = vmul.f32 %v2910_v30, %v2456_v51  ;;  %2214 = vmatmul.msk.f32.gmra.mxu0 %vm329_vm2, %v1427_v5  ;;  %v1398_v54 = vmul.f32 %v2470_v58, %v2802_v21  ;;  %v816_v5 = vmul.f32 %v2830_v36, %v2417_v19  ;;  %v2949_v32 = vld [vmem:[#allocation2 + $0xa9] sm:$0xff] }
  0x6a   : > { %v854_v31 = vadd.f32 %v822_v28, %v757_v18  ;;  %v719_v28 = vmul.f32 %v2817_v16, %v2412_v17  ;;  %v2947_v18 = vld [vmem:[#allocation2 + $0xa8] sm:$0xff]  ;;  %3866 = vst [vmem:[#allocation34_spill] sm:$0xff] %v2949_v32  ;;  %v1434_v11 = vadd.f32 %v1402_v57, %v1337_v29  ;;  %v1241_v48 = vadd.f32 %v1209_v15, %v1141_v33  ;;  %v2970_v33 = vld [vmem:[#allocation2 + $0xe0] sm:$0xff] }
  0x6b   : > { %3865 = vst [vmem:[#allocation33_spill] sm:$0xff] %v2947_v18  ;;  %v1136_v37 = vadd.f32 %v1104_v43, %v1039_v7  ;;  %v916_v0 = vmul.f32 %v2841_v63, %v2439_v40  ;;  %v1013_v16 = vmul.f32 %v2843_v53, %v2441_v41  ;;  %v1110_v36 = vmul.f32 %v2857_v25, %v2450_v46  ;;  %v2963_v57 = vld [vmem:[#allocation2 + $0xca] sm:$0xff]  ;;  %v2972_v7 = vld [vmem:[#allocation2 + $0xe1] sm:$0xff] }
  0x6c   : > { %v954_v59 = vadd.f32 %v922_v2, %v854_v31  ;;  %3868 = vst [vmem:[#allocation36_spill] sm:$0xff] %v2955_v3  ;;  %v751_v31 = vadd.f32 %v719_v28, %v622_v24  ;;  %2221 = vmatmul.msk.f32.vlgmr.msra.gmra.mxu1 %vm329_vm2, %v1434_v11  ;;  %v1338_v15 = vadd.f32 %v1306_v26, %v1241_v48  ;;  %v2978_v26 = vld [vmem:[#allocation2 + $0xe2] sm:$0xff] }
  0x6d   : > { %v2953_v2 = vld [vmem:[#allocation2 + $0xaa] sm:$0xff]  ;;  %3869 = vst [vmem:[#allocation37_spill] sm:$0xff] %v2961_v50  ;;  %v1236_v43 = vadd.f32 %v1204_v56, %v1136_v37  ;;  %v1210_v29 = vmul.f32 %v2947_v18, %v2456_v51  ;;  %v629_v11 = vmul.f32 %v2405_v13, %v2955_v3  ;;  %v2980_v56 = vld [vmem:[#allocation2 + $0xf8] sm:$0xff]  ;;  %v823_v18 = vmul.f32 %v2417_v19, %v2963_v57 }
  0x6e   : > { %3867 = vst [vmem:[#allocation35_spill] sm:$0xff] %v2953_v2  ;;  %v1051_v49 = vadd.f32 %v1019_v20, %v954_v59  ;;  %v1307_v20 = vmul.f32 %v2949_v32, %v2464_v55  ;;  %v848_v24 = vadd.f32 %v816_v5, %v751_v31  ;;  %v1404_v28 = vmul.f32 %v2953_v2, %v2470_v58  ;;  %v2988_v5 = vld [vmem:[#allocation2 + $0xfa] sm:$0xff] }
  0x6f   : > { %3870 = vst [vmem:[#allocation38_spill] sm:$0xff] %v2963_v57  ;;  %v1435_v48 = vadd.f32 %v1403_v52, %v1338_v15  ;;  %v1333_v37 = vadd.f32 %v1301_v44, %v1236_v43  ;;  %v726_v32 = vmul.f32 %v2412_v17, %v2961_v50  ;;  %v923_v3 = vmul.f32 %v2970_v33, %v2439_v40 }
  0x70   : > { %3871 = vst [vmem:[#allocation39_spill] sm:$0xff] %v2970_v33  ;;  %v1148_v59 = vadd.f32 %v1116_v12, %v1051_v49  ;;  %v2986_v12 = vld [vmem:[#allocation2 + $0xf9] sm:$0xff]  ;;  %v948_v31 = vadd.f32 %v916_v0, %v848_v24  ;;  %v1020_v52 = vmul.f32 %v2972_v7, %v2441_v41  ;;  %v1117_v43 = vmul.f32 %v2978_v26, %v2450_v46 }
  0x71   : > { %3872 = vst [vmem:[#allocation40_spill] sm:$0xff] %v2972_v7  ;;  %2215 = vmatmul.msk.f32.gmra.mxu0 %vm329_vm2, %v2851_v8  ;;  %v2996_v44 = vadd.f32 %v1398_v54, %v1333_v37  ;;  %v758_v15 = vadd.f32 %v726_v32, %v629_v11  ;;  %v1217_v57 = vmul.f32 %v2980_v56, %v2456_v51 }
  0x72   : > { %3873 = vst [vmem:[#allocation41_spill] sm:$0xff] %v2978_v26  ;;  %v1248_v49 = vadd.f32 %v1216_v4, %v1148_v59  ;;  %v1045_v2 = vadd.f32 %v1013_v16, %v948_v31  ;;  %v1314_v8 = vmul.f32 %v2986_v12, %v2464_v55  ;;  %v1411_v4 = vmul.f32 %v2988_v5, %v2470_v58  ;;  %v3032_v31 = vld [vmem:[#allocation2 + $0xb1] sm:$0xff] }
  0x73   : > { %3874 = vst [vmem:[#allocation42_spill] sm:$0xff] %v2980_v56  ;;  %v855_v0 = vadd.f32 %v823_v18, %v758_v15  ;;  %v746_v54 = vadd.f32 %v2739_v23, %v2735_v22  ;;  %v911_v32 = vmul.f32 %v2770_v39, %v2439_v40  ;;  %v1008_v59 = vmul.f32 %v2772_v47, %v2441_v41  ;;  %v3034_v15 = vld [vmem:[#allocation2 + $0xb2] sm:$0xff] }
  0x74   : > { %3875 = vst [vmem:[#allocation43_spill] sm:$0xff] %v2986_v12  ;;  %v1345_v50 = vadd.f32 %v1313_v42, %v1248_v49  ;;  %v1142_v42 = vadd.f32 %v1110_v36, %v1045_v2  ;;  %v1105_v16 = vmul.f32 %v2793_v35, %v2450_v46  ;;  %v1205_v11 = vmul.f32 %v2456_v51, %v2806_v10  ;;  %v3023_v49 = vld [vmem:[#allocation2 + $0xb0] sm:$0xff]  ;;  %v3884_v10 = vld [vmem:[#allocation28_spill] sm:$0xff] }
  0x75   : > { %3876 = vst [vmem:[#allocation44_spill] sm:$0xff] %v2988_v5  ;;  %2222 = vmatmul.msk.f32.gmra.mxu1 %vm329_vm2, %v1435_v48  ;;  %v955_v18 = vadd.f32 %v923_v3, %v855_v0  ;;  %v843_v22 = vadd.f32 %v2756_v45, %v746_v54  ;;  %v1302_v23 = vmul.f32 %v2464_v55, %v2808_v14  ;;  %v3879_v2 = vld [vmem:[#allocation23_spill] sm:$0xff]  ;;  %v3880_v3 = vld [vmem:[#allocation24_spill] sm:$0xff] }
  0x76   : > { %v1442_v24 = vadd.f32 %v2927_v9, %v1345_v50  ;;  %v1399_v37 = vmul.f32 %v2470_v58, %v2822_v1  ;;  %3877 = vst [vmem:[#allocation45_spill] sm:$0xff] %v3023_v49  ;;  %v1242_v36 = vadd.f32 %v1210_v29, %v1142_v42  ;;  %v3878_v50 = vld [vmem:[#allocation22_spill] sm:$0xff]  ;;  %v720_v48 = vmul.f32 %v3879_v2, %v2412_v17  ;;  %v3881_v1 = vld [vmem:[#allocation25_spill] sm:$0xff]  ;;  %v3883_v42 = vld [vmem:[#allocation27_spill] sm:$0xff] }
  0x77   : > { %v623_v9 = vmul.f32 %v3878_v50, %v2405_v13  ;;  %v817_v45 = vmul.f32 %v3880_v3, %v2417_v19  ;;  %v1052_v0 = vadd.f32 %v1020_v52, %v955_v18  ;;  %v943_v54 = vadd.f32 %v911_v32, %v843_v22  ;;  %v3882_v29 = vld [vmem:[#allocation26_spill] sm:$0xff] }
  0x78   : > { %2229 = vmatmul.msk.f32.vlgmr.msra.gmra.mxu2 %vm329_vm2, %v1442_v24  ;;  %v917_v14 = vmul.f32 %v3881_v1, %v2439_v40  ;;  %v1014_v24 = vmul.f32 %v3882_v29, %v2441_v41  ;;  %v1339_v50 = vadd.f32 %v1307_v20, %v1242_v36  ;;  %v1111_v3 = vmul.f32 %v3884_v10, %v2450_v46  ;;  %v3885_v1 = vld [vmem:[#allocation8_spill] sm:$0xff]  ;;  %v3887_v36 = vld [vmem:[#allocation5_spill] sm:$0xff] }
  0x79   : > { %2216 = vmatmul.msk.f32.gmra.mxu0 %vm329_vm2, %v3883_v42  ;;  %v752_v2 = vadd.f32 %v720_v48, %v623_v9  ;;  %v1211_v35 = vmul.f32 %v3023_v49, %v2456_v51  ;;  %v1149_v47 = vadd.f32 %v1117_v43, %v1052_v0  ;;  %v1040_v52 = vadd.f32 %v1008_v59, %v943_v54  ;;  %v3886_v42 = vld [vmem:[#allocation4_spill] sm:$0xff] }
  0x7a   : > { %v1308_v32 = vmul.f32 %v3032_v31, %v2464_v55  ;;  %v1405_v18 = vmul.f32 %v3034_v15, %v2470_v58  ;;  %v1436_v22 = vadd.f32 %v1404_v28, %v1339_v50  ;;  %v431_v20 = vadd.f32 %v3886_v42, %v3885_v1  ;;  %v3888_v43 = vld [vmem:[#allocation32_spill] sm:$0xff] }
  0x7b   : > { %v849_v29 = vadd.f32 %v817_v45, %v752_v2  ;;  %vm462_vm9 = vcmp.ge.f32.partialorder %v3887_v36, 0.0  ;;  %v1249_v9 = vadd.f32 %v1217_v57, %v1149_v47  ;;  %v1137_v48 = vadd.f32 %v1105_v16, %v1040_v52  ;;  %v365_v57 = vld [vmem:[%s2383_s8 + $0xd8] sm:$0xff] }
  0x7c   : > { %v494_v49 = vmul.f32 0.1, %v3887_v36  ;;  %v630_v59 = vmul.f32 %v3888_v43, %v2405_v13  ;;  %vm463_vm10 = vcmp.ge.f32.partialorder %v431_v20, 0.0  ;;  %v495_v54 = vmul.f32 0.1, %v431_v20  ;;  %v3893_v43 = vld [vmem:[#allocation12_spill] sm:$0xff] }
  0x7d   : > { %v949_v0 = vadd.f32 %v917_v14, %v849_v29  ;;  %v727_v28 = vmul.f32 %v2895_v60, %v2412_v17  ;;  %2223 = vmatmul.msk.f32.gmra.mxu1 %vm329_vm2, %v1436_v22  ;;  %v1346_v50 = vadd.f32 %v1314_v8, %v1249_v9  ;;  %v1237_v2 = vadd.f32 %v1205_v11, %v1137_v48  ;;  %v3892_v48 = vld [vmem:[#allocation6_spill] sm:$0xff] }
  0x7e   : > { %v526_v1 = vsel %vm462_vm9, %v3887_v36, %v494_v49  ;;  %v824_v47 = vmul.f32 %v2901_v61, %v2417_v19  ;;  %v527_v45 = vsel %vm463_vm10, %v431_v20, %v495_v54  ;;  %v924_v29 = vmul.f32 %v2910_v30, %v2439_v40  ;;  %v3890_v20 = vld [vmem:[#allocation7_spill] sm:$0xff] }
  0x7f   : > { %v1046_v16 = vadd.f32 %v1014_v24, %v949_v0  ;;  %559 = vst.msk [vmem:[#allocation2 + $0x109] sm:$0xff] %vm329_vm2, %v526_v1  ;;  %v759_v14 = vadd.f32 %v727_v28, %v630_v59  ;;  %v1443_v52 = vadd.f32 %v1411_v4, %v1346_v50  ;;  %v1334_v60 = vadd.f32 %v1302_v23, %v1237_v2  ;;  %v3889_v24 = vld [vmem:[#allocation3_spill] sm:$0xff]  ;;  %v3891_v23 = vld [vmem:[#allocation9_spill] sm:$0xff] }
  0x80   : > { %560 = vst.msk [vmem:[#allocation2 + $0x111] sm:$0xff] %vm329_vm2, %v527_v45  ;;  %v1021_v8 = vmul.f32 %v2912_v38, %v2441_v41  ;;  %v1118_v11 = vmul.f32 %v2918_v34, %v2450_v46  ;;  %v401_v22 = vmul.f32 %v3889_v24, %v365_v57  ;;  %v435_v36 = vadd.f32 %v3886_v42, %v3890_v20  ;;  %v3895_v24 = vld [vmem:[#allocation10_spill] sm:$0xff] }
  0x81   : > { %2217 = vmatmul.msk.f32.gmra.mxu0 %vm329_vm2, %v2996_v44  ;;  %v1143_v61 = vadd.f32 %v1111_v3, %v1046_v16  ;;  %v856_v49 = vadd.f32 %v824_v47, %v759_v14  ;;  %2230 = vmatmul.msk.f32.gmra.mxu2 %vm329_vm2, %v1443_v52  ;;  %v1431_v4 = vadd.f32 %v1399_v37, %v1334_v60  ;;  %vm464_vm11 = vcmp.ge.f32.partialorder %v3892_v48, 0.0  ;;  %v3894_v3 = vld [vmem:[#allocation13_spill] sm:$0xff] }
  0x82   : > { %v436_v9 = vadd.f32 %v3886_v42, %v3891_v23  ;;  %vm465_vm12 = vcmp.ge.f32.partialorder %v3893_v43, 0.0  ;;  %v437_v44 = vadd.f32 %v3886_v42, %v401_v22  ;;  %vm466_vm13 = vcmp.ge.f32.partialorder %v3894_v3, 0.0 }
  0x83   : > { %v1243_v59 = vadd.f32 %v1211_v35, %v1143_v61  ;;  %v956_v0 = vadd.f32 %v924_v29, %v856_v49  ;;  %vm467_vm14 = vcmp.ge.f32.partialorder %v435_v36, 0.0  ;;  %v496_v54 = vmul.f32 0.1, %v3892_v48 }
  0x84   : > { %vm468_vm15 = vcmp.ge.f32.partialorder %v436_v9, 0.0  ;;  %v497_v28 = vmul.f32 0.1, %v3893_v43  ;;  %vm469_vm0 = vcmp.ge.f32.partialorder %v437_v44, 0.0  ;;  %v498_v2 = vmul.f32 0.1, %v3894_v3 }
  0x85   : > { %v1340_v37 = vadd.f32 %v1308_v32, %v1243_v59  ;;  %v1053_v50 = vadd.f32 %v1021_v8, %v956_v0  ;;  %v499_v35 = vmul.f32 0.1, %v435_v36  ;;  %v500_v57 = vmul.f32 0.1, %v436_v9 }
  0x86   : > { %v3086_v1 = vld [vmem:[#allocation2 + $0x108] sm:$0xff]  ;;  %v528_v42 = vsel %vm464_vm11, %v3892_v48, %v496_v54  ;;  %v529_v16 = vsel %vm465_vm12, %v3893_v43, %v497_v28  ;;  %v501_v8 = vmul.f32 0.1, %v437_v44  ;;  %v530_v61 = vsel %vm466_vm13, %v3894_v3, %v498_v2 }
  0x87   : > { %v3088_v47 = vld [vmem:[#allocation2 + $0x109] sm:$0xff]  ;;  %v1437_v45 = vadd.f32 %v1405_v18, %v1340_v37  ;;  %v1150_v32 = vadd.f32 %v1118_v11, %v1053_v50  ;;  %v1218_v14 = vmul.f32 %v3086_v1, %v2456_v51  ;;  %561 = vst.msk [vmem:[#allocation2 + $0x121] sm:$0xff] %vm329_vm2, %v528_v42  ;;  %v531_v18 = vsel %vm467_vm14, %v435_v36, %v499_v35  ;;  %v3899_v37 = vld [vmem:[#allocation21_spill] sm:$0xff] }
  0x88   : > { %v1315_v29 = vmul.f32 %v3088_v47, %v2464_v55  ;;  %v3100_v52 = vld [vmem:[#allocation2 + $0x10a] sm:$0xff]  ;;  %562 = vst.msk [vmem:[#allocation2 + $0x129] sm:$0xff] %vm329_vm2, %v529_v16  ;;  %v532_v49 = vsel %vm468_vm15, %v436_v9, %v500_v57  ;;  %v618_v22 = vmul.f32 %v3895_v24, %v2405_v13  ;;  %v533_v20 = vsel %vm469_vm0, %v437_v44, %v501_v8  ;;  %v3901_v42 = vld [vmem:[#allocation33_spill] sm:$0xff] }
  0x89   : > { %v1412_v60 = vmul.f32 %v3100_v52, %v2470_v58  ;;  %2218 = vmatmul.msk.f32.gmra.mxu0 %vm329_vm2, %v1431_v4  ;;  %2224 = vmatmul.msk.f32.gmra.mxu1 %vm329_vm2, %v1437_v45  ;;  %v1250_v11 = vadd.f32 %v1218_v14, %v1150_v32  ;;  %563 = vst.msk [vmem:[#allocation2 + $0x139] sm:$0xff] %vm329_vm2, %v530_v61  ;;  %v3896_v36 = vld [vmem:[#allocation11_spill] sm:$0xff]  ;;  %v3897_v44 = vld [vmem:[#allocation18_spill] sm:$0xff]  ;;  %v3904_v8 = vld [vmem:[#allocation29_spill] sm:$0xff] }
  0x8a   : > { %564 = vst.msk [vmem:[#allocation2 + $0x141] sm:$0xff] %vm329_vm2, %v531_v18  ;;  %v715_v23 = vmul.f32 %v3896_v36, %v2412_v17  ;;  %v812_v4 = vmul.f32 %v2768_v27, %v2417_v19  ;;  %v912_v9 = vmul.f32 %v2439_v40, %v2785_v6  ;;  %v1009_v43 = vmul.f32 %v2441_v41, %v2787_v62  ;;  %v3898_v27 = vld [vmem:[#allocation19_spill] sm:$0xff] }
  0x8b   : > { %v1347_v48 = vadd.f32 %v1315_v29, %v1250_v11  ;;  %565 = vst.msk [vmem:[#allocation2 + $0x151] sm:$0xff] %vm329_vm2, %v532_v49  ;;  %v1106_v59 = vmul.f32 %v2450_v46, %v2802_v21  ;;  %v1206_v3 = vmul.f32 %v3897_v44, %v2456_v51  ;;  %v3134_v54 = vmul.f32 %v3898_v27, %v2464_v55  ;;  %v3903_v32 = vld [vmem:[#allocation35_spill] sm:$0xff] }
  0x8c   : > { %566 = vst.msk [vmem:[#allocation2 + $0x159] sm:$0xff] %vm329_vm2, %v533_v20  ;;  %v747_v0 = vadd.f32 %v715_v23, %v618_v22  ;;  %v624_v28 = vmul.f32 %v2841_v63, %v2405_v13  ;;  %v3140_v62 = vmul.f32 %v3899_v37, %v2470_v58  ;;  %v721_v21 = vmul.f32 %v2843_v53, %v2412_v17  ;;  %v3902_v63 = vld [vmem:[#allocation34_spill] sm:$0xff]  ;;  %v3908_v44 = vld [vmem:[#allocation31_spill] sm:$0xff] }
  0x8d   : > { %v1444_v6 = vadd.f32 %v1412_v60, %v1347_v48  ;;  %v818_v50 = vmul.f32 %v2857_v25, %v2417_v19  ;;  %v918_v16 = vmul.f32 %v3901_v42, %v2439_v40  ;;  %v1015_v45 = vmul.f32 %v3902_v63, %v2441_v41  ;;  %v3907_v22 = vld [vmem:[#allocation30_spill] sm:$0xff] }
  0x8e   : > { %v3146_v2 = vld [vmem:[#allocation2 + $0x120] sm:$0xff]  ;;  %v844_v57 = vadd.f32 %v812_v4, %v747_v0  ;;  %v1112_v14 = vmul.f32 %v3903_v32, %v2450_v46  ;;  %v753_v60 = vadd.f32 %v721_v21, %v624_v28  ;;  %v1212_v61 = vmul.f32 %v2456_v51, %v3904_v8 }
  0x8f   : > { %v3148_v35 = vld [vmem:[#allocation2 + $0x121] sm:$0xff]  ;;  %2231 = vmatmul.msk.f32.gmra.mxu2 %vm329_vm2, %v1444_v6  ;;  %v636_v53 = vmul.f32 %v2405_v13, %v3146_v2  ;;  %v1309_v20 = vmul.f32 %v2464_v55, %v3907_v22  ;;  %v631_v36 = vmul.f32 %v2970_v33, %v2405_v13  ;;  %v1406_v27 = vmul.f32 %v2470_v58, %v3908_v44  ;;  %v3197_v22 = vld [vmem:[#allocation2 + $0x110] sm:$0xff] }
  0x90   : > { %3900 = vst [vmem:[#allocation27_spill] sm:$0xff] %v3148_v35  ;;  %v733_v25 = vmul.f32 %v2412_v17, %v3148_v35  ;;  %v3161_v29 = vld [vmem:[#allocation2 + $0x122] sm:$0xff]  ;;  %v3167_v11 = vld [vmem:[#allocation2 + $0x138] sm:$0xff]  ;;  %v944_v24 = vadd.f32 %v912_v9, %v844_v57  ;;  %v850_v0 = vadd.f32 %v818_v50, %v753_v60  ;;  %v728_v21 = vmul.f32 %v2972_v7, %v2412_v17  ;;  %v3213_v63 = vld [vmem:[#allocation2 + $0x12a] sm:$0xff] }
  0x91   : > { %v830_v18 = vmul.f32 %v2417_v19, %v3161_v29  ;;  %3905 = vst [vmem:[#allocation28_spill] sm:$0xff] %v3167_v11  ;;  %v3169_v49 = vld [vmem:[#allocation2 + $0x139] sm:$0xff]  ;;  %v930_v4 = vmul.f32 %v3167_v11, %v2439_v40  ;;  %v825_v57 = vmul.f32 %v2978_v26, %v2417_v19  ;;  %v925_v26 = vmul.f32 %v2980_v56, %v2439_v40 }
  0x92   : > { %3906 = vst [vmem:[#allocation8_spill] sm:$0xff] %v3169_v49  ;;  %v765_v23 = vadd.f32 %v733_v25, %v636_v53  ;;  %v3177_v48 = vld [vmem:[#allocation2 + $0x13a] sm:$0xff]  ;;  %v1027_v28 = vmul.f32 %v3169_v49, %v2441_v41  ;;  %v3183_v9 = vld [vmem:[#allocation2 + $0x150] sm:$0xff]  ;;  %v1041_v37 = vadd.f32 %v1009_v43, %v944_v24  ;;  %v950_v8 = vadd.f32 %v918_v16, %v850_v0 }
  0x93   : > { %v3185_v6 = vld [vmem:[#allocation2 + $0x151] sm:$0xff]  ;;  %v1124_v50 = vmul.f32 %v3177_v48, %v2450_v46  ;;  %v1224_v25 = vmul.f32 %v3183_v9, %v2456_v51  ;;  %3909 = vst [vmem:[#allocation4_spill] sm:$0xff] %v3197_v22  ;;  %v760_v44 = vadd.f32 %v728_v21, %v631_v36  ;;  %v1022_v16 = vmul.f32 %v2986_v12, %v2441_v41  ;;  %v3211_v0 = vld [vmem:[#allocation2 + $0x129] sm:$0xff] }
  0x94   : > { %v862_v53 = vadd.f32 %v830_v18, %v765_v23  ;;  %v3195_v60 = vld [vmem:[#allocation2 + $0x152] sm:$0xff]  ;;  %v1321_v43 = vmul.f32 %v3185_v6, %v2464_v55  ;;  %v1138_v24 = vadd.f32 %v1106_v59, %v1041_v37  ;;  %v3205_v23 = vld [vmem:[#allocation2 + $0x128] sm:$0xff]  ;;  %v1047_v32 = vadd.f32 %v1015_v45, %v950_v8  ;;  %3912 = vst [vmem:[#allocation3_spill] sm:$0xff] %v3211_v0 }
  0x95   : > { %v3203_v18 = vld [vmem:[#allocation2 + $0x111] sm:$0xff]  ;;  %3911 = vst [vmem:[#allocation32_spill] sm:$0xff] %v3205_v23  ;;  %v1418_v33 = vmul.f32 %v3195_v60, %v2470_v58  ;;  %v857_v36 = vadd.f32 %v825_v57, %v760_v44  ;;  %v1119_v37 = vmul.f32 %v2988_v5, %v2450_v46  ;;  %v1219_v21 = vmul.f32 %v3197_v22, %v2456_v51  ;;  %v3234_v5 = vld [vmem:[#allocation2 + $0x142] sm:$0xff] }
  0x96   : > { %3910 = vst [vmem:[#allocation5_spill] sm:$0xff] %v3203_v18  ;;  %v962_v7 = vadd.f32 %v930_v4, %v862_v53  ;;  %v1238_v59 = vadd.f32 %v1206_v3, %v1138_v24  ;;  %v3219_v4 = vld [vmem:[#allocation2 + $0x112] sm:$0xff]  ;;  %v3221_v53 = vld [vmem:[#allocation2 + $0x140] sm:$0xff]  ;;  %v1144_v8 = vadd.f32 %v1112_v14, %v1047_v32  ;;  %v1316_v12 = vmul.f32 %v3203_v18, %v2464_v55 }
  0x97   : > { %3913 = vst [vmem:[#allocation7_spill] sm:$0xff] %v3213_v63  ;;  %v637_v56 = vmul.f32 %v2405_v13, %v3205_v23  ;;  %v3227_v3 = vld [vmem:[#allocation2 + $0x141] sm:$0xff]  ;;  %v957_v24 = vadd.f32 %v925_v26, %v857_v36  ;;  %v734_v44 = vmul.f32 %v2412_v17, %v3211_v0  ;;  %v831_v22 = vmul.f32 %v2417_v19, %v3213_v63 }
  0x98   : > { %3914 = vst [vmem:[#allocation9_spill] sm:$0xff] %v3219_v4  ;;  %v1059_v45 = vadd.f32 %v1027_v28, %v962_v7  ;;  %v1335_v57 = vadd.f32 %v3134_v54, %v1238_v59  ;;  %v3236_v7 = vld [vmem:[#allocation2 + $0x158] sm:$0xff]  ;;  %v1244_v14 = vadd.f32 %v1212_v61, %v1144_v8  ;;  %v1413_v28 = vmul.f32 %v3219_v4, %v2470_v58 }
  0x99   : > { %3915 = vst [vmem:[#allocation6_spill] sm:$0xff] %v3221_v53  ;;  %v931_v23 = vmul.f32 %v3221_v53, %v2439_v40  ;;  %v3242_v54 = vld [vmem:[#allocation2 + $0x159] sm:$0xff]  ;;  %v1054_v59 = vadd.f32 %v1022_v16, %v957_v24  ;;  %v766_v36 = vadd.f32 %v734_v44, %v637_v56  ;;  %v1028_v63 = vmul.f32 %v3227_v3, %v2441_v41  ;;  %v3918_v16 = vld [vmem:[#allocation14_spill] sm:$0xff]  ;;  %v3919_v24 = vld [vmem:[#allocation15_spill] sm:$0xff] }
  0x9a   : > { %3916 = vst [vmem:[#allocation12_spill] sm:$0xff] %v3227_v3  ;;  %v1156_v32 = vadd.f32 %v1124_v50, %v1059_v45  ;;  %v1432_v26 = vadd.f32 %v3140_v62, %v1335_v57  ;;  %v1341_v18 = vadd.f32 %v1309_v20, %v1244_v14  ;;  %v1125_v61 = vmul.f32 %v3234_v5, %v2450_v46  ;;  %v3251_v45 = vld [vmem:[#allocation2 + $0x15a] sm:$0xff] }
  0x9b   : > { %3917 = vst [vmem:[#allocation13_spill] sm:$0xff] %v3234_v5  ;;  %v1225_v50 = vmul.f32 %v3236_v7, %v2456_v51  ;;  %v1151_v8 = vadd.f32 %v1119_v37, %v1054_v59  ;;  %v863_v53 = vadd.f32 %v831_v22, %v766_v36  ;;  %v1322_v56 = vmul.f32 %v3242_v54, %v2464_v55  ;;  %v3920_v22 = vld [vmem:[#allocation16_spill] sm:$0xff] }
  0x9c   : > { %v1256_v0 = vadd.f32 %v1224_v25, %v1156_v32  ;;  %2219 = vmatmul.msk.f32.gmra.mxu0 %vm329_vm2, %v1432_v26  ;;  %v619_v62 = vmul.f32 %v2770_v39, %v2405_v13  ;;  %v1438_v20 = vadd.f32 %v1406_v27, %v1341_v18  ;;  %v716_v57 = vmul.f32 %v3918_v16, %v2412_v17  ;;  %v3922_v18 = vld [vmem:[#allocation20_spill] sm:$0xff] }
  0x9d   : > { %v813_v44 = vmul.f32 %v3919_v24, %v2417_v19  ;;  %v1251_v32 = vadd.f32 %v1219_v21, %v1151_v8  ;;  %v963_v14 = vadd.f32 %v931_v23, %v863_v53  ;;  %v1419_v37 = vmul.f32 %v3251_v45, %v2470_v58  ;;  %v3923_v23 = vld [vmem:[#allocation22_spill] sm:$0xff]  ;;  %v3924_v53 = vld [vmem:[#allocation23_spill] sm:$0xff] }
  0x9e   : > { %v1353_v25 = vadd.f32 %v1321_v43, %v1256_v0  ;;  %v913_v26 = vmul.f32 %v2439_v40, %v3920_v22  ;;  %2225 = vmatmul.msk.f32.gmra.mxu1 %vm329_vm2, %v1438_v20  ;;  %v748_v39 = vadd.f32 %v716_v57, %v619_v62  ;;  %v3921_v43 = vld [vmem:[#allocation17_spill] sm:$0xff]  ;;  %v1107_v0 = vmul.f32 %v2450_v46, %v3922_v18  ;;  %v3926_v20 = vld [vmem:[#allocation26_spill] sm:$0xff] }
  0x9f   : > { %v1010_v27 = vmul.f32 %v2441_v41, %v3921_v43  ;;  %v1348_v36 = vadd.f32 %v1316_v12, %v1251_v32  ;;  %v1060_v16 = vadd.f32 %v1028_v63, %v963_v14  ;;  %v1207_v21 = vmul.f32 %v3923_v23, %v2456_v51  ;;  %v3927_v32 = vld [vmem:[#allocation24_spill] sm:$0xff]  ;;  %v3928_v22 = vld [vmem:[#allocation45_spill] sm:$0xff] }
  0xa0   : > { %v1450_v59 = vadd.f32 %v1418_v33, %v1353_v25  ;;  %v1304_v8 = vmul.f32 %v3924_v53, %v2464_v55  ;;  %v845_v33 = vadd.f32 %v813_v44, %v748_v39  ;;  %v3925_v25 = vld [vmem:[#allocation25_spill] sm:$0xff]  ;;  %v722_v57 = vmul.f32 %v3926_v20, %v2412_v17 }
  0xa1   : > { %v625_v62 = vmul.f32 %v3925_v25, %v2405_v13  ;;  %v819_v24 = vmul.f32 %v3884_v10, %v2417_v19  ;;  %v1445_v12 = vadd.f32 %v1413_v28, %v1348_v36  ;;  %v1157_v63 = vadd.f32 %v1125_v61, %v1060_v16  ;;  %v3929_v28 = vld [vmem:[#allocation36_spill] sm:$0xff]  ;;  %v3930_v36 = vld [vmem:[#allocation37_spill] sm:$0xff] }
  0xa2   : > { %2237 = vmatmul.msk.f32.vlgmr.msra.gmra.mxu3 %vm329_vm2, %v1450_v59  ;;  %v1401_v14 = vmul.f32 %v3927_v32, %v2470_v58  ;;  %v919_v43 = vmul.f32 %v3928_v22, %v2439_v40  ;;  %v945_v59 = vadd.f32 %v913_v26, %v845_v33  ;;  %v1016_v39 = vmul.f32 %v3032_v31, %v2441_v41 }
  0xa3   : > { %v754_v44 = vadd.f32 %v722_v57, %v625_v62  ;;  %v1113_v18 = vmul.f32 %v3034_v15, %v2450_v46  ;;  %2232 = vmatmul.msk.f32.gmra.mxu2 %vm329_vm2, %v1445_v12  ;;  %v1257_v10 = vadd.f32 %v1225_v50, %v1157_v63  ;;  %v1213_v61 = vmul.f32 %v2456_v51, %v3929_v28  ;;  %v366_v62 = vld [vmem:[%s2383_s8 + $0xe0] sm:$0xff]  ;;  %v3931_v50 = vld [vmem:[#allocation38_spill] sm:$0xff] }
  0xa4   : > { %v1310_v16 = vmul.f32 %v2464_v55, %v3930_v36  ;;  %v632_v26 = vmul.f32 %v2910_v30, %v2405_v13  ;;  %v1042_v23 = vadd.f32 %v1010_v27, %v945_v59  ;;  %v729_v33 = vmul.f32 %v2912_v38, %v2412_v17  ;;  %v367_v30 = vld [vmem:[%s2383_s8 + $0xe8] sm:$0xff] }
  0xa5   : > { %v851_v53 = vadd.f32 %v819_v24, %v754_v44  ;;  %v826_v25 = vmul.f32 %v2918_v34, %v2417_v19  ;;  %v1354_v20 = vadd.f32 %v1322_v56, %v1257_v10  ;;  %v1407_v57 = vmul.f32 %v2470_v58, %v3931_v50  ;;  %v3318_v44 = vld [vmem:[%s3753_s1] ss:$0 sm:$0xff] }
  0xa6   : > { %v926_v12 = vmul.f32 %v3086_v1, %v2439_v40  ;;  %v1023_v63 = vmul.f32 %v3088_v47, %v2441_v41  ;;  %v1139_v27 = vadd.f32 %v1107_v0, %v1042_v23  ;;  %v761_v32 = vadd.f32 %v729_v33, %v632_v26  ;;  %3932 = vst [vmem:[#allocation10_spill] sm:$0xff] %v3318_v44 }
  0xa7   : > { %v951_v24 = vadd.f32 %v919_v43, %v851_v53  ;;  %v1120_v38 = vmul.f32 %v3100_v52, %v2450_v46  ;;  %v1451_v59 = vadd.f32 %v1419_v37, %v1354_v20  ;;  %v1220_v34 = vmul.f32 %v2456_v51, %v3146_v2  ;;  %v3326_v37 = vld [vmem:[%s3754_s2] ss:$0 sm:$0xff] }
  0xa8   : > { %v1317_v56 = vmul.f32 %v2464_v55, %v3148_v35  ;;  %v402_v10 = vmul.f32 %v3318_v44, %v366_v62  ;;  %v1239_v0 = vadd.f32 %v1207_v21, %v1139_v27  ;;  %v858_v26 = vadd.f32 %v826_v25, %v761_v32 }
  0xa9   : > { %v1048_v43 = vadd.f32 %v1016_v39, %v951_v24  ;;  %v403_v23 = vmul.f32 %v3318_v44, %v367_v30  ;;  %v638_v33 = vmul.f32 %v3167_v11, %v2405_v13  ;;  %v735_v62 = vmul.f32 %v3169_v49, %v2412_v17 }
  0xaa   : > { %2238 = vmatmul.msk.f32.gmra.mxu3 %vm329_vm2, %v1451_v59  ;;  %v438_v53 = vadd.f32 %v3326_v37, %v402_v10  ;;  %v832_v21 = vmul.f32 %v3177_v48, %v2417_v19  ;;  %v1336_v39 = vadd.f32 %v1304_v8, %v1239_v0  ;;  %v958_v20 = vadd.f32 %v926_v12, %v858_v26 }
  0xab   : > { %v1145_v25 = vadd.f32 %v1113_v18, %v1048_v43  ;;  %v439_v30 = vadd.f32 %v3326_v37, %v403_v23  ;;  %v767_v24 = vadd.f32 %v735_v62, %v638_v33  ;;  %v932_v32 = vmul.f32 %v3183_v9, %v2439_v40  ;;  %v2034_v43 = vld [vmem:[#allocation2 + $0xc0] sm:$0xff]  ;;  %v3933_v23 = vld [vmem:[#allocation34_spill] sm:$0xff]  ;;  %v2130_v62 = vld [vmem:[#allocation2 + $0xd8] sm:$0xff] }
  0xac   : > { %vm470_vm3 = vcmp.ge.f32.partialorder %v438_v53, 0.0  ;;  %v502_v27 = vmul.f32 0.1, %v438_v53  ;;  %v1433_v59 = vadd.f32 %v1401_v14, %v1336_v39  ;;  %v1055_v44 = vadd.f32 %v1023_v63, %v958_v20  ;;  %v2066_v14 = vld [vmem:[#allocation2 + $0xc1] sm:$0xff] }
  0xad   : > { %v1245_v10 = vadd.f32 %v1213_v61, %v1145_v25  ;;  %vm471_vm4 = vcmp.ge.f32.partialorder %v439_v30, 0.0  ;;  %v503_v11 = vmul.f32 0.1, %v439_v30  ;;  %v864_v35 = vadd.f32 %v832_v21, %v767_v24  ;;  %v2098_v33 = vld [vmem:[#allocation2 + $0xc2] sm:$0xff]  ;;  %v2162_v21 = vld [vmem:[#allocation2 + $0xd9] sm:$0xff] }
  0xae   : > { %v534_v49 = vsel %vm470_vm3, %v438_v53, %v502_v27  ;;  %v1029_v8 = vmul.f32 %v3185_v6, %v2441_v41  ;;  %2220 = vmatmul.msk.f32.gmra.mxu0 %vm329_vm2, %v1433_v59  ;;  %v1152_v12 = vadd.f32 %v1120_v38, %v1055_v44  ;;  %v1414_v0 = vmul.f32 %v2470_v58, %v3161_v29  ;;  %v3934_v44 = vld [vmem:[#allocation35_spill] sm:$0xff]  ;;  %v3935_v59 = vld [vmem:[#allocation42_spill] sm:$0xff] }
  0xaf   : > { %v1342_v18 = vadd.f32 %v1310_v16, %v1245_v10  ;;  %567 = vst.msk [vmem:[#allocation2 + $0x169] sm:$0xff] %vm329_vm2, %v534_v49  ;;  %v535_v61 = vsel %vm471_vm4, %v439_v30, %v503_v11  ;;  %v964_v63 = vadd.f32 %v932_v32, %v864_v35  ;;  %v626_v26 = vmul.f32 %v3901_v42, %v2405_v13  ;;  %v2194_v35 = vld [vmem:[#allocation2 + $0xda] sm:$0xff] }
  0xb0   : > { %v723_v53 = vmul.f32 %v3933_v23, %v2412_v17  ;;  %v1252_v38 = vadd.f32 %v1220_v34, %v1152_v12  ;;  %568 = vst.msk [vmem:[#allocation2 + $0x171] sm:$0xff] %vm329_vm2, %v535_v61  ;;  %v1126_v49 = vmul.f32 %v3195_v60, %v2450_v46  ;;  %v820_v11 = vmul.f32 %v3934_v44, %v2417_v19  ;;  %v3938_v61 = vld [vmem:[#allocation4_spill] sm:$0xff] }
  0xb1   : > { %v1439_v16 = vadd.f32 %v1407_v57, %v1342_v18  ;;  %v1061_v39 = vadd.f32 %v1029_v8, %v964_v63  ;;  %v920_v42 = vmul.f32 %v2034_v43, %v2439_v40  ;;  %v1017_v20 = vmul.f32 %v2066_v14, %v2441_v41  ;;  %v3936_v8 = vld [vmem:[#allocation43_spill] sm:$0xff]  ;;  %v3937_v14 = vld [vmem:[#allocation44_spill] sm:$0xff] }
  0xb2   : > { %v755_v25 = vadd.f32 %v723_v53, %v626_v26  ;;  %v1349_v30 = vadd.f32 %v1317_v56, %v1252_v38  ;;  %v1114_v57 = vmul.f32 %v2098_v33, %v2450_v46  ;;  %v1214_v34 = vmul.f32 %v2130_v62, %v2456_v51  ;;  %v3939_v62 = vld [vmem:[#allocation5_spill] sm:$0xff] }
  0xb3   : > { %2226 = vmatmul.msk.f32.gmra.mxu1 %vm329_vm2, %v1439_v16  ;;  %v1311_v27 = vmul.f32 %v2162_v21, %v2464_v55  ;;  %v1408_v32 = vmul.f32 %v2194_v35, %v2470_v58  ;;  %v633_v10 = vmul.f32 %v3935_v59, %v2405_v13  ;;  %v730_v18 = vmul.f32 %v3936_v8, %v2412_v17 }
  0xb4   : > { %v852_v24 = vadd.f32 %v820_v11, %v755_v25  ;;  %v1446_v12 = vadd.f32 %v1414_v0, %v1349_v30  ;;  %v1158_v43 = vadd.f32 %v1126_v49, %v1061_v39  ;;  %v827_v56 = vmul.f32 %v3937_v14, %v2417_v19  ;;  %v3940_v49 = vld [vmem:[#allocation32_spill] sm:$0xff]  ;;  %v3941_v11 = vld [vmem:[#allocation3_spill] sm:$0xff]  ;;  %v3942_v30 = vld [vmem:[#allocation6_spill] sm:$0xff] }
  0xb5   : > { %v927_v63 = vmul.f32 %v3938_v61, %v2439_v40  ;;  %v762_v33 = vadd.f32 %v730_v18, %v633_v10  ;;  %v1024_v21 = vmul.f32 %v3939_v62, %v2441_v41  ;;  %v1121_v16 = vmul.f32 %v3219_v4, %v2450_v46 }
  0xb6   : > { %v3368_v26 = vld [vmem:[#allocation2 + $0x168] sm:$0xff]  ;;  %v952_v53 = vadd.f32 %v920_v42, %v852_v24  ;;  %2233 = vmatmul.msk.f32.gmra.mxu2 %vm329_vm2, %v1446_v12  ;;  %v1221_v44 = vmul.f32 %v2456_v51, %v3940_v49  ;;  %v1318_v35 = vmul.f32 %v2464_v55, %v3941_v11  ;;  %v639_v24 = vmul.f32 %v3942_v30, %v2405_v13  ;;  %v3944_v12 = vld [vmem:[#allocation7_spill] sm:$0xff] }
  0xb7   : > { %v3370_v23 = vld [vmem:[#allocation2 + $0x169] sm:$0xff]  ;;  %v1226_v0 = vmul.f32 %v3368_v26, %v2456_v51  ;;  %v859_v42 = vadd.f32 %v827_v56, %v762_v33  ;;  %v736_v59 = vmul.f32 %v3227_v3, %v2412_v17  ;;  %v1415_v14 = vmul.f32 %v2470_v58, %v3944_v12  ;;  %v3409_v49 = vld [vmem:[#allocation2 + $0x172] sm:$0xff] }
  0xb8   : > { %v1323_v38 = vmul.f32 %v3370_v23, %v2464_v55  ;;  %v3385_v39 = vld [vmem:[#allocation2 + $0x16a] sm:$0xff]  ;;  %v1049_v25 = vadd.f32 %v1017_v20, %v952_v53  ;;  %v833_v11 = vmul.f32 %v3234_v5, %v2417_v19  ;;  %v933_v3 = vmul.f32 %v3236_v7, %v2439_v40 }
  0xb9   : > { %v3391_v10 = vld [vmem:[#allocation2 + $0x170] sm:$0xff]  ;;  %v1258_v8 = vadd.f32 %v1226_v0, %v1158_v43  ;;  %v1420_v18 = vmul.f32 %v3385_v39, %v2470_v58  ;;  %v959_v53 = vadd.f32 %v927_v63, %v859_v42  ;;  %v768_v33 = vadd.f32 %v736_v59, %v639_v24 }
  0xba   : > { %3943 = vst [vmem:[#allocation11_spill] sm:$0xff] %v3391_v10  ;;  %v3399_v20 = vld [vmem:[#allocation2 + $0x171] sm:$0xff]  ;;  %v1146_v56 = vadd.f32 %v1114_v57, %v1049_v25  ;;  %v1030_v43 = vmul.f32 %v3242_v54, %v2441_v41  ;;  %v1127_v0 = vmul.f32 %v3251_v45, %v2450_v46  ;;  %v1227_v12 = vmul.f32 %v3391_v10, %v2456_v51 }
  0xbb   : > { %v1355_v30 = vadd.f32 %v1323_v38, %v1258_v8  ;;  %v1056_v4 = vadd.f32 %v1024_v21, %v959_v53  ;;  %v865_v57 = vadd.f32 %v833_v11, %v768_v33  ;;  %v1324_v63 = vmul.f32 %v3399_v20, %v2464_v55  ;;  %v368_v53 = vld [vmem:[%s2383_s8 + $0xf0] sm:$0xff] }
  0xbc   : > { %v1246_v5 = vadd.f32 %v1214_v34, %v1146_v56  ;;  %v627_v38 = vmul.f32 %v3928_v22, %v2405_v13  ;;  %v724_v42 = vmul.f32 %v3032_v31, %v2412_v17  ;;  %v821_v24 = vmul.f32 %v3034_v15, %v2417_v19 }
  0xbd   : > { %v1452_v25 = vadd.f32 %v1420_v18, %v1355_v30  ;;  %v1153_v8 = vadd.f32 %v1121_v16, %v1056_v4  ;;  %v965_v10 = vadd.f32 %v933_v3, %v865_v57  ;;  %v1421_v34 = vmul.f32 %v3409_v49, %v2470_v58  ;;  %v3945_v3 = vld [vmem:[#allocation39_spill] sm:$0xff]  ;;  %v3946_v30 = vld [vmem:[#allocation40_spill] sm:$0xff] }
  0xbe   : > { %v1343_v59 = vadd.f32 %v1311_v27, %v1246_v5  ;;  %v756_v21 = vadd.f32 %v724_v42, %v627_v38  ;;  %v921_v11 = vmul.f32 %v2439_v40, %v3929_v28  ;;  %v1018_v22 = vmul.f32 %v2441_v41, %v3930_v36 }
  0xbf   : > { %2239 = vmatmul.msk.f32.gmra.mxu3 %vm329_vm2, %v1452_v25  ;;  %v1115_v31 = vmul.f32 %v2450_v46, %v3931_v50  ;;  %v1253_v5 = vadd.f32 %v1221_v44, %v1153_v8  ;;  %v1062_v4 = vadd.f32 %v1030_v43, %v965_v10  ;;  %v1215_v27 = vmul.f32 %v3945_v3, %v2456_v51  ;;  %v3947_v44 = vld [vmem:[#allocation41_spill] sm:$0xff]  ;;  %v3950_v8 = vld [vmem:[#allocation8_spill] sm:$0xff] }
  0xc0   : > { %v1440_v15 = vadd.f32 %v1408_v32, %v1343_v59  ;;  %v853_v16 = vadd.f32 %v821_v24, %v756_v21  ;;  %v1312_v18 = vmul.f32 %v3946_v30, %v2464_v55  ;;  %v634_v28 = vmul.f32 %v3086_v1, %v2405_v13  ;;  %v3948_v1 = vld [vmem:[#allocation27_spill] sm:$0xff] }
  0xc1   : > { %v731_v36 = vmul.f32 %v3088_v47, %v2412_v17  ;;  %v1350_v50 = vadd.f32 %v1318_v35, %v1253_v5  ;;  %v1159_v32 = vadd.f32 %v1127_v0, %v1062_v4  ;;  %v1409_v10 = vmul.f32 %v3947_v44, %v2470_v58  ;;  %v369_v47 = vld [vmem:[%s2383_s8 + $0xf8] sm:$0xff] }
  0xc2   : > { %2227 = vmatmul.msk.f32.gmra.mxu1 %vm329_vm2, %v1440_v15  ;;  %v828_v56 = vmul.f32 %v3100_v52, %v2417_v19  ;;  %v953_v33 = vadd.f32 %v921_v11, %v853_v16  ;;  %v928_v57 = vmul.f32 %v2439_v40, %v3146_v2  ;;  %v1025_v25 = vmul.f32 %v2441_v41, %v3948_v1  ;;  %v3949_v0 = vld [vmem:[#allocation28_spill] sm:$0xff]  ;;  %v3951_v11 = vld [vmem:[#allocation10_spill] sm:$0xff] }
  0xc3   : > { %v763_v43 = vadd.f32 %v731_v36, %v634_v28  ;;  %v1447_v38 = vadd.f32 %v1415_v14, %v1350_v50  ;;  %v1259_v42 = vadd.f32 %v1227_v12, %v1159_v32  ;;  %v1122_v35 = vmul.f32 %v2450_v46, %v3161_v29 }
  0xc4   : > { %v1222_v24 = vmul.f32 %v3949_v0, %v2456_v51  ;;  %v1050_v59 = vadd.f32 %v1018_v22, %v953_v33  ;;  %v1319_v21 = vmul.f32 %v3950_v8, %v2464_v55  ;;  %v404_v15 = vmul.f32 %v3951_v11, %v368_v53  ;;  %v3955_v8 = vld [vmem:[#allocation7_spill] sm:$0xff] }
  0xc5   : > { %v860_v52 = vadd.f32 %v828_v56, %v763_v43  ;;  %2234 = vmatmul.msk.f32.gmra.mxu2 %vm329_vm2, %v1447_v38  ;;  %v1356_v2 = vadd.f32 %v1324_v63, %v1259_v42  ;;  %v405_v5 = vmul.f32 %v3951_v11, %v369_v47  ;;  %v640_v12 = vmul.f32 %v3183_v9, %v2405_v13  ;;  %v3953_v38 = vld [vmem:[#allocation32_spill] sm:$0xff] }
  0xc6   : > { %v737_v29 = vmul.f32 %v3185_v6, %v2412_v17  ;;  %v1147_v14 = vadd.f32 %v1115_v31, %v1050_v59  ;;  %v440_v22 = vadd.f32 %v3326_v37, %v404_v15  ;;  %v834_v3 = vmul.f32 %v3195_v60, %v2417_v19 }
  0xc7   : > { %v960_v4 = vadd.f32 %v928_v57, %v860_v52  ;;  %v1453_v16 = vadd.f32 %v1421_v34, %v1356_v2  ;;  %v441_v30 = vadd.f32 %v3326_v37, %v405_v5  ;;  %v934_v63 = vmul.f32 %v3368_v26, %v2439_v40  ;;  %v3956_v5 = vld [vmem:[#allocation11_spill] sm:$0xff] }
  0xc8   : > { %v769_v28 = vadd.f32 %v737_v29, %v640_v12  ;;  %v1247_v36 = vadd.f32 %v1215_v27, %v1147_v14  ;;  %vm472_vm5 = vcmp.ge.f32.partialorder %v440_v22, 0.0  ;;  %v504_v9 = vmul.f32 0.1, %v440_v22  ;;  %v3957_v14 = vld [vmem:[#allocation6_spill] sm:$0xff] }
  0xc9   : > { %v1057_v50 = vadd.f32 %v1025_v25, %v960_v4  ;;  %2240 = vmatmul.msk.f32.gmra.mxu3 %vm329_vm2, %v1453_v16  ;;  %vm473_vm1 = vcmp.ge.f32.partialorder %v441_v30, 0.0  ;;  %v505_v6 = vmul.f32 0.1, %v441_v30  ;;  %v1031_v32 = vmul.f32 %v3370_v23, %v2441_v41 }
  0xca   : > { %v866_v31 = vadd.f32 %v834_v3, %v769_v28  ;;  %v1344_v60 = vadd.f32 %v1312_v18, %v1247_v36  ;;  %v1416_v37 = vmul.f32 %v3177_v48, %v2470_v58  ;;  %v536_v44 = vsel %vm472_vm5, %v440_v22, %v504_v9  ;;  %v3952_v48 = vld [vmem:[#allocation9_spill] sm:$0xff] }
  0xcb   : > { %v1154_v34 = vadd.f32 %v1122_v35, %v1057_v50  ;;  %v537_v56 = vsel %vm473_vm1, %v441_v30, %v505_v6  ;;  %569 = vst.msk [vmem:[#allocation2 + $0x181] sm:$0xff] %vm329_vm2, %v536_v44  ;;  %v635_v53 = vmul.f32 %v3938_v61, %v2405_v13  ;;  %v732_v33 = vmul.f32 %v3939_v62, %v2412_v17  ;;  %v3954_v62 = vld [vmem:[#allocation3_spill] sm:$0xff]  ;;  %v3958_v50 = vld [vmem:[#allocation12_spill] sm:$0xff]  ;;  %v3959_v6 = vld [vmem:[#allocation13_spill] sm:$0xff] }
  0xcc   : > { %v966_v27 = vadd.f32 %v934_v63, %v866_v31  ;;  %v1441_v43 = vadd.f32 %v1409_v10, %v1344_v60  ;;  %570 = vst.msk [vmem:[#allocation2 + $0x189] sm:$0xff] %vm329_vm2, %v537_v56  ;;  %v1128_v18 = vmul.f32 %v3385_v39, %v2450_v46  ;;  %v829_v1 = vmul.f32 %v3952_v48, %v2417_v19 }
  0xcd   : > { %v1254_v57 = vadd.f32 %v1222_v24, %v1154_v34  ;;  %v764_v47 = vadd.f32 %v732_v33, %v635_v53  ;;  %v929_v42 = vmul.f32 %v2439_v40, %v3953_v38  ;;  %v1026_v10 = vmul.f32 %v2441_v41, %v3954_v62 }
  0xce   : > { %v1063_v25 = vadd.f32 %v1031_v32, %v966_v27  ;;  %2228 = vmatmul.msk.f32.gmra.mxu1 %vm329_vm2, %v1441_v43  ;;  %v641_v0 = vmul.f32 %v3236_v7, %v2405_v13  ;;  %v738_v24 = vmul.f32 %v3242_v54, %v2412_v17  ;;  %v1123_v11 = vmul.f32 %v2450_v46, %v3955_v8 }
  0xcf   : > { %v1351_v61 = vadd.f32 %v1319_v21, %v1254_v57  ;;  %v861_v35 = vadd.f32 %v829_v1, %v764_v47  ;;  %v835_v15 = vmul.f32 %v3251_v45, %v2417_v19  ;;  %v935_v12 = vmul.f32 %v3956_v5, %v2439_v40  ;;  %v2146_v47 = vld [vmem:[#allocation2 + $0x198] sm:$0xff] }
  0xd0   : > { %v1160_v52 = vadd.f32 %v1128_v18, %v1063_v25  ;;  %v770_v21 = vadd.f32 %v738_v24, %v641_v0  ;;  %v642_v29 = vmul.f32 %v3368_v26, %v2405_v13  ;;  %v1223_v4 = vmul.f32 %v3957_v14, %v2456_v51 }
  0xd1   : > { %v1448_v59 = vadd.f32 %v1416_v37, %v1351_v61  ;;  %v961_v2 = vadd.f32 %v929_v42, %v861_v35  ;;  %v1032_v22 = vmul.f32 %v3399_v20, %v2441_v41  ;;  %v739_v45 = vmul.f32 %v3370_v23, %v2412_v17 }
  0xd2   : > { %v2144_v7 = vld [vmem:[#allocation2 + $0x180] sm:$0xff]  ;;  %v836_v3 = vmul.f32 %v3385_v39, %v2417_v19  ;;  %v867_v63 = vadd.f32 %v835_v15, %v770_v21  ;;  %v1320_v9 = vmul.f32 %v3958_v50, %v2464_v55  ;;  %v1417_v31 = vmul.f32 %v3959_v6, %v2470_v58 }
  0xd3   : > { %2235 = vmatmul.msk.f32.gmra.mxu2 %vm329_vm2, %v1448_v59  ;;  %v2176_v54 = vld [vmem:[#allocation2 + $0x181] sm:$0xff]  ;;  %v1228_v16 = vmul.f32 %v2144_v7, %v2456_v51  ;;  %v1058_v28 = vadd.f32 %v1026_v10, %v961_v2  ;;  %v1129_v23 = vmul.f32 %v3409_v49, %v2450_v46  ;;  %v771_v32 = vadd.f32 %v739_v45, %v642_v29  ;;  %v2177_v56 = vld [vmem:[#allocation2 + $0x189] sm:$0xff] }
  0xd4   : > { %v1325_v26 = vmul.f32 %v2176_v54, %v2464_v55  ;;  %v2208_v30 = vld [vmem:[#allocation2 + $0x182] sm:$0xff]  ;;  %v967_v37 = vadd.f32 %v935_v12, %v867_v63  ;;  %v936_v53 = vmul.f32 %v2144_v7, %v2439_v40  ;;  %v1033_v33 = vmul.f32 %v2176_v54, %v2441_v41  ;;  %v2209_v1 = vld [vmem:[#allocation2 + $0x18a] sm:$0xff]  ;;  %v2210_v54 = vld [vmem:[#allocation2 + $0x19a] sm:$0xff] }
  0xd5   : > { %v2145_v36 = vld [vmem:[#allocation2 + $0x188] sm:$0xff]  ;;  %v1260_v60 = vadd.f32 %v1228_v16, %v1160_v52  ;;  %v1422_v39 = vmul.f32 %v2208_v30, %v2470_v58  ;;  %v1155_v34 = vadd.f32 %v1123_v11, %v1058_v28  ;;  %v868_v27 = vadd.f32 %v836_v3, %v771_v32  ;;  %v2178_v11 = vld [vmem:[#allocation2 + $0x199] sm:$0xff] }
  0xd6   : > { %v1229_v44 = vmul.f32 %v2145_v36, %v2456_v51  ;;  %v1064_v18 = vadd.f32 %v1032_v22, %v967_v37  ;;  %v1130_v48 = vmul.f32 %v2208_v30, %v2450_v46  ;;  %v643_v38 = vmul.f32 %v3956_v5, %v2405_v13  ;;  %v1577_v13 = vpop.f32.mrf.mxu0  ;;  %v2179_v16 = vld [vmem:[#allocation2 + $0x1a1] sm:$0xff] }
  0xd7   : > { %v1357_v43 = vadd.f32 %v1325_v26, %v1260_v60  ;;  %v1255_v57 = vadd.f32 %v1223_v4, %v1155_v34  ;;  %v968_v25 = vadd.f32 %v936_v53, %v868_v27  ;;  %v740_v42 = vmul.f32 %v3399_v20, %v2412_v17  ;;  %1674 = vst.msk [vmem:[%s3533_s27] sm:$0xff] %vm1673_vm6, %v1577_v13  ;;  %v2147_v4 = vld [vmem:[#allocation2 + $0x1a0] sm:$0xff] }
  0xd8   : > { %v837_v61 = vmul.f32 %v3409_v49, %v2417_v19  ;;  %v1161_v10 = vadd.f32 %v1129_v23, %v1064_v18  ;;  %v1326_v0 = vmul.f32 %v2177_v56, %v2464_v55  ;;  %v937_v52 = vmul.f32 %v2145_v36, %v2439_v40 }
  0xd9   : > { %v1454_v35 = vadd.f32 %v1422_v39, %v1357_v43  ;;  %v1352_v62 = vadd.f32 %v1320_v9, %v1255_v57  ;;  %v1065_v24 = vadd.f32 %v1033_v33, %v968_v25  ;;  %v772_v59 = vadd.f32 %v740_v42, %v643_v38 }
  0xda   : > { %v1261_v19 = vadd.f32 %v1229_v44, %v1161_v10  ;;  %v1423_v49 = vmul.f32 %v2209_v1, %v2470_v58  ;;  %v1230_v20 = vmul.f32 %v2146_v47, %v2456_v51  ;;  %v1034_v40 = vmul.f32 %v2177_v56, %v2441_v41 }
  0xdb   : > { %2241 = vmatmul.msk.f32.gmra.mxu3 %vm329_vm2, %v1454_v35  ;;  %v1449_v17 = vadd.f32 %v1417_v31, %v1352_v62  ;;  %v1162_v8 = vadd.f32 %v1130_v48, %v1065_v24  ;;  %v869_v15 = vadd.f32 %v837_v61, %v772_v59  ;;  %v1327_v29 = vmul.f32 %v2178_v11, %v2464_v55  ;;  %v2211_v31 = vld [vmem:[#allocation2 + $0x1a2] sm:$0xff] }
  0xdc   : > { %v1358_v2 = vadd.f32 %v1326_v0, %v1261_v19  ;;  %v1131_v7 = vmul.f32 %v2209_v1, %v2450_v46  ;;  %v1424_v22 = vmul.f32 %v2210_v54, %v2470_v58  ;;  %v1231_v3 = vmul.f32 %v2147_v4, %v2456_v51 }
  0xdd   : > { %2236 = vmatmul.msk.f32.gmra.mxu2 %vm329_vm2, %v1449_v17  ;;  %v969_v21 = vadd.f32 %v937_v52, %v869_v15  ;;  %v1262_v12 = vadd.f32 %v1230_v20, %v1162_v8  ;;  %v1776_v26 = vmul.f32 %v1577_v13, %v1577_v13  ;;  %v1707_v28 = vsel %vm1673_vm6, %v1577_v13, 0.0 }
  0xde   : > { %v1455_v5 = vadd.f32 %v1423_v49, %v1358_v2  ;;  %v1328_v9 = vmul.f32 %v2179_v16, %v2464_v55  ;;  %v1425_v34 = vmul.f32 %v2211_v31, %v2470_v58 }
  0xdf   : > { %v1066_v14 = vadd.f32 %v1034_v40, %v969_v21  ;;  %v1359_v41 = vadd.f32 %v1327_v29, %v1262_v12  ;;  %v1808_v51 = vsel %vm1673_vm6, %v1776_v26, 0.0 }
  0xe1   : > { %v1163_v45 = vadd.f32 %v1131_v7, %v1066_v14  ;;  %v1456_v36 = vadd.f32 %v1424_v22, %v1359_v41 }
  0xe3   : > { %2242 = vmatmul.msk.f32.gmra.mxu3 %vm329_vm2, %v1455_v5  ;;  %v1263_v50 = vadd.f32 %v1231_v3, %v1163_v45 }
  0xe5   : > { %v1360_v39 = vadd.f32 %v1328_v9, %v1263_v50 }
  0xe6   : > { %v1580_v30 = vpop.f32.mrf.mxu0 }
  0xe7   : > { %1675 = vst.msk [vmem:[%s3533_s27 + $0x8] sm:$0xff] %vm1673_vm6, %v1580_v30  ;;  %v1708_v46 = vsel %vm1673_vm6, %v1580_v30, 0.0  ;;  %v1777_v63 = vmul.f32 %v1580_v30, %v1580_v30  ;;  %v1457_v56 = vadd.f32 %v1425_v34, %v1360_v39 }
  0xe8   : > { %v1709_v6 = vadd.f32 %v1708_v46, %v1707_v28 }
  0xe9   : > { %v1809_v23 = vsel %vm1673_vm6, %v1777_v63, 0.0  ;;  %v3554_v60 = vpop.f32.mrf.mxu1 }
  0xea   : > { %v1810_v32 = vadd.f32 %v1809_v23, %v1808_v51  ;;  %1682 = vst.msk [vmem:[%s3533_s27 + $0x40] sm:$0xff] %vm1673_vm6, %v3554_v60  ;;  %v1784_v54 = vmul.f32 %v3554_v60, %v3554_v60  ;;  %v1722_v3 = vsel %vm1673_vm6, %v3554_v60, 0.0 }
  0xeb   : > { %2243 = vmatmul.msk.f32.gmra.mxu3 %vm329_vm2, %v1456_v36 }
  0xec   : > { %v1823_v63 = vsel %vm1673_vm6, %v1784_v54, 0.0 }
  0xee   : > { %v1583_v55 = vpop.f32.mrf.mxu0 }
  0xef   : > { %1676 = vst.msk [vmem:[%s3533_s27 + $0x10] sm:$0xff] %vm1673_vm6, %v1583_v55  ;;  %v1710_v37 = vsel %vm1673_vm6, %v1583_v55, 0.0  ;;  %v1778_v44 = vmul.f32 %v1583_v55, %v1583_v55 }
  0xf0   : > { %v1711_v27 = vadd.f32 %v1710_v37, %v1709_v6 }
  0xf1   : > { %v1811_v53 = vsel %vm1673_vm6, %v1778_v44, 0.0 }
  0xf2   : > { %v1812_v33 = vadd.f32 %v1811_v53, %v1810_v32  ;;  %v1604_v43 = vpop.f32.mrf.mxu1 }
  0xf3   : > { %2244 = vmatmul.msk.f32.gmra.mxu3 %vm329_vm2, %v1457_v56  ;;  %1683 = vst.msk [vmem:[%s3533_s27 + $0x48] sm:$0xff] %vm1673_vm6, %v1604_v43  ;;  %v1785_v16 = vmul.f32 %v1604_v43, %v1604_v43  ;;  %v1724_v36 = vsel %vm1673_vm6, %v1604_v43, 0.0  ;;  %vm571_vm2 = vcmask 58368  }
  0xf5   : > { %v1825_v31 = vsel %vm1673_vm6, %v1785_v16, 0.0 }
  0xf6   : > { %v1586_v58 = vpop.f32.mrf.mxu0 }
  0xf7   : > { %1677 = vst.msk [vmem:[%s3533_s27 + $0x18] sm:$0xff] %vm1673_vm6, %v1586_v58  ;;  %v1712_v57 = vsel %vm1673_vm6, %v1586_v58, 0.0  ;;  %v1779_v18 = vmul.f32 %v1586_v58, %v1586_v58 }
  0xf8   : > { %v1713_v48 = vadd.f32 %v1712_v57, %v1711_v27 }
  0xf9   : > { %v1813_v1 = vsel %vm1673_vm6, %v1779_v18, 0.0 }
  0xfa   : > { %v1814_v25 = vadd.f32 %v1813_v1, %v1812_v33  ;;  %v1607_v38 = vpop.f32.mrf.mxu1 }
  0xfb   : > { %v3572_v47 = vpop.f32.mrf.mxu2  ;;  %1684 = vst.msk [vmem:[%s3533_s27 + $0x50] sm:$0xff] %vm1673_vm6, %v1607_v38  ;;  %v1786_v50 = vmul.f32 %v1607_v38, %v1607_v38  ;;  %v1726_v51 = vsel %vm1673_vm6, %v1607_v38, 0.0 }
  0xfc   : > { %1690 = vst.msk [vmem:[%s3533_s27 + $0x80] sm:$0xff] %vm1673_vm6, %v3572_v47 }
  0xfd   : > { %v1827_v39 = vsel %vm1673_vm6, %v1786_v50, 0.0 }
  0xfe   : > { %v1589_v42 = vpop.f32.mrf.mxu0 }
  0xff   : > { %1678 = vst.msk [vmem:[%s3533_s27 + $0x20] sm:$0xff] %vm1673_vm6, %v1589_v42  ;;  %v1714_v61 = vsel %vm1673_vm6, %v1589_v42, 0.0  ;;  %v1780_v35 = vmul.f32 %v1589_v42, %v1589_v42 }
 0x100   : > { %v1715_v62 = vadd.f32 %v1714_v61, %v1713_v48 }
 0x101   : > { %v1815_v10 = vsel %vm1673_vm6, %v1780_v35, 0.0 }
 0x102   : > { %v1816_v0 = vadd.f32 %v1815_v10, %v1814_v25 }
 0x104   : > { %v3583_v24 = vpop.f32.mrf.mxu2 }
 0x105   : > { %1691 = vst.msk [vmem:[%s3533_s27 + $0x88] sm:$0xff] %vm1673_vm6, %v3583_v24  ;;  %v1740_v54 = vsel %vm1673_vm6, %v3583_v24, 0.0 }
 0x106   : > { %v1592_v59 = vpop.f32.mrf.mxu0  ;;  %v1610_v52 = vpop.f32.mrf.mxu1 }
 0x107   : > { %1679 = vst.msk [vmem:[%s3533_s27 + $0x28] sm:$0xff] %vm1673_vm6, %v1592_v59  ;;  %v1781_v20 = vmul.f32 %v1592_v59, %v1592_v59  ;;  %v1716_v8 = vsel %vm1673_vm6, %v1592_v59, 0.0  ;;  %v1787_v23 = vmul.f32 %v1610_v52, %v1610_v52  ;;  %v1728_v34 = vsel %vm1673_vm6, %v1610_v52, 0.0 }
 0x108   : > { %1685 = vst.msk [vmem:[%s3533_s27 + $0x58] sm:$0xff] %vm1673_vm6, %v1610_v52  ;;  %v1717_v21 = vadd.f32 %v1716_v8, %v1715_v62 }
 0x109   : > { %v1817_v40 = vsel %vm1673_vm6, %v1781_v20, 0.0  ;;  %v1829_v44 = vsel %vm1673_vm6, %v1787_v23, 0.0 }
 0x10a   : > { %v1818_v12 = vadd.f32 %v1817_v40, %v1816_v0 }
 0x112   : > { %v3592_v13 = vpop.f32.mrf.mxu2 }
 0x113   : > { %1692 = vst.msk [vmem:[%s3533_s27 + $0x90] sm:$0xff] %vm1673_vm6, %v3592_v13 }
 0x119   : > { %v1595_v17 = vpop.f32.mrf.mxu0 }
 0x11a   : > { %1680 = vst.msk [vmem:[%s3533_s27 + $0x30] sm:$0xff] %vm1673_vm6, %v1595_v17  ;;  %v1782_v11 = vmul.f32 %v1595_v17, %v1595_v17  ;;  %v1718_v2 = vsel %vm1673_vm6, %v1595_v17, 0.0 }
 0x11b   : > { %v1613_v19 = vpop.f32.mrf.mxu1  ;;  %v1719_v29 = vadd.f32 %v1718_v2, %v1717_v21  ;;  %v1738_v2 = vsel %vm1673_vm6, %v3572_v47, 0.0  ;;  %v1793_v21 = vmul.f32 %v3583_v24, %v3583_v24 }
 0x11c   : > { %1686 = vst.msk [vmem:[%s3533_s27 + $0x60] sm:$0xff] %vm1673_vm6, %v1613_v19  ;;  %v1819_v5 = vsel %vm1673_vm6, %v1782_v11, 0.0  ;;  %v1788_v53 = vmul.f32 %v1613_v19, %v1613_v19  ;;  %v1730_v43 = vsel %vm1673_vm6, %v1613_v19, 0.0  ;;  %v1792_v19 = vmul.f32 %v3572_v47, %v3572_v47 }
 0x11d   : > { %v1820_v22 = vadd.f32 %v1819_v5, %v1818_v12 }
 0x11e   : > { %v1831_v18 = vsel %vm1673_vm6, %v1788_v53, 0.0 }
 0x125   : > { %v3601_v49 = vpop.f32.mrf.mxu3 }
 0x126   : > { %1698 = vst.msk [vmem:[%s3533_s27 + $0xc0] sm:$0xff] %vm1673_vm6, %v3601_v49  ;;  %v3607_v15 = vpop.f32.mrf.mxu2 }
 0x127   : > { %1693 = vst.msk [vmem:[%s3533_s27 + $0x98] sm:$0xff] %vm1673_vm6, %v3607_v15  ;;  %v1795_v24 = vmul.f32 %v3607_v15, %v3607_v15 }
 0x12b   : > { %v1598_v7 = vpop.f32.mrf.mxu0 }
 0x12c   : > { %1681 = vst.msk [vmem:[%s3533_s27 + $0x38] sm:$0xff] %vm1673_vm6, %v1598_v7  ;;  %v1720_v14 = vsel %vm1673_vm6, %v1598_v7, 0.0  ;;  %v1783_v4 = vmul.f32 %v1598_v7, %v1598_v7  ;;  %v1839_v7 = vsel %vm1673_vm6, %v1792_v19, 0.0 }
 0x12d   : > { %v3620_v41 = vpop.f32.mrf.mxu3  ;;  %v1721_v45 = vadd.f32 %v1720_v14, %v1719_v29  ;;  %v1794_v14 = vmul.f32 %v3592_v13, %v3592_v13 }
 0x12e   : > { %1699 = vst.msk [vmem:[%s3533_s27 + $0xc8] sm:$0xff] %vm1673_vm6, %v3620_v41  ;;  %v1821_v26 = vsel %vm1673_vm6, %v1783_v4, 0.0 }
 0x12f   : > { %v1723_v30 = vadd.f32 %v1722_v3, %v1721_v45  ;;  %v1822_v28 = vadd.f32 %v1821_v26, %v1820_v22  ;;  %v1841_v22 = vsel %vm1673_vm6, %v1793_v21, 0.0  ;;  %v1742_v45 = vsel %vm1673_vm6, %v3592_v13, 0.0 }
 0x130   : > { %v1616_v46 = vpop.f32.mrf.mxu1  ;;  %v3960_v26 = vmov 0.0   ;;  %v1845_v13 = vsel %vm1673_vm6, %v1795_v24, 0.0 }
 0x131   : > { %1687 = vst.msk [vmem:[%s3533_s27 + $0x68] sm:$0xff] %vm1673_vm6, %v1616_v46  ;;  %v1725_v9 = vadd.f32 %v1724_v36, %v1723_v30  ;;  %v1824_v6 = vadd.f32 %v1823_v63, %v1822_v28  ;;  %v1789_v48 = vmul.f32 %v1616_v46, %v1616_v46  ;;  %v1732_v25 = vsel %vm1673_vm6, %v1616_v46, 0.0 }
 0x132   : > { %572 = vst.msk [vmem:[%s3678_s30] sm:$0x3] %vm571_vm2, %v3960_v26  ;;  %v1843_v30 = vsel %vm1673_vm6, %v1794_v14, 0.0  ;;  %v1744_v28 = vsel %vm1673_vm6, %v3607_v15, 0.0 }
 0x133   : > { %v1727_v32 = vadd.f32 %v1726_v51, %v1725_v9  ;;  %v1826_v60 = vadd.f32 %v1825_v31, %v1824_v6  ;;  %v1833_v42 = vsel %vm1673_vm6, %v1789_v48, 0.0 }
 0x135   : > { %v1828_v55 = vadd.f32 %v1827_v39, %v1826_v60  ;;  %v1729_v37 = vadd.f32 %v1728_v34, %v1727_v32 }
 0x137   : > { %v1830_v56 = vadd.f32 %v1829_v44, %v1828_v55  ;;  %v1731_v58 = vadd.f32 %v1730_v43, %v1729_v37  ;;  %v1800_v43 = vmul.f32 %v3601_v49, %v3601_v49 }
 0x139   : > { %v1637_v27 = vpop.f32.mrf.mxu2  ;;  %v1832_v1 = vadd.f32 %v1831_v18, %v1830_v56  ;;  %v1733_v38 = vadd.f32 %v1732_v25, %v1731_v58  ;;  %v1801_v25 = vmul.f32 %v3620_v41, %v3620_v41 }
 0x13a   : > { %1694 = vst.msk [vmem:[%s3533_s27 + $0xa0] sm:$0xff] %vm1673_vm6, %v1637_v27  ;;  %v1796_v46 = vmul.f32 %v1637_v27, %v1637_v27  ;;  %v1746_v9 = vsel %vm1673_vm6, %v1637_v27, 0.0 }
 0x13b   : > { %v1834_v35 = vadd.f32 %v1833_v42, %v1832_v1  ;;  %v1754_v1 = vsel %vm1673_vm6, %v3601_v49, 0.0  ;;  %v1857_v49 = vsel %vm1673_vm6, %v1801_v25, 0.0 }
 0x13c   : > { %v1847_v23 = vsel %vm1673_vm6, %v1796_v46, 0.0 }
 0x13f   : > { %v1619_v33 = vpop.f32.mrf.mxu1 }
 0x140   : > { %1688 = vst.msk [vmem:[%s3533_s27 + $0x70] sm:$0xff] %vm1673_vm6, %v1619_v33  ;;  %v1790_v61 = vmul.f32 %v1619_v33, %v1619_v33  ;;  %v1734_v62 = vsel %vm1673_vm6, %v1619_v33, 0.0 }
 0x141   : > { %v1735_v0 = vadd.f32 %v1734_v62, %v1733_v38  ;;  %v1756_v62 = vsel %vm1673_vm6, %v3620_v41, 0.0 }
 0x142   : > { %v3642_v57 = vpop.f32.mrf.mxu3  ;;  %v1835_v59 = vsel %vm1673_vm6, %v1790_v61, 0.0 }
 0x143   : > { %1700 = vst.msk [vmem:[%s3533_s27 + $0xd0] sm:$0xff] %vm1673_vm6, %v3642_v57  ;;  %v1836_v52 = vadd.f32 %v1835_v59, %v1834_v35  ;;  %v1855_v35 = vsel %vm1673_vm6, %v1800_v43, 0.0 }
 0x148   : > { %v1640_v10 = vpop.f32.mrf.mxu2 }
 0x149   : > { %1695 = vst.msk [vmem:[%s3533_s27 + $0xa8] sm:$0xff] %vm1673_vm6, %v1640_v10  ;;  %v1797_v31 = vmul.f32 %v1640_v10, %v1640_v10  ;;  %v1748_v32 = vsel %vm1673_vm6, %v1640_v10, 0.0  ;;  %v1802_v10 = vmul.f32 %v3642_v57, %v3642_v57 }
 0x14b   : > { %v1622_v17 = vpop.f32.mrf.mxu1  ;;  %v1849_v39 = vsel %vm1673_vm6, %v1797_v31, 0.0  ;;  %v1859_v41 = vsel %vm1673_vm6, %v1802_v10, 0.0 }
 0x14c   : > { %1689 = vst.msk [vmem:[%s3533_s27 + $0x78] sm:$0xff] %vm1673_vm6, %v1622_v17  ;;  %v1736_v20 = vsel %vm1673_vm6, %v1622_v17, 0.0  ;;  %v1791_v8 = vmul.f32 %v1622_v17, %v1622_v17  ;;  %v3659_v11 = vpop.f32.mrf.mxu3  ;;  %v1758_v17 = vsel %vm1673_vm6, %v3642_v57, 0.0 }
 0x14d   : > { %v1737_v40 = vadd.f32 %v1736_v20, %v1735_v0  ;;  %1701 = vst.msk [vmem:[%s3533_s27 + $0xd8] sm:$0xff] %vm1673_vm6, %v3659_v11  ;;  %v1803_v19 = vmul.f32 %v3659_v11, %v3659_v11 }
 0x14e   : > { %v1837_v5 = vsel %vm1673_vm6, %v1791_v8, 0.0 }
 0x14f   : > { %v1739_v12 = vadd.f32 %v1738_v2, %v1737_v40  ;;  %v1838_v29 = vadd.f32 %v1837_v5, %v1836_v52  ;;  %v1760_v40 = vsel %vm1673_vm6, %v3659_v11, 0.0 }
 0x151   : > { %v1741_v47 = vadd.f32 %v1740_v54, %v1739_v12  ;;  %v1840_v4 = vadd.f32 %v1839_v7, %v1838_v29  ;;  %v1861_v12 = vsel %vm1673_vm6, %v1803_v19, 0.0 }
 0x153   : > { %v1743_v3 = vadd.f32 %v1742_v45, %v1741_v47  ;;  %v1842_v16 = vadd.f32 %v1841_v22, %v1840_v4 }
 0x155   : > { %v1844_v63 = vadd.f32 %v1843_v30, %v1842_v16  ;;  %v1745_v36 = vadd.f32 %v1744_v28, %v1743_v3 }
 0x156   : > { %v1643_v50 = vpop.f32.mrf.mxu2 }
 0x157   : > { %1696 = vst.msk [vmem:[%s3533_s27 + $0xb0] sm:$0xff] %vm1673_vm6, %v1643_v50  ;;  %v1747_v6 = vadd.f32 %v1746_v9, %v1745_v36  ;;  %v1846_v51 = vadd.f32 %v1845_v13, %v1844_v63  ;;  %v1798_v34 = vmul.f32 %v1643_v50, %v1643_v50  ;;  %v1750_v37 = vsel %vm1673_vm6, %v1643_v50, 0.0 }
 0x159   : > { %v1848_v15 = vadd.f32 %v1847_v23, %v1846_v51  ;;  %v1749_v60 = vadd.f32 %v1748_v32, %v1747_v6  ;;  %v1851_v27 = vsel %vm1673_vm6, %v1798_v34, 0.0 }
 0x15b   : > { %v1850_v55 = vadd.f32 %v1849_v39, %v1848_v15  ;;  %v1751_v44 = vadd.f32 %v1750_v37, %v1749_v60  ;;  %v1706_v37 = vld [vmem:[%s3678_s30] sm:$0x3] }
 0x15d   : > { %v1852_v53 = vadd.f32 %v1851_v27, %v1850_v55 }
 0x15e   : > { %v1661_v56 = vpop.f32.mrf.mxu3 }
 0x15f   : > { %1702 = vst.msk [vmem:[%s3533_s27 + $0xe0] sm:$0xff] %vm1673_vm6, %v1661_v56  ;;  %v1804_v2 = vmul.f32 %v1661_v56, %v1661_v56  ;;  %v1762_v57 = vsel %vm1673_vm6, %v1661_v56, 0.0 }
 0x160   : > { %v1646_v33 = vpop.f32.mrf.mxu2 }
 0x161   : > { %1697 = vst.msk [vmem:[%s3533_s27 + $0xb8] sm:$0xff] %vm1673_vm6, %v1646_v33  ;;  %v1752_v58 = vsel %vm1673_vm6, %v1646_v33, 0.0  ;;  %v1799_v18 = vmul.f32 %v1646_v33, %v1646_v33  ;;  %v1863_v54 = vsel %vm1673_vm6, %v1804_v2, 0.0 }
 0x162   : > { %v1753_v48 = vadd.f32 %v1752_v58, %v1751_v44 }
 0x163   : > { %v1853_v38 = vsel %vm1673_vm6, %v1799_v18, 0.0 }
 0x164   : > { %v1755_v42 = vadd.f32 %v1754_v1, %v1753_v48  ;;  %v1854_v61 = vadd.f32 %v1853_v38, %v1852_v53 }
 0x166   : > { %v1757_v0 = vadd.f32 %v1756_v62, %v1755_v42  ;;  %v1856_v59 = vadd.f32 %v1855_v35, %v1854_v61  ;;  %v1664_v52 = vpop.f32.mrf.mxu3 }
 0x167   : > { %1703 = vst.msk [vmem:[%s3533_s27 + $0xe8] sm:$0xff] %vm1673_vm6, %v1664_v52  ;;  %v1805_v14 = vmul.f32 %v1664_v52, %v1664_v52  ;;  %v1764_v22 = vsel %vm1673_vm6, %v1664_v52, 0.0 }
 0x168   : > { %v1759_v20 = vadd.f32 %v1758_v17, %v1757_v0  ;;  %v1858_v8 = vadd.f32 %v1857_v49, %v1856_v59 }
 0x169   : > { %v1865_v45 = vsel %vm1673_vm6, %v1805_v14, 0.0 }
 0x16a   : > { %v1860_v21 = vadd.f32 %v1859_v41, %v1858_v8  ;;  %v1761_v5 = vadd.f32 %v1760_v40, %v1759_v20 }
 0x16c   : > { %v1763_v29 = vadd.f32 %v1762_v57, %v1761_v5  ;;  %v1862_v7 = vadd.f32 %v1861_v12, %v1860_v21 }
 0x16e   : > { %v1864_v47 = vadd.f32 %v1863_v54, %v1862_v7  ;;  %v1667_v4 = vpop.f32.mrf.mxu3  ;;  %v1765_v11 = vadd.f32 %v1764_v22, %v1763_v29 }
 0x16f   : > { %1704 = vst.msk [vmem:[%s3533_s27 + $0xf0] sm:$0xff] %vm1673_vm6, %v1667_v4  ;;  %v1806_v24 = vmul.f32 %v1667_v4, %v1667_v4  ;;  %v1766_v16 = vsel %vm1673_vm6, %v1667_v4, 0.0 }
 0x170   : > { %v1866_v3 = vadd.f32 %v1865_v45, %v1864_v47  ;;  %v1767_v26 = vadd.f32 %v1766_v16, %v1765_v11 }
 0x171   : > { %v1867_v30 = vsel %vm1673_vm6, %v1806_v24, 0.0 }
 0x172   : > { %v1868_v28 = vadd.f32 %v1867_v30, %v1866_v3 }
 0x176   : > { %v1670_v46 = vpop.f32.mrf.mxu3 }
 0x177   : > { %1705 = vst.msk [vmem:[%s3533_s27 + $0xf8] sm:$0xff] %vm1673_vm6, %v1670_v46  ;;  %v1768_v63 = vsel %vm1673_vm6, %v1670_v46, 0.0  ;;  %v1807_v36 = vmul.f32 %v1670_v46, %v1670_v46 }
 0x178   : > { %v1769_v50 = vadd.f32 %v1768_v63, %v1767_v26 }
 0x179   : > { %v1869_v13 = vsel %vm1673_vm6, %v1807_v36, 0.0 }
 0x17a   : > { %v1770_v9 = vrot.slane %v1769_v50, 4  ;;  %v1870_v6 = vadd.f32 %v1869_v13, %v1868_v28 }
 0x17c   : > { %v1771_v31 = vadd.f32 %v1770_v9, %v1769_v50  ;;  %v1871_v51 = vrot.slane %v1870_v6, 4 }
 0x17e   : > { %v1772_v23 = vrot.slane %v1771_v31, 2  ;;  %v1872_v32 = vadd.f32 %v1871_v51, %v1870_v6 }
 0x180   : > { %v1773_v15 = vadd.f32 %v1772_v23, %v1771_v31  ;;  %v1873_v60 = vrot.slane %v1872_v32, 2 }
 0x182   : > { %v1774_v39 = vrot.slane %v1773_v15, 1  ;;  %v1874_v34 = vadd.f32 %v1873_v60, %v1872_v32 }
 0x184   : > { %v1875_v55 = vrot.slane %v1874_v34, 1  ;;  %v1775_v44 = vadd.f32 %v1774_v39, %v1773_v15 }
 0x186   : > { %v1876_v56 = vadd.f32 %v1875_v55, %v1874_v34 }
 0x188   : > { %v1878_v27 = vsel %vm1877_vm7, %v1775_v44, %v1876_v56 }
 0x189   : > { %v1879_v53 = vadd.f32 %v1878_v27, %v1706_v37 }
 0x18b   : > { %1881 = vst.msk [vmem:[%s3678_s30] sm:$0x3] %vm571_vm2, %v1879_v53 }
 0x18c PF: > { %s17_s23 = sadd.s32 1, %s2303_s23   ;;  %s3961_s21 = smov %s2299_s22 }
 0x18d   : > { %p14_p5 = scmp.ge.s32.totalorder %s17_s23, 4   ;;  %s3962_s22 = smov %s3964_s24 }
 0x18f   :  { %16 = sbr.rel (!%p14_p5) target bundleno = 2 (0x2), region = 91 }

</bundles_post_ra>
